<compile_context>
chip_gen: v7x
topology: tpu7x:2x2x1
jax: 0.10.0
libtpu: 0.0.40
codegen_flags: <defaults>
</compile_context>

<pallas_src>
from functools import partial

import jax
import jax.numpy as jnp
from jax.experimental import pallas as pl
from jax.experimental.pallas import tpu as pltpu


def _round_up(x, m):
    return (x + m - 1) // m * m


def _physical_vmem_bytes():
    try:
        return int(pltpu.get_tpu_info().vmem_capacity_bytes)
    except Exception:
        return 64 * 1024 * 1024   # conservative default: v7x per-TC VMEM


# ----------------------------- Fused kernel --------------------------------

def _fused_model_kernel(x_ref,
                        wqkv_ref, bqkv_ref, wo_ref, bo_ref,
                        w1_ref, b1_ref, w2_ref, b2_ref,
                        wc_ref, bc_ref,
                        out_ref,
                        *, num_layers, num_heads, compute_dtype):
    BB, S, E = x_ref.shape
    Dh = E // num_heads
    M = BB * S
    scale = 1.0 / (Dh ** 0.5)
    cdt = compute_dtype

    def mm(a, w):
        # 2-D MXU matmul; weights are pre-cast (bf16 by default), activations
        # cast to match, f32 accumulation.
        return jnp.dot(a.astype(w.dtype), w, preferred_element_type=jnp.float32)

    def bmm(a, b, eq):
        # Batched activation-activation matmul (attention), f32 accumulation.
        return jnp.einsum(eq, a.astype(cdt), b.astype(cdt),
                          preferred_element_type=jnp.float32)

    def layernorm(y):
        # elementwise_affine=False, eps=1e-5 (matches torch.nn.LayerNorm cfg)
        mu = jnp.mean(y, axis=-1, keepdims=True)
        var = jnp.mean(jnp.square(y - mu), axis=-1, keepdims=True)
        return (y - mu) * jax.lax.rsqrt(var + 1e-5)

    def layer_body(l, x2):
        # ---- fused QKV projection: one matmul with N = 3E ----
        qkv = mm(x2, wqkv_ref[l]) + bqkv_ref[l]          # (M, 3E) f32
        qkv3 = qkv.reshape(BB, S, 3 * E)
        wo_l = wo_ref[l]                                  # (H, Dh, E)

        # ---- attention; head merge folded into the output projection ----
        attn = jnp.zeros((M, E), jnp.float32)
        for h in range(num_heads):
            q_h = qkv3[:, :, h * Dh:(h + 1) * Dh]
            k_h = qkv3[:, :, E + h * Dh:E + (h + 1) * Dh]
            v_h = qkv3[:, :, 2 * E + h * Dh:2 * E + (h + 1) * Dh]
            s = bmm(q_h, k_h, "bqd,bkd->bqk") * scale     # (BB, S, S) f32
            p = jnp.exp(s - jnp.max(s, axis=-1, keepdims=True))
            p = p * pl.reciprocal(jnp.sum(p, axis=-1, keepdims=True),
                                  approx=True)
            o_h = bmm(p, v_h, "bqk,bkd->bqd")             # (BB, S, Dh) f32
            # Accumulate o_h @ Wo[h] directly -> no per-head VMEM stores.
            attn = attn + mm(o_h.reshape(M, Dh), wo_l[h])
        x2 = layernorm(x2 + attn + bo_ref[l])

        # ---- MLP ----
        h1 = jnp.maximum(mm(x2, w1_ref[l]) + b1_ref[l], 0.0)
        x2 = layernorm(x2 + mm(h1, w2_ref[l]) + b2_ref[l])
        return x2

    x2 = x_ref[...].astype(jnp.float32).reshape(M, E)
    if num_layers <= 4:
        for l in range(num_layers):                       # static unroll
            x2 = layer_body(l, x2)
    else:
        # Deep models: bound live ranges / instruction count.
        x2 = jax.lax.fori_loop(0, num_layers, layer_body, x2)

    # ---- cls head into a 128-lane padded slab (lane-dense store) ----
    logits = mm(x2, wc_ref[...]) + bc_ref[...]
    out_ref[...] = logits.reshape(BB, S, -1).astype(out_ref.dtype)


# ------------------------------ Wrapper -------------------------------------

def radioml_transformer_forward(x, kparams, *, num_heads, num_layers,
                                num_classes, batch_block=None,
                                single_buffer_weights=True):
    """x: (B, S, E) float32 -> (B, S, num_classes) float32."""
    B, S, E = x.shape
    assert E % num_heads == 0
    Cpad = kparams["wc"].shape[1]
    F = kparams["w1"].shape[2]

    names = ("wqkv", "bqkv", "wo", "bo", "w1", "b1", "w2", "b2", "wc", "bc")
    weights = [kparams[n] for n in names]

    weight_bytes = sum(int(w.size) * w.dtype.itemsize for w in weights)
    if not single_buffer_weights:
        weight_bytes *= 2        # default pipeline double-buffers every input

    def est_bytes(bb):
        io = 2 * bb * S * (E + Cpad) * 4          # double-buffered x / out blocks
        # live f32 activations: x2, qkv, attn acc, mlp hidden, one head's
        # scores+probs, residual temporaries
        act = 4 * bb * S * (E + 3 * E + E + F + 2 * S + 2 * E)
        return weight_bytes + io + act

    phys = _physical_vmem_bytes()
    budget = int(0.7 * phys)

    if batch_block is None:
        divs = [d for d in range(B, 0, -1) if B % d == 0]
        # Prefer >= 2 grid steps so the "parallel" axis can split across both
        # v7x TensorCores; the extra grid step is essentially free on 1-TC
        # chips (v5e/v6e).
        prefer = [d for d in divs if B // d >= 2] or divs
        batch_block = next((d for d in prefer if est_bytes(d) <= budget),
                           next((d for d in divs if est_bytes(d) <= budget), 1))
        # TODO(synk): flash-style query tiling for very large S where even
        # batch_block=1 exceeds the VMEM budget.
    assert B % batch_block == 0
    grid = (B // batch_block,)

    vmem_limit = int(min(0.9 * phys,
                         max(est_bytes(batch_block) + (4 << 20), 32 << 20)))

    def const_spec(arr):
        nd = arr.ndim
        idx = lambda i, _nd=nd: (0,) * _nd
        if single_buffer_weights:
            # Weights never change across grid steps -> keep one VMEM copy.
            try:
                return pl.BlockSpec(arr.shape, idx,
                                    pipeline_mode=pl.Buffered(1))
            except TypeError:
                pass
        return pl.BlockSpec(arr.shape, idx)

    in_specs = ([pl.BlockSpec((batch_block, S, E), lambda i: (i, 0, 0))]
                + [const_spec(w) for w in weights])
    out_spec = pl.BlockSpec((batch_block, S, Cpad), lambda i: (i, 0, 0))

    out = pl.pallas_call(
        partial(_fused_model_kernel, num_layers=num_layers,
                num_heads=num_heads, compute_dtype=kparams["wqkv"].dtype),
        out_shape=jax.ShapeDtypeStruct((B, S, Cpad), jnp.float32),
        grid=grid,
        in_specs=in_specs,
        out_specs=out_spec,
        compiler_params=pltpu.CompilerParams(
            dimension_semantics=("parallel",),
            vmem_limit_bytes=vmem_limit),
    )(x, *weights)
    return out[..., :num_classes]


# --------------------------- Param preparation ------------------------------

def init_params(key, num_layers, emb_dim, mlp_dim, num_classes):
    """Random params in PyTorch layout: Linear weight (out, in), bias (out,)."""
    def dense(k, out_f, in_f):
        kw, kb = jax.random.split(k)
        w = 0.02 * jax.random.normal(kw, (out_f, in_f), jnp.float32)
        b = 0.01 * jax.random.normal(kb, (out_f,), jnp.float32)
        return w, b

    layers = []
    for _ in range(num_layers):
        key, *ks = jax.random.split(key, 7)
        wq, bq = dense(ks[0], emb_dim, emb_dim)
        wk, bk = dense(ks[1], emb_dim, emb_dim)
        wv, bv = dense(ks[2], emb_dim, emb_dim)
        wo, bo = dense(ks[3], emb_dim, emb_dim)
        w1, b1 = dense(ks[4], mlp_dim, emb_dim)
        w2, b2 = dense(ks[5], emb_dim, mlp_dim)
        layers.append(dict(wq=wq, bq=bq, wk=wk, bk=bk, wv=wv, bv=bv,
                           wo=wo, bo=bo, w1=w1, b1=b1, w2=w2, b2=b2))
    key, kc = jax.random.split(key)
    wc, bc = dense(kc, num_classes, emb_dim)
    return dict(layers=layers, wc=wc, bc=bc)


def prepare_kernel_params(params, num_heads, num_classes,
                          compute_dtype=jnp.bfloat16):
    """One-time conversion to kernel layout:
       - QKV fused & transposed to (L, E, 3E); biases (L, 1, 3E)
       - out-proj as (L, H, Dh, E) so the head merge folds into it
       - MLP weights transposed to (in, out)
       - matmul weights pre-cast to compute_dtype (bf16); biases stay f32
       - cls head padded to a 128-lane slab."""
    layers = params["layers"]
    E = layers[0]["wq"].shape[1]
    H = num_heads
    Dh = E // H

    def stack(fn):
        return jnp.stack([fn(lp) for lp in layers])

    kp = dict(
        wqkv=stack(lambda lp: jnp.concatenate(
            [lp["wq"].T, lp["wk"].T, lp["wv"].T], axis=1)).astype(compute_dtype),
        bqkv=stack(lambda lp: jnp.concatenate(
            [lp["bq"], lp["bk"], lp["bv"]]).reshape(1, -1)).astype(jnp.float32),
        wo=stack(lambda lp: lp["wo"].T.reshape(H, Dh, E)).astype(compute_dtype),
        bo=stack(lambda lp: lp["bo"].reshape(1, -1)).astype(jnp.float32),
        w1=stack(lambda lp: lp["w1"].T).astype(compute_dtype),
        b1=stack(lambda lp: lp["b1"].reshape(1, -1)).astype(jnp.float32),
        w2=stack(lambda lp: lp["w2"].T).astype(compute_dtype),
        b2=stack(lambda lp: lp["b2"].reshape(1, -1)).astype(jnp.float32),
    )
    wc_t = params["wc"].T                         # (E, C)
    bc = params["bc"].reshape(1, -1)              # (1, C)
    C = wc_t.shape[1]
    Cpad = max(128, _round_up(C, 128))
    kp["wc"] = jnp.zeros((E, Cpad), jnp.float32).at[:, :C].set(
        wc_t).astype(compute_dtype)
    kp["bc"] = jnp.zeros((1, Cpad), jnp.float32).at[:, :C].set(bc)
    return kp


# ----------------------------- Pure-JAX reference ---------------------------

def reference_forward(x, params, num_heads):
    def linear(y, w, b):
        return y @ w.T + b

    def ln(y):
        mu = y.mean(-1, keepdims=True)
        var = ((y - mu) ** 2).mean(-1, keepdims=True)
        return (y - mu) * jax.lax.rsqrt(var + 1e-5)

    B, S, E = x.shape
    H = num_heads
    Dh = E // H
    for lp in params["layers"]:
        q = linear(x, lp["wq"], lp["bq"]).reshape(B, S, H, Dh).transpose(0, 2, 1, 3)
        k = linear(x, lp["wk"], lp["bk"]).reshape(B, S, H, Dh).transpose(0, 2, 1, 3)
        v = linear(x, lp["wv"], lp["bv"]).reshape(B, S, H, Dh).transpose(0, 2, 1, 3)
        s = (q @ k.transpose(0, 1, 3, 2)) / (Dh ** 0.5)
        p = jax.nn.softmax(s, axis=-1)
        o = (p @ v).transpose(0, 2, 1, 3).reshape(B, S, E)
        x = ln(x + linear(o, lp["wo"], lp["bo"]))
        h1 = jax.nn.relu(linear(x, lp["w1"], lp["b1"]))
        x = ln(x + linear(h1, lp["w2"], lp["b2"]))
    return linear(x, params["wc"], params["bc"])


# ---------------------------------- Main -------------------------------------

if __name__ == "__main__":
    B, S, E = 2, 8, 32
    num_heads = 4
    mlp_dim = 64
    num_classes = 8
    num_layers = 2

    key = jax.random.PRNGKey(0)
    kx, kp = jax.random.split(key)
    x = jax.random.normal(kx, (B, S, E), jnp.float32)
    params = init_params(kp, num_layers, E, mlp_dim, num_classes)
    kparams = prepare_kernel_params(params, num_heads, num_classes)

    def run(single_buffer_weights):
        fwd = jax.jit(partial(radioml_transformer_forward,
                              num_heads=num_heads, num_layers=num_layers,
                              num_classes=num_classes,
                              single_buffer_weights=single_buffer_weights))
        return jax.block_until_ready(fwd(x, kparams))

    try:
        out = run(True)
    except Exception:
        # Fallback: default (double-buffered) weight specs.
        out = run(False)

    assert out.shape == (B, S, num_classes), out.shape
    assert bool(jnp.all(jnp.isfinite(out)))

    # Loose tolerance: bf16 MXU operands + approx reciprocal in softmax.
    ref = reference_forward(x, params, num_heads)
    err = float(jnp.max(jnp.abs(out - ref)))
    assert err < 5e-2, f"max abs error vs reference = {err}"

    print("KERNEL_OK")
</pallas_src>

<mosaic_0001>
module attributes {stable_mosaic.version = 11 : i64} {
  func.func @_fused_model_kernel(%arg0: i32, %arg1: memref<1x8x32xf32, #tpu.memory_space<vmem>>, %arg2: memref<2x32x96xbf16, #tpu.memory_space<vmem>>, %arg3: memref<2x1x96xf32, #tpu.memory_space<vmem>>, %arg4: memref<2x4x8x32xbf16, #tpu.memory_space<vmem>>, %arg5: memref<2x1x32xf32, #tpu.memory_space<vmem>>, %arg6: memref<2x32x64xbf16, #tpu.memory_space<vmem>>, %arg7: memref<2x1x64xf32, #tpu.memory_space<vmem>>, %arg8: memref<2x64x32xbf16, #tpu.memory_space<vmem>>, %arg9: memref<2x1x32xf32, #tpu.memory_space<vmem>>, %arg10: memref<32x128xbf16, #tpu.memory_space<vmem>>, %arg11: memref<1x128xf32, #tpu.memory_space<vmem>>, %arg12: memref<1x8x128xf32, #tpu.memory_space<vmem>>) attributes {dimension_semantics = [#tpu.dimension_semantics<parallel>], iteration_bounds = array<i64: 2>, scalar_prefetch = 0 : i64, scratch_operands = 0 : i64, tpu.core_type = #tpu.core_type<tc>, window_params = [{transform_indices = @transform_0, window_bounds = array<i64: 1, 8, 32>}, {pipeline_mode = #tpu.pipeline_mode<synchronous>, transform_indices = @transform_1, window_bounds = array<i64: 2, 32, 96>}, {pipeline_mode = #tpu.pipeline_mode<synchronous>, transform_indices = @transform_2, window_bounds = array<i64: 2, 1, 96>}, {pipeline_mode = #tpu.pipeline_mode<synchronous>, transform_indices = @transform_3, window_bounds = array<i64: 2, 4, 8, 32>}, {pipeline_mode = #tpu.pipeline_mode<synchronous>, transform_indices = @transform_4, window_bounds = array<i64: 2, 1, 32>}, {pipeline_mode = #tpu.pipeline_mode<synchronous>, transform_indices = @transform_5, window_bounds = array<i64: 2, 32, 64>}, {pipeline_mode = #tpu.pipeline_mode<synchronous>, transform_indices = @transform_6, window_bounds = array<i64: 2, 1, 64>}, {pipeline_mode = #tpu.pipeline_mode<synchronous>, transform_indices = @transform_7, window_bounds = array<i64: 2, 64, 32>}, {pipeline_mode = #tpu.pipeline_mode<synchronous>, transform_indices = @transform_8, window_bounds = array<i64: 2, 1, 32>}, {pipeline_mode = #tpu.pipeline_mode<synchronous>, transform_indices = @transform_9, window_bounds = array<i64: 32, 128>}, {pipeline_mode = #tpu.pipeline_mode<synchronous>, transform_indices = @transform_10, window_bounds = array<i64: 1, 128>}, {transform_indices = @transform_11, window_bounds = array<i64: 1, 8, 128>}]} {
    %c0 = arith.constant 0 : index
    %c0_0 = arith.constant 0 : index
    %c0_1 = arith.constant 0 : index
    %0 = vector.load %arg1[%c0, %c0_0, %c0_1] : memref<1x8x32xf32, #tpu.memory_space<vmem>>, vector<1x8x32xf32>
    %1 = vector.shape_cast %0 : vector<1x8x32xf32> to vector<8x32xf32>
    %c0_2 = arith.constant 0 : index
    %c0_3 = arith.constant 0 : index
    %c0_4 = arith.constant 0 : index
    %2 = vector.load %arg2[%c0_2, %c0_3, %c0_4] : memref<2x32x96xbf16, #tpu.memory_space<vmem>>, vector<1x32x96xbf16>
    %3 = vector.shape_cast %2 : vector<1x32x96xbf16> to vector<32x96xbf16>
    %4 = arith.truncf %1 : vector<8x32xf32> to vector<8x32xbf16>
    %cst = arith.constant dense<0.000000e+00> : vector<8x96xf32>
    %5 = tpu.matmul %4, %3, %cst {dimension_numbers = #tpu.dot_dimension_numbers<[1], [0], [0], [1], [0, 0, 1, 1], [], []>} : vector<8x32xbf16>, vector<32x96xbf16>, vector<8x96xf32> -> vector<8x96xf32>
    %c0_5 = arith.constant 0 : index
    %c0_6 = arith.constant 0 : index
    %c0_7 = arith.constant 0 : index
    %6 = vector.load %arg3[%c0_5, %c0_6, %c0_7] : memref<2x1x96xf32, #tpu.memory_space<vmem>>, vector<1x1x96xf32>
    %7 = vector.shape_cast %6 : vector<1x1x96xf32> to vector<1x96xf32>
    %8 = vector.broadcast %7 : vector<1x96xf32> to vector<8x96xf32>
    %9 = arith.addf %5, %8 : vector<8x96xf32>
    %10 = vector.shape_cast %9 : vector<8x96xf32> to vector<1x8x96xf32>
    %c0_8 = arith.constant 0 : index
    %c0_9 = arith.constant 0 : index
    %c0_10 = arith.constant 0 : index
    %c0_11 = arith.constant 0 : index
    %11 = vector.load %arg4[%c0_8, %c0_9, %c0_10, %c0_11] : memref<2x4x8x32xbf16, #tpu.memory_space<vmem>>, vector<1x4x8x32xbf16>
    %12 = vector.shape_cast %11 : vector<1x4x8x32xbf16> to vector<4x8x32xbf16>
    %cst_12 = arith.constant 0.000000e+00 : f32
    %13 = vector.broadcast %cst_12 : f32 to vector<8x32xf32>
    %14 = vector.extract_strided_slice %10 {offsets = [0, 0, 0], sizes = [1, 8, 8], strides = [1, 1, 1]} : vector<1x8x96xf32> to vector<1x8x8xf32>
    %15 = vector.extract_strided_slice %10 {offsets = [0, 0, 32], sizes = [1, 8, 8], strides = [1, 1, 1]} : vector<1x8x96xf32> to vector<1x8x8xf32>
    %16 = vector.extract_strided_slice %10 {offsets = [0, 0, 64], sizes = [1, 8, 8], strides = [1, 1, 1]} : vector<1x8x96xf32> to vector<1x8x8xf32>
    %17 = arith.truncf %14 : vector<1x8x8xf32> to vector<1x8x8xbf16>
    %18 = arith.truncf %15 : vector<1x8x8xf32> to vector<1x8x8xbf16>
    "tpu.trace_start"() <{level = 10 : i32, message = "bqd,bkd->bqk"}> : () -> ()
    %cst_13 = arith.constant dense<0.000000e+00> : vector<1x8x8xf32>
    %19 = tpu.matmul %17, %18, %cst_13 {dimension_numbers = #tpu.dot_dimension_numbers<[2], [2], [1], [1], [0, 0, 0, 1, 1, 1], [0], [0]>} : vector<1x8x8xbf16>, vector<1x8x8xbf16>, vector<1x8x8xf32> -> vector<1x8x8xf32>
    "tpu.trace_stop"() : () -> ()
    %cst_14 = arith.constant 0.353553385 : f32
    %20 = vector.broadcast %cst_14 : f32 to vector<1x8x8xf32>
    %21 = arith.mulf %19, %20 : vector<1x8x8xf32>
    %cst_15 = arith.constant dense<0xFF800000> : vector<1x8xf32>
    %22 = vector.multi_reduction <maximumf>, %21, %cst_15 [2] : vector<1x8x8xf32> to vector<1x8xf32>
    %23 = vector.shape_cast %22 : vector<1x8xf32> to vector<1x8x1xf32>
    %24 = vector.broadcast %23 : vector<1x8x1xf32> to vector<1x8x8xf32>
    %25 = arith.subf %21, %24 : vector<1x8x8xf32>
    %26 = math.exp %25 : vector<1x8x8xf32>
    %cst_16 = arith.constant dense<0.000000e+00> : vector<1x8xf32>
    %27 = vector.multi_reduction <add>, %26, %cst_16 [2] : vector<1x8x8xf32> to vector<1x8xf32>
    %28 = vector.shape_cast %27 : vector<1x8xf32> to vector<1x8x1xf32>
    %29 = tpu.reciprocal %28 {approx = true} : vector<1x8x1xf32> -> vector<1x8x1xf32>
    %30 = vector.broadcast %29 : vector<1x8x1xf32> to vector<1x8x8xf32>
    %31 = arith.mulf %26, %30 : vector<1x8x8xf32>
    %32 = arith.truncf %31 : vector<1x8x8xf32> to vector<1x8x8xbf16>
    %33 = arith.truncf %16 : vector<1x8x8xf32> to vector<1x8x8xbf16>
    "tpu.trace_start"() <{level = 10 : i32, message = "bqk,bkd->bqd"}> : () -> ()
    %cst_17 = arith.constant dense<0.000000e+00> : vector<1x8x8xf32>
    %34 = tpu.matmul %32, %33, %cst_17 {dimension_numbers = #tpu.dot_dimension_numbers<[2], [1], [1], [2], [0, 0, 0, 1, 1, 2], [0], [0]>} : vector<1x8x8xbf16>, vector<1x8x8xbf16>, vector<1x8x8xf32> -> vector<1x8x8xf32>
    "tpu.trace_stop"() : () -> ()
    %35 = vector.shape_cast %34 : vector<1x8x8xf32> to vector<8x8xf32>
    %36 = vector.extract_strided_slice %12 {offsets = [0, 0, 0], sizes = [1, 8, 32], strides = [1, 1, 1]} : vector<4x8x32xbf16> to vector<1x8x32xbf16>
    %37 = vector.shape_cast %36 : vector<1x8x32xbf16> to vector<8x32xbf16>
    %38 = arith.truncf %35 : vector<8x8xf32> to vector<8x8xbf16>
    %cst_18 = arith.constant dense<0.000000e+00> : vector<8x32xf32>
    %39 = tpu.matmul %38, %37, %cst_18 {dimension_numbers = #tpu.dot_dimension_numbers<[1], [0], [0], [1], [0, 0, 1, 1], [], []>} : vector<8x8xbf16>, vector<8x32xbf16>, vector<8x32xf32> -> vector<8x32xf32>
    %40 = arith.addf %13, %39 : vector<8x32xf32>
    %41 = vector.extract_strided_slice %10 {offsets = [0, 0, 8], sizes = [1, 8, 8], strides = [1, 1, 1]} : vector<1x8x96xf32> to vector<1x8x8xf32>
    %42 = vector.extract_strided_slice %10 {offsets = [0, 0, 40], sizes = [1, 8, 8], strides = [1, 1, 1]} : vector<1x8x96xf32> to vector<1x8x8xf32>
    %43 = vector.extract_strided_slice %10 {offsets = [0, 0, 72], sizes = [1, 8, 8], strides = [1, 1, 1]} : vector<1x8x96xf32> to vector<1x8x8xf32>
    %44 = arith.truncf %41 : vector<1x8x8xf32> to vector<1x8x8xbf16>
    %45 = arith.truncf %42 : vector<1x8x8xf32> to vector<1x8x8xbf16>
    "tpu.trace_start"() <{level = 10 : i32, message = "bqd,bkd->bqk"}> : () -> ()
    %cst_19 = arith.constant dense<0.000000e+00> : vector<1x8x8xf32>
    %46 = tpu.matmul %44, %45, %cst_19 {dimension_numbers = #tpu.dot_dimension_numbers<[2], [2], [1], [1], [0, 0, 0, 1, 1, 1], [0], [0]>} : vector<1x8x8xbf16>, vector<1x8x8xbf16>, vector<1x8x8xf32> -> vector<1x8x8xf32>
    "tpu.trace_stop"() : () -> ()
    %cst_20 = arith.constant 0.353553385 : f32
    %47 = vector.broadcast %cst_20 : f32 to vector<1x8x8xf32>
    %48 = arith.mulf %46, %47 : vector<1x8x8xf32>
    %cst_21 = arith.constant dense<0xFF800000> : vector<1x8xf32>
    %49 = vector.multi_reduction <maximumf>, %48, %cst_21 [2] : vector<1x8x8xf32> to vector<1x8xf32>
    %50 = vector.shape_cast %49 : vector<1x8xf32> to vector<1x8x1xf32>
    %51 = vector.broadcast %50 : vector<1x8x1xf32> to vector<1x8x8xf32>
    %52 = arith.subf %48, %51 : vector<1x8x8xf32>
    %53 = math.exp %52 : vector<1x8x8xf32>
    %cst_22 = arith.constant dense<0.000000e+00> : vector<1x8xf32>
    %54 = vector.multi_reduction <add>, %53, %cst_22 [2] : vector<1x8x8xf32> to vector<1x8xf32>
    %55 = vector.shape_cast %54 : vector<1x8xf32> to vector<1x8x1xf32>
    %56 = tpu.reciprocal %55 {approx = true} : vector<1x8x1xf32> -> vector<1x8x1xf32>
    %57 = vector.broadcast %56 : vector<1x8x1xf32> to vector<1x8x8xf32>
    %58 = arith.mulf %53, %57 : vector<1x8x8xf32>
    %59 = arith.truncf %58 : vector<1x8x8xf32> to vector<1x8x8xbf16>
    %60 = arith.truncf %43 : vector<1x8x8xf32> to vector<1x8x8xbf16>
    "tpu.trace_start"() <{level = 10 : i32, message = "bqk,bkd->bqd"}> : () -> ()
    %cst_23 = arith.constant dense<0.000000e+00> : vector<1x8x8xf32>
    %61 = tpu.matmul %59, %60, %cst_23 {dimension_numbers = #tpu.dot_dimension_numbers<[2], [1], [1], [2], [0, 0, 0, 1, 1, 2], [0], [0]>} : vector<1x8x8xbf16>, vector<1x8x8xbf16>, vector<1x8x8xf32> -> vector<1x8x8xf32>
    "tpu.trace_stop"() : () -> ()
    %62 = vector.shape_cast %61 : vector<1x8x8xf32> to vector<8x8xf32>
    %63 = vector.extract_strided_slice %12 {offsets = [1, 0, 0], sizes = [1, 8, 32], strides = [1, 1, 1]} : vector<4x8x32xbf16> to vector<1x8x32xbf16>
    %64 = vector.shape_cast %63 : vector<1x8x32xbf16> to vector<8x32xbf16>
    %65 = arith.truncf %62 : vector<8x8xf32> to vector<8x8xbf16>
    %cst_24 = arith.constant dense<0.000000e+00> : vector<8x32xf32>
    %66 = tpu.matmul %65, %64, %cst_24 {dimension_numbers = #tpu.dot_dimension_numbers<[1], [0], [0], [1], [0, 0, 1, 1], [], []>} : vector<8x8xbf16>, vector<8x32xbf16>, vector<8x32xf32> -> vector<8x32xf32>
    %67 = arith.addf %40, %66 : vector<8x32xf32>
    %68 = vector.extract_strided_slice %10 {offsets = [0, 0, 16], sizes = [1, 8, 8], strides = [1, 1, 1]} : vector<1x8x96xf32> to vector<1x8x8xf32>
    %69 = vector.extract_strided_slice %10 {offsets = [0, 0, 48], sizes = [1, 8, 8], strides = [1, 1, 1]} : vector<1x8x96xf32> to vector<1x8x8xf32>
    %70 = vector.extract_strided_slice %10 {offsets = [0, 0, 80], sizes = [1, 8, 8], strides = [1, 1, 1]} : vector<1x8x96xf32> to vector<1x8x8xf32>
    %71 = arith.truncf %68 : vector<1x8x8xf32> to vector<1x8x8xbf16>
    %72 = arith.truncf %69 : vector<1x8x8xf32> to vector<1x8x8xbf16>
    "tpu.trace_start"() <{level = 10 : i32, message = "bqd,bkd->bqk"}> : () -> ()
    %cst_25 = arith.constant dense<0.000000e+00> : vector<1x8x8xf32>
    %73 = tpu.matmul %71, %72, %cst_25 {dimension_numbers = #tpu.dot_dimension_numbers<[2], [2], [1], [1], [0, 0, 0, 1, 1, 1], [0], [0]>} : vector<1x8x8xbf16>, vector<1x8x8xbf16>, vector<1x8x8xf32> -> vector<1x8x8xf32>
    "tpu.trace_stop"() : () -> ()
    %cst_26 = arith.constant 0.353553385 : f32
    %74 = vector.broadcast %cst_26 : f32 to vector<1x8x8xf32>
    %75 = arith.mulf %73, %74 : vector<1x8x8xf32>
    %cst_27 = arith.constant dense<0xFF800000> : vector<1x8xf32>
    %76 = vector.multi_reduction <maximumf>, %75, %cst_27 [2] : vector<1x8x8xf32> to vector<1x8xf32>
    %77 = vector.shape_cast %76 : vector<1x8xf32> to vector<1x8x1xf32>
    %78 = vector.broadcast %77 : vector<1x8x1xf32> to vector<1x8x8xf32>
    %79 = arith.subf %75, %78 : vector<1x8x8xf32>
    %80 = math.exp %79 : vector<1x8x8xf32>
    %cst_28 = arith.constant dense<0.000000e+00> : vector<1x8xf32>
    %81 = vector.multi_reduction <add>, %80, %cst_28 [2] : vector<1x8x8xf32> to vector<1x8xf32>
    %82 = vector.shape_cast %81 : vector<1x8xf32> to vector<1x8x1xf32>
    %83 = tpu.reciprocal %82 {approx = true} : vector<1x8x1xf32> -> vector<1x8x1xf32>
    %84 = vector.broadcast %83 : vector<1x8x1xf32> to vector<1x8x8xf32>
    %85 = arith.mulf %80, %84 : vector<1x8x8xf32>
    %86 = arith.truncf %85 : vector<1x8x8xf32> to vector<1x8x8xbf16>
    %87 = arith.truncf %70 : vector<1x8x8xf32> to vector<1x8x8xbf16>
    "tpu.trace_start"() <{level = 10 : i32, message = "bqk,bkd->bqd"}> : () -> ()
    %cst_29 = arith.constant dense<0.000000e+00> : vector<1x8x8xf32>
    %88 = tpu.matmul %86, %87, %cst_29 {dimension_numbers = #tpu.dot_dimension_numbers<[2], [1], [1], [2], [0, 0, 0, 1, 1, 2], [0], [0]>} : vector<1x8x8xbf16>, vector<1x8x8xbf16>, vector<1x8x8xf32> -> vector<1x8x8xf32>
    "tpu.trace_stop"() : () -> ()
    %89 = vector.shape_cast %88 : vector<1x8x8xf32> to vector<8x8xf32>
    %90 = vector.extract_strided_slice %12 {offsets = [2, 0, 0], sizes = [1, 8, 32], strides = [1, 1, 1]} : vector<4x8x32xbf16> to vector<1x8x32xbf16>
    %91 = vector.shape_cast %90 : vector<1x8x32xbf16> to vector<8x32xbf16>
    %92 = arith.truncf %89 : vector<8x8xf32> to vector<8x8xbf16>
    %cst_30 = arith.constant dense<0.000000e+00> : vector<8x32xf32>
    %93 = tpu.matmul %92, %91, %cst_30 {dimension_numbers = #tpu.dot_dimension_numbers<[1], [0], [0], [1], [0, 0, 1, 1], [], []>} : vector<8x8xbf16>, vector<8x32xbf16>, vector<8x32xf32> -> vector<8x32xf32>
    %94 = arith.addf %67, %93 : vector<8x32xf32>
    %95 = vector.extract_strided_slice %10 {offsets = [0, 0, 24], sizes = [1, 8, 8], strides = [1, 1, 1]} : vector<1x8x96xf32> to vector<1x8x8xf32>
    %96 = vector.extract_strided_slice %10 {offsets = [0, 0, 56], sizes = [1, 8, 8], strides = [1, 1, 1]} : vector<1x8x96xf32> to vector<1x8x8xf32>
    %97 = vector.extract_strided_slice %10 {offsets = [0, 0, 88], sizes = [1, 8, 8], strides = [1, 1, 1]} : vector<1x8x96xf32> to vector<1x8x8xf32>
    %98 = arith.truncf %95 : vector<1x8x8xf32> to vector<1x8x8xbf16>
    %99 = arith.truncf %96 : vector<1x8x8xf32> to vector<1x8x8xbf16>
    "tpu.trace_start"() <{level = 10 : i32, message = "bqd,bkd->bqk"}> : () -> ()
    %cst_31 = arith.constant dense<0.000000e+00> : vector<1x8x8xf32>
    %100 = tpu.matmul %98, %99, %cst_31 {dimension_numbers = #tpu.dot_dimension_numbers<[2], [2], [1], [1], [0, 0, 0, 1, 1, 1], [0], [0]>} : vector<1x8x8xbf16>, vector<1x8x8xbf16>, vector<1x8x8xf32> -> vector<1x8x8xf32>
    "tpu.trace_stop"() : () -> ()
    %cst_32 = arith.constant 0.353553385 : f32
    %101 = vector.broadcast %cst_32 : f32 to vector<1x8x8xf32>
    %102 = arith.mulf %100, %101 : vector<1x8x8xf32>
    %cst_33 = arith.constant dense<0xFF800000> : vector<1x8xf32>
    %103 = vector.multi_reduction <maximumf>, %102, %cst_33 [2] : vector<1x8x8xf32> to vector<1x8xf32>
    %104 = vector.shape_cast %103 : vector<1x8xf32> to vector<1x8x1xf32>
    %105 = vector.broadcast %104 : vector<1x8x1xf32> to vector<1x8x8xf32>
    %106 = arith.subf %102, %105 : vector<1x8x8xf32>
    %107 = math.exp %106 : vector<1x8x8xf32>
    %cst_34 = arith.constant dense<0.000000e+00> : vector<1x8xf32>
    %108 = vector.multi_reduction <add>, %107, %cst_34 [2] : vector<1x8x8xf32> to vector<1x8xf32>
    %109 = vector.shape_cast %108 : vector<1x8xf32> to vector<1x8x1xf32>
    %110 = tpu.reciprocal %109 {approx = true} : vector<1x8x1xf32> -> vector<1x8x1xf32>
    %111 = vector.broadcast %110 : vector<1x8x1xf32> to vector<1x8x8xf32>
    %112 = arith.mulf %107, %111 : vector<1x8x8xf32>
    %113 = arith.truncf %112 : vector<1x8x8xf32> to vector<1x8x8xbf16>
    %114 = arith.truncf %97 : vector<1x8x8xf32> to vector<1x8x8xbf16>
    "tpu.trace_start"() <{level = 10 : i32, message = "bqk,bkd->bqd"}> : () -> ()
    %cst_35 = arith.constant dense<0.000000e+00> : vector<1x8x8xf32>
    %115 = tpu.matmul %113, %114, %cst_35 {dimension_numbers = #tpu.dot_dimension_numbers<[2], [1], [1], [2], [0, 0, 0, 1, 1, 2], [0], [0]>} : vector<1x8x8xbf16>, vector<1x8x8xbf16>, vector<1x8x8xf32> -> vector<1x8x8xf32>
    "tpu.trace_stop"() : () -> ()
    %116 = vector.shape_cast %115 : vector<1x8x8xf32> to vector<8x8xf32>
    %117 = vector.extract_strided_slice %12 {offsets = [3, 0, 0], sizes = [1, 8, 32], strides = [1, 1, 1]} : vector<4x8x32xbf16> to vector<1x8x32xbf16>
    %118 = vector.shape_cast %117 : vector<1x8x32xbf16> to vector<8x32xbf16>
    %119 = arith.truncf %116 : vector<8x8xf32> to vector<8x8xbf16>
    %cst_36 = arith.constant dense<0.000000e+00> : vector<8x32xf32>
    %120 = tpu.matmul %119, %118, %cst_36 {dimension_numbers = #tpu.dot_dimension_numbers<[1], [0], [0], [1], [0, 0, 1, 1], [], []>} : vector<8x8xbf16>, vector<8x32xbf16>, vector<8x32xf32> -> vector<8x32xf32>
    %121 = arith.addf %94, %120 : vector<8x32xf32>
    %122 = arith.addf %1, %121 : vector<8x32xf32>
    %c0_37 = arith.constant 0 : index
    %c0_38 = arith.constant 0 : index
    %c0_39 = arith.constant 0 : index
    %123 = vector.load %arg5[%c0_37, %c0_38, %c0_39] : memref<2x1x32xf32, #tpu.memory_space<vmem>>, vector<1x1x32xf32>
    %124 = vector.shape_cast %123 : vector<1x1x32xf32> to vector<1x32xf32>
    %125 = vector.broadcast %124 : vector<1x32xf32> to vector<8x32xf32>
    %126 = arith.addf %122, %125 : vector<8x32xf32>
    %cst_40 = arith.constant dense<0.000000e+00> : vector<8xf32>
    %127 = vector.multi_reduction <add>, %126, %cst_40 [1] : vector<8x32xf32> to vector<8xf32>
    %128 = vector.shape_cast %127 : vector<8xf32> to vector<8x1xf32>
    %cst_41 = arith.constant 3.200000e+01 : f32
    %129 = vector.broadcast %cst_41 : f32 to vector<8x1xf32>
    %130 = arith.divf %128, %129 : vector<8x1xf32>
    %131 = vector.broadcast %130 : vector<8x1xf32> to vector<8x32xf32>
    %132 = arith.subf %126, %131 : vector<8x32xf32>
    %133 = arith.mulf %132, %132 : vector<8x32xf32>
    %cst_42 = arith.constant dense<0.000000e+00> : vector<8xf32>
    %134 = vector.multi_reduction <add>, %133, %cst_42 [1] : vector<8x32xf32> to vector<8xf32>
    %135 = vector.shape_cast %134 : vector<8xf32> to vector<8x1xf32>
    %cst_43 = arith.constant 3.200000e+01 : f32
    %136 = vector.broadcast %cst_43 : f32 to vector<8x1xf32>
    %137 = arith.divf %135, %136 : vector<8x1xf32>
    %138 = vector.broadcast %130 : vector<8x1xf32> to vector<8x32xf32>
    %139 = arith.subf %126, %138 : vector<8x32xf32>
    %cst_44 = arith.constant 9.99999974E-6 : f32
    %140 = vector.broadcast %cst_44 : f32 to vector<8x1xf32>
    %141 = arith.addf %137, %140 : vector<8x1xf32>
    %142 = math.rsqrt %141 : vector<8x1xf32>
    %143 = vector.broadcast %142 : vector<8x1xf32> to vector<8x32xf32>
    %144 = arith.mulf %139, %143 : vector<8x32xf32>
    %c0_45 = arith.constant 0 : index
    %c0_46 = arith.constant 0 : index
    %c0_47 = arith.constant 0 : index
    %145 = vector.load %arg6[%c0_45, %c0_46, %c0_47] : memref<2x32x64xbf16, #tpu.memory_space<vmem>>, vector<1x32x64xbf16>
    %146 = vector.shape_cast %145 : vector<1x32x64xbf16> to vector<32x64xbf16>
    %147 = arith.truncf %144 : vector<8x32xf32> to vector<8x32xbf16>
    %cst_48 = arith.constant dense<0.000000e+00> : vector<8x64xf32>
    %148 = tpu.matmul %147, %146, %cst_48 {dimension_numbers = #tpu.dot_dimension_numbers<[1], [0], [0], [1], [0, 0, 1, 1], [], []>} : vector<8x32xbf16>, vector<32x64xbf16>, vector<8x64xf32> -> vector<8x64xf32>
    %c0_49 = arith.constant 0 : index
    %c0_50 = arith.constant 0 : index
    %c0_51 = arith.constant 0 : index
    %149 = vector.load %arg7[%c0_49, %c0_50, %c0_51] : memref<2x1x64xf32, #tpu.memory_space<vmem>>, vector<1x1x64xf32>
    %150 = vector.shape_cast %149 : vector<1x1x64xf32> to vector<1x64xf32>
    %151 = vector.broadcast %150 : vector<1x64xf32> to vector<8x64xf32>
    %152 = arith.addf %148, %151 : vector<8x64xf32>
    %cst_52 = arith.constant 0.000000e+00 : f32
    %153 = vector.broadcast %cst_52 : f32 to vector<8x64xf32>
    %154 = arith.maximumf %152, %153 : vector<8x64xf32>
    %c0_53 = arith.constant 0 : index
    %c0_54 = arith.constant 0 : index
    %c0_55 = arith.constant 0 : index
    %155 = vector.load %arg8[%c0_53, %c0_54, %c0_55] : memref<2x64x32xbf16, #tpu.memory_space<vmem>>, vector<1x64x32xbf16>
    %156 = vector.shape_cast %155 : vector<1x64x32xbf16> to vector<64x32xbf16>
    %157 = arith.truncf %154 : vector<8x64xf32> to vector<8x64xbf16>
    %cst_56 = arith.constant dense<0.000000e+00> : vector<8x32xf32>
    %158 = tpu.matmul %157, %156, %cst_56 {dimension_numbers = #tpu.dot_dimension_numbers<[1], [0], [0], [1], [0, 0, 1, 1], [], []>} : vector<8x64xbf16>, vector<64x32xbf16>, vector<8x32xf32> -> vector<8x32xf32>
    %159 = arith.addf %144, %158 : vector<8x32xf32>
    %c0_57 = arith.constant 0 : index
    %c0_58 = arith.constant 0 : index
    %c0_59 = arith.constant 0 : index
    %160 = vector.load %arg9[%c0_57, %c0_58, %c0_59] : memref<2x1x32xf32, #tpu.memory_space<vmem>>, vector<1x1x32xf32>
    %161 = vector.shape_cast %160 : vector<1x1x32xf32> to vector<1x32xf32>
    %162 = vector.broadcast %161 : vector<1x32xf32> to vector<8x32xf32>
    %163 = arith.addf %159, %162 : vector<8x32xf32>
    %cst_60 = arith.constant dense<0.000000e+00> : vector<8xf32>
    %164 = vector.multi_reduction <add>, %163, %cst_60 [1] : vector<8x32xf32> to vector<8xf32>
    %165 = vector.shape_cast %164 : vector<8xf32> to vector<8x1xf32>
    %cst_61 = arith.constant 3.200000e+01 : f32
    %166 = vector.broadcast %cst_61 : f32 to vector<8x1xf32>
    %167 = arith.divf %165, %166 : vector<8x1xf32>
    %168 = vector.broadcast %167 : vector<8x1xf32> to vector<8x32xf32>
    %169 = arith.subf %163, %168 : vector<8x32xf32>
    %170 = arith.mulf %169, %169 : vector<8x32xf32>
    %cst_62 = arith.constant dense<0.000000e+00> : vector<8xf32>
    %171 = vector.multi_reduction <add>, %170, %cst_62 [1] : vector<8x32xf32> to vector<8xf32>
    %172 = vector.shape_cast %171 : vector<8xf32> to vector<8x1xf32>
    %cst_63 = arith.constant 3.200000e+01 : f32
    %173 = vector.broadcast %cst_63 : f32 to vector<8x1xf32>
    %174 = arith.divf %172, %173 : vector<8x1xf32>
    %175 = vector.broadcast %167 : vector<8x1xf32> to vector<8x32xf32>
    %176 = arith.subf %163, %175 : vector<8x32xf32>
    %cst_64 = arith.constant 9.99999974E-6 : f32
    %177 = vector.broadcast %cst_64 : f32 to vector<8x1xf32>
    %178 = arith.addf %174, %177 : vector<8x1xf32>
    %179 = math.rsqrt %178 : vector<8x1xf32>
    %180 = vector.broadcast %179 : vector<8x1xf32> to vector<8x32xf32>
    %181 = arith.mulf %176, %180 : vector<8x32xf32>
    %c1 = arith.constant 1 : index
    %c0_65 = arith.constant 0 : index
    %c0_66 = arith.constant 0 : index
    %182 = vector.load %arg2[%c1, %c0_65, %c0_66] : memref<2x32x96xbf16, #tpu.memory_space<vmem>>, vector<1x32x96xbf16>
    %183 = vector.shape_cast %182 : vector<1x32x96xbf16> to vector<32x96xbf16>
    %184 = arith.truncf %181 : vector<8x32xf32> to vector<8x32xbf16>
    %cst_67 = arith.constant dense<0.000000e+00> : vector<8x96xf32>
    %185 = tpu.matmul %184, %183, %cst_67 {dimension_numbers = #tpu.dot_dimension_numbers<[1], [0], [0], [1], [0, 0, 1, 1], [], []>} : vector<8x32xbf16>, vector<32x96xbf16>, vector<8x96xf32> -> vector<8x96xf32>
    %c1_68 = arith.constant 1 : index
    %c0_69 = arith.constant 0 : index
    %c0_70 = arith.constant 0 : index
    %186 = vector.load %arg3[%c1_68, %c0_69, %c0_70] : memref<2x1x96xf32, #tpu.memory_space<vmem>>, vector<1x1x96xf32>
    %187 = vector.shape_cast %186 : vector<1x1x96xf32> to vector<1x96xf32>
    %188 = vector.broadcast %187 : vector<1x96xf32> to vector<8x96xf32>
    %189 = arith.addf %185, %188 : vector<8x96xf32>
    %190 = vector.shape_cast %189 : vector<8x96xf32> to vector<1x8x96xf32>
    %c1_71 = arith.constant 1 : index
    %c0_72 = arith.constant 0 : index
    %c0_73 = arith.constant 0 : index
    %c0_74 = arith.constant 0 : index
    %191 = vector.load %arg4[%c1_71, %c0_72, %c0_73, %c0_74] : memref<2x4x8x32xbf16, #tpu.memory_space<vmem>>, vector<1x4x8x32xbf16>
    %192 = vector.shape_cast %191 : vector<1x4x8x32xbf16> to vector<4x8x32xbf16>
    %cst_75 = arith.constant 0.000000e+00 : f32
    %193 = vector.broadcast %cst_75 : f32 to vector<8x32xf32>
    %194 = vector.extract_strided_slice %190 {offsets = [0, 0, 0], sizes = [1, 8, 8], strides = [1, 1, 1]} : vector<1x8x96xf32> to vector<1x8x8xf32>
    %195 = vector.extract_strided_slice %190 {offsets = [0, 0, 32], sizes = [1, 8, 8], strides = [1, 1, 1]} : vector<1x8x96xf32> to vector<1x8x8xf32>
    %196 = vector.extract_strided_slice %190 {offsets = [0, 0, 64], sizes = [1, 8, 8], strides = [1, 1, 1]} : vector<1x8x96xf32> to vector<1x8x8xf32>
    %197 = arith.truncf %194 : vector<1x8x8xf32> to vector<1x8x8xbf16>
    %198 = arith.truncf %195 : vector<1x8x8xf32> to vector<1x8x8xbf16>
    "tpu.trace_start"() <{level = 10 : i32, message = "bqd,bkd->bqk"}> : () -> ()
    %cst_76 = arith.constant dense<0.000000e+00> : vector<1x8x8xf32>
    %199 = tpu.matmul %197, %198, %cst_76 {dimension_numbers = #tpu.dot_dimension_numbers<[2], [2], [1], [1], [0, 0, 0, 1, 1, 1], [0], [0]>} : vector<1x8x8xbf16>, vector<1x8x8xbf16>, vector<1x8x8xf32> -> vector<1x8x8xf32>
    "tpu.trace_stop"() : () -> ()
    %cst_77 = arith.constant 0.353553385 : f32
    %200 = vector.broadcast %cst_77 : f32 to vector<1x8x8xf32>
    %201 = arith.mulf %199, %200 : vector<1x8x8xf32>
    %cst_78 = arith.constant dense<0xFF800000> : vector<1x8xf32>
    %202 = vector.multi_reduction <maximumf>, %201, %cst_78 [2] : vector<1x8x8xf32> to vector<1x8xf32>
    %203 = vector.shape_cast %202 : vector<1x8xf32> to vector<1x8x1xf32>
    %204 = vector.broadcast %203 : vector<1x8x1xf32> to vector<1x8x8xf32>
    %205 = arith.subf %201, %204 : vector<1x8x8xf32>
    %206 = math.exp %205 : vector<1x8x8xf32>
    %cst_79 = arith.constant dense<0.000000e+00> : vector<1x8xf32>
    %207 = vector.multi_reduction <add>, %206, %cst_79 [2] : vector<1x8x8xf32> to vector<1x8xf32>
    %208 = vector.shape_cast %207 : vector<1x8xf32> to vector<1x8x1xf32>
    %209 = tpu.reciprocal %208 {approx = true} : vector<1x8x1xf32> -> vector<1x8x1xf32>
    %210 = vector.broadcast %209 : vector<1x8x1xf32> to vector<1x8x8xf32>
    %211 = arith.mulf %206, %210 : vector<1x8x8xf32>
    %212 = arith.truncf %211 : vector<1x8x8xf32> to vector<1x8x8xbf16>
    %213 = arith.truncf %196 : vector<1x8x8xf32> to vector<1x8x8xbf16>
    "tpu.trace_start"() <{level = 10 : i32, message = "bqk,bkd->bqd"}> : () -> ()
    %cst_80 = arith.constant dense<0.000000e+00> : vector<1x8x8xf32>
    %214 = tpu.matmul %212, %213, %cst_80 {dimension_numbers = #tpu.dot_dimension_numbers<[2], [1], [1], [2], [0, 0, 0, 1, 1, 2], [0], [0]>} : vector<1x8x8xbf16>, vector<1x8x8xbf16>, vector<1x8x8xf32> -> vector<1x8x8xf32>
    "tpu.trace_stop"() : () -> ()
    %215 = vector.shape_cast %214 : vector<1x8x8xf32> to vector<8x8xf32>
    %216 = vector.extract_strided_slice %192 {offsets = [0, 0, 0], sizes = [1, 8, 32], strides = [1, 1, 1]} : vector<4x8x32xbf16> to vector<1x8x32xbf16>
    %217 = vector.shape_cast %216 : vector<1x8x32xbf16> to vector<8x32xbf16>
    %218 = arith.truncf %215 : vector<8x8xf32> to vector<8x8xbf16>
    %cst_81 = arith.constant dense<0.000000e+00> : vector<8x32xf32>
    %219 = tpu.matmul %218, %217, %cst_81 {dimension_numbers = #tpu.dot_dimension_numbers<[1], [0], [0], [1], [0, 0, 1, 1], [], []>} : vector<8x8xbf16>, vector<8x32xbf16>, vector<8x32xf32> -> vector<8x32xf32>
    %220 = arith.addf %193, %219 : vector<8x32xf32>
    %221 = vector.extract_strided_slice %190 {offsets = [0, 0, 8], sizes = [1, 8, 8], strides = [1, 1, 1]} : vector<1x8x96xf32> to vector<1x8x8xf32>
    %222 = vector.extract_strided_slice %190 {offsets = [0, 0, 40], sizes = [1, 8, 8], strides = [1, 1, 1]} : vector<1x8x96xf32> to vector<1x8x8xf32>
    %223 = vector.extract_strided_slice %190 {offsets = [0, 0, 72], sizes = [1, 8, 8], strides = [1, 1, 1]} : vector<1x8x96xf32> to vector<1x8x8xf32>
    %224 = arith.truncf %221 : vector<1x8x8xf32> to vector<1x8x8xbf16>
    %225 = arith.truncf %222 : vector<1x8x8xf32> to vector<1x8x8xbf16>
    "tpu.trace_start"() <{level = 10 : i32, message = "bqd,bkd->bqk"}> : () -> ()
    %cst_82 = arith.constant dense<0.000000e+00> : vector<1x8x8xf32>
    %226 = tpu.matmul %224, %225, %cst_82 {dimension_numbers = #tpu.dot_dimension_numbers<[2], [2], [1], [1], [0, 0, 0, 1, 1, 1], [0], [0]>} : vector<1x8x8xbf16>, vector<1x8x8xbf16>, vector<1x8x8xf32> -> vector<1x8x8xf32>
    "tpu.trace_stop"() : () -> ()
    %cst_83 = arith.constant 0.353553385 : f32
    %227 = vector.broadcast %cst_83 : f32 to vector<1x8x8xf32>
    %228 = arith.mulf %226, %227 : vector<1x8x8xf32>
    %cst_84 = arith.constant dense<0xFF800000> : vector<1x8xf32>
    %229 = vector.multi_reduction <maximumf>, %228, %cst_84 [2] : vector<1x8x8xf32> to vector<1x8xf32>
    %230 = vector.shape_cast %229 : vector<1x8xf32> to vector<1x8x1xf32>
    %231 = vector.broadcast %230 : vector<1x8x1xf32> to vector<1x8x8xf32>
    %232 = arith.subf %228, %231 : vector<1x8x8xf32>
    %233 = math.exp %232 : vector<1x8x8xf32>
    %cst_85 = arith.constant dense<0.000000e+00> : vector<1x8xf32>
    %234 = vector.multi_reduction <add>, %233, %cst_85 [2] : vector<1x8x8xf32> to vector<1x8xf32>
    %235 = vector.shape_cast %234 : vector<1x8xf32> to vector<1x8x1xf32>
    %236 = tpu.reciprocal %235 {approx = true} : vector<1x8x1xf32> -> vector<1x8x1xf32>
    %237 = vector.broadcast %236 : vector<1x8x1xf32> to vector<1x8x8xf32>
    %238 = arith.mulf %233, %237 : vector<1x8x8xf32>
    %239 = arith.truncf %238 : vector<1x8x8xf32> to vector<1x8x8xbf16>
    %240 = arith.truncf %223 : vector<1x8x8xf32> to vector<1x8x8xbf16>
    "tpu.trace_start"() <{level = 10 : i32, message = "bqk,bkd->bqd"}> : () -> ()
    %cst_86 = arith.constant dense<0.000000e+00> : vector<1x8x8xf32>
    %241 = tpu.matmul %239, %240, %cst_86 {dimension_numbers = #tpu.dot_dimension_numbers<[2], [1], [1], [2], [0, 0, 0, 1, 1, 2], [0], [0]>} : vector<1x8x8xbf16>, vector<1x8x8xbf16>, vector<1x8x8xf32> -> vector<1x8x8xf32>
    "tpu.trace_stop"() : () -> ()
    %242 = vector.shape_cast %241 : vector<1x8x8xf32> to vector<8x8xf32>
    %243 = vector.extract_strided_slice %192 {offsets = [1, 0, 0], sizes = [1, 8, 32], strides = [1, 1, 1]} : vector<4x8x32xbf16> to vector<1x8x32xbf16>
    %244 = vector.shape_cast %243 : vector<1x8x32xbf16> to vector<8x32xbf16>
    %245 = arith.truncf %242 : vector<8x8xf32> to vector<8x8xbf16>
    %cst_87 = arith.constant dense<0.000000e+00> : vector<8x32xf32>
    %246 = tpu.matmul %245, %244, %cst_87 {dimension_numbers = #tpu.dot_dimension_numbers<[1], [0], [0], [1], [0, 0, 1, 1], [], []>} : vector<8x8xbf16>, vector<8x32xbf16>, vector<8x32xf32> -> vector<8x32xf32>
    %247 = arith.addf %220, %246 : vector<8x32xf32>
    %248 = vector.extract_strided_slice %190 {offsets = [0, 0, 16], sizes = [1, 8, 8], strides = [1, 1, 1]} : vector<1x8x96xf32> to vector<1x8x8xf32>
    %249 = vector.extract_strided_slice %190 {offsets = [0, 0, 48], sizes = [1, 8, 8], strides = [1, 1, 1]} : vector<1x8x96xf32> to vector<1x8x8xf32>
    %250 = vector.extract_strided_slice %190 {offsets = [0, 0, 80], sizes = [1, 8, 8], strides = [1, 1, 1]} : vector<1x8x96xf32> to vector<1x8x8xf32>
    %251 = arith.truncf %248 : vector<1x8x8xf32> to vector<1x8x8xbf16>
    %252 = arith.truncf %249 : vector<1x8x8xf32> to vector<1x8x8xbf16>
    "tpu.trace_start"() <{level = 10 : i32, message = "bqd,bkd->bqk"}> : () -> ()
    %cst_88 = arith.constant dense<0.000000e+00> : vector<1x8x8xf32>
    %253 = tpu.matmul %251, %252, %cst_88 {dimension_numbers = #tpu.dot_dimension_numbers<[2], [2], [1], [1], [0, 0, 0, 1, 1, 1], [0], [0]>} : vector<1x8x8xbf16>, vector<1x8x8xbf16>, vector<1x8x8xf32> -> vector<1x8x8xf32>
    "tpu.trace_stop"() : () -> ()
    %cst_89 = arith.constant 0.353553385 : f32
    %254 = vector.broadcast %cst_89 : f32 to vector<1x8x8xf32>
    %255 = arith.mulf %253, %254 : vector<1x8x8xf32>
    %cst_90 = arith.constant dense<0xFF800000> : vector<1x8xf32>
    %256 = vector.multi_reduction <maximumf>, %255, %cst_90 [2] : vector<1x8x8xf32> to vector<1x8xf32>
    %257 = vector.shape_cast %256 : vector<1x8xf32> to vector<1x8x1xf32>
    %258 = vector.broadcast %257 : vector<1x8x1xf32> to vector<1x8x8xf32>
    %259 = arith.subf %255, %258 : vector<1x8x8xf32>
    %260 = math.exp %259 : vector<1x8x8xf32>
    %cst_91 = arith.constant dense<0.000000e+00> : vector<1x8xf32>
    %261 = vector.multi_reduction <add>, %260, %cst_91 [2] : vector<1x8x8xf32> to vector<1x8xf32>
    %262 = vector.shape_cast %261 : vector<1x8xf32> to vector<1x8x1xf32>
    %263 = tpu.reciprocal %262 {approx = true} : vector<1x8x1xf32> -> vector<1x8x1xf32>
    %264 = vector.broadcast %263 : vector<1x8x1xf32> to vector<1x8x8xf32>
    %265 = arith.mulf %260, %264 : vector<1x8x8xf32>
    %266 = arith.truncf %265 : vector<1x8x8xf32> to vector<1x8x8xbf16>
    %267 = arith.truncf %250 : vector<1x8x8xf32> to vector<1x8x8xbf16>
    "tpu.trace_start"() <{level = 10 : i32, message = "bqk,bkd->bqd"}> : () -> ()
    %cst_92 = arith.constant dense<0.000000e+00> : vector<1x8x8xf32>
    %268 = tpu.matmul %266, %267, %cst_92 {dimension_numbers = #tpu.dot_dimension_numbers<[2], [1], [1], [2], [0, 0, 0, 1, 1, 2], [0], [0]>} : vector<1x8x8xbf16>, vector<1x8x8xbf16>, vector<1x8x8xf32> -> vector<1x8x8xf32>
    "tpu.trace_stop"() : () -> ()
    %269 = vector.shape_cast %268 : vector<1x8x8xf32> to vector<8x8xf32>
    %270 = vector.extract_strided_slice %192 {offsets = [2, 0, 0], sizes = [1, 8, 32], strides = [1, 1, 1]} : vector<4x8x32xbf16> to vector<1x8x32xbf16>
    %271 = vector.shape_cast %270 : vector<1x8x32xbf16> to vector<8x32xbf16>
    %272 = arith.truncf %269 : vector<8x8xf32> to vector<8x8xbf16>
    %cst_93 = arith.constant dense<0.000000e+00> : vector<8x32xf32>
    %273 = tpu.matmul %272, %271, %cst_93 {dimension_numbers = #tpu.dot_dimension_numbers<[1], [0], [0], [1], [0, 0, 1, 1], [], []>} : vector<8x8xbf16>, vector<8x32xbf16>, vector<8x32xf32> -> vector<8x32xf32>
    %274 = arith.addf %247, %273 : vector<8x32xf32>
    %275 = vector.extract_strided_slice %190 {offsets = [0, 0, 24], sizes = [1, 8, 8], strides = [1, 1, 1]} : vector<1x8x96xf32> to vector<1x8x8xf32>
    %276 = vector.extract_strided_slice %190 {offsets = [0, 0, 56], sizes = [1, 8, 8], strides = [1, 1, 1]} : vector<1x8x96xf32> to vector<1x8x8xf32>
    %277 = vector.extract_strided_slice %190 {offsets = [0, 0, 88], sizes = [1, 8, 8], strides = [1, 1, 1]} : vector<1x8x96xf32> to vector<1x8x8xf32>
    %278 = arith.truncf %275 : vector<1x8x8xf32> to vector<1x8x8xbf16>
    %279 = arith.truncf %276 : vector<1x8x8xf32> to vector<1x8x8xbf16>
    "tpu.trace_start"() <{level = 10 : i32, message = "bqd,bkd->bqk"}> : () -> ()
    %cst_94 = arith.constant dense<0.000000e+00> : vector<1x8x8xf32>
    %280 = tpu.matmul %278, %279, %cst_94 {dimension_numbers = #tpu.dot_dimension_numbers<[2], [2], [1], [1], [0, 0, 0, 1, 1, 1], [0], [0]>} : vector<1x8x8xbf16>, vector<1x8x8xbf16>, vector<1x8x8xf32> -> vector<1x8x8xf32>
    "tpu.trace_stop"() : () -> ()
    %cst_95 = arith.constant 0.353553385 : f32
    %281 = vector.broadcast %cst_95 : f32 to vector<1x8x8xf32>
    %282 = arith.mulf %280, %281 : vector<1x8x8xf32>
    %cst_96 = arith.constant dense<0xFF800000> : vector<1x8xf32>
    %283 = vector.multi_reduction <maximumf>, %282, %cst_96 [2] : vector<1x8x8xf32> to vector<1x8xf32>
    %284 = vector.shape_cast %283 : vector<1x8xf32> to vector<1x8x1xf32>
    %285 = vector.broadcast %284 : vector<1x8x1xf32> to vector<1x8x8xf32>
    %286 = arith.subf %282, %285 : vector<1x8x8xf32>
    %287 = math.exp %286 : vector<1x8x8xf32>
    %cst_97 = arith.constant dense<0.000000e+00> : vector<1x8xf32>
    %288 = vector.multi_reduction <add>, %287, %cst_97 [2] : vector<1x8x8xf32> to vector<1x8xf32>
    %289 = vector.shape_cast %288 : vector<1x8xf32> to vector<1x8x1xf32>
    %290 = tpu.reciprocal %289 {approx = true} : vector<1x8x1xf32> -> vector<1x8x1xf32>
    %291 = vector.broadcast %290 : vector<1x8x1xf32> to vector<1x8x8xf32>
    %292 = arith.mulf %287, %291 : vector<1x8x8xf32>
    %293 = arith.truncf %292 : vector<1x8x8xf32> to vector<1x8x8xbf16>
    %294 = arith.truncf %277 : vector<1x8x8xf32> to vector<1x8x8xbf16>
    "tpu.trace_start"() <{level = 10 : i32, message = "bqk,bkd->bqd"}> : () -> ()
    %cst_98 = arith.constant dense<0.000000e+00> : vector<1x8x8xf32>
    %295 = tpu.matmul %293, %294, %cst_98 {dimension_numbers = #tpu.dot_dimension_numbers<[2], [1], [1], [2], [0, 0, 0, 1, 1, 2], [0], [0]>} : vector<1x8x8xbf16>, vector<1x8x8xbf16>, vector<1x8x8xf32> -> vector<1x8x8xf32>
    "tpu.trace_stop"() : () -> ()
    %296 = vector.shape_cast %295 : vector<1x8x8xf32> to vector<8x8xf32>
    %297 = vector.extract_strided_slice %192 {offsets = [3, 0, 0], sizes = [1, 8, 32], strides = [1, 1, 1]} : vector<4x8x32xbf16> to vector<1x8x32xbf16>
    %298 = vector.shape_cast %297 : vector<1x8x32xbf16> to vector<8x32xbf16>
    %299 = arith.truncf %296 : vector<8x8xf32> to vector<8x8xbf16>
    %cst_99 = arith.constant dense<0.000000e+00> : vector<8x32xf32>
    %300 = tpu.matmul %299, %298, %cst_99 {dimension_numbers = #tpu.dot_dimension_numbers<[1], [0], [0], [1], [0, 0, 1, 1], [], []>} : vector<8x8xbf16>, vector<8x32xbf16>, vector<8x32xf32> -> vector<8x32xf32>
    %301 = arith.addf %274, %300 : vector<8x32xf32>
    %302 = arith.addf %181, %301 : vector<8x32xf32>
    %c1_100 = arith.constant 1 : index
    %c0_101 = arith.constant 0 : index
    %c0_102 = arith.constant 0 : index
    %303 = vector.load %arg5[%c1_100, %c0_101, %c0_102] : memref<2x1x32xf32, #tpu.memory_space<vmem>>, vector<1x1x32xf32>
    %304 = vector.shape_cast %303 : vector<1x1x32xf32> to vector<1x32xf32>
    %305 = vector.broadcast %304 : vector<1x32xf32> to vector<8x32xf32>
    %306 = arith.addf %302, %305 : vector<8x32xf32>
    %cst_103 = arith.constant dense<0.000000e+00> : vector<8xf32>
    %307 = vector.multi_reduction <add>, %306, %cst_103 [1] : vector<8x32xf32> to vector<8xf32>
    %308 = vector.shape_cast %307 : vector<8xf32> to vector<8x1xf32>
    %cst_104 = arith.constant 3.200000e+01 : f32
    %309 = vector.broadcast %cst_104 : f32 to vector<8x1xf32>
    %310 = arith.divf %308, %309 : vector<8x1xf32>
    %311 = vector.broadcast %310 : vector<8x1xf32> to vector<8x32xf32>
    %312 = arith.subf %306, %311 : vector<8x32xf32>
    %313 = arith.mulf %312, %312 : vector<8x32xf32>
    %cst_105 = arith.constant dense<0.000000e+00> : vector<8xf32>
    %314 = vector.multi_reduction <add>, %313, %cst_105 [1] : vector<8x32xf32> to vector<8xf32>
    %315 = vector.shape_cast %314 : vector<8xf32> to vector<8x1xf32>
    %cst_106 = arith.constant 3.200000e+01 : f32
    %316 = vector.broadcast %cst_106 : f32 to vector<8x1xf32>
    %317 = arith.divf %315, %316 : vector<8x1xf32>
    %318 = vector.broadcast %310 : vector<8x1xf32> to vector<8x32xf32>
    %319 = arith.subf %306, %318 : vector<8x32xf32>
    %cst_107 = arith.constant 9.99999974E-6 : f32
    %320 = vector.broadcast %cst_107 : f32 to vector<8x1xf32>
    %321 = arith.addf %317, %320 : vector<8x1xf32>
    %322 = math.rsqrt %321 : vector<8x1xf32>
    %323 = vector.broadcast %322 : vector<8x1xf32> to vector<8x32xf32>
    %324 = arith.mulf %319, %323 : vector<8x32xf32>
    %c1_108 = arith.constant 1 : index
    %c0_109 = arith.constant 0 : index
    %c0_110 = arith.constant 0 : index
    %325 = vector.load %arg6[%c1_108, %c0_109, %c0_110] : memref<2x32x64xbf16, #tpu.memory_space<vmem>>, vector<1x32x64xbf16>
    %326 = vector.shape_cast %325 : vector<1x32x64xbf16> to vector<32x64xbf16>
    %327 = arith.truncf %324 : vector<8x32xf32> to vector<8x32xbf16>
    %cst_111 = arith.constant dense<0.000000e+00> : vector<8x64xf32>
    %328 = tpu.matmul %327, %326, %cst_111 {dimension_numbers = #tpu.dot_dimension_numbers<[1], [0], [0], [1], [0, 0, 1, 1], [], []>} : vector<8x32xbf16>, vector<32x64xbf16>, vector<8x64xf32> -> vector<8x64xf32>
    %c1_112 = arith.constant 1 : index
    %c0_113 = arith.constant 0 : index
    %c0_114 = arith.constant 0 : index
    %329 = vector.load %arg7[%c1_112, %c0_113, %c0_114] : memref<2x1x64xf32, #tpu.memory_space<vmem>>, vector<1x1x64xf32>
    %330 = vector.shape_cast %329 : vector<1x1x64xf32> to vector<1x64xf32>
    %331 = vector.broadcast %330 : vector<1x64xf32> to vector<8x64xf32>
    %332 = arith.addf %328, %331 : vector<8x64xf32>
    %cst_115 = arith.constant 0.000000e+00 : f32
    %333 = vector.broadcast %cst_115 : f32 to vector<8x64xf32>
    %334 = arith.maximumf %332, %333 : vector<8x64xf32>
    %c1_116 = arith.constant 1 : index
    %c0_117 = arith.constant 0 : index
    %c0_118 = arith.constant 0 : index
    %335 = vector.load %arg8[%c1_116, %c0_117, %c0_118] : memref<2x64x32xbf16, #tpu.memory_space<vmem>>, vector<1x64x32xbf16>
    %336 = vector.shape_cast %335 : vector<1x64x32xbf16> to vector<64x32xbf16>
    %337 = arith.truncf %334 : vector<8x64xf32> to vector<8x64xbf16>
    %cst_119 = arith.constant dense<0.000000e+00> : vector<8x32xf32>
    %338 = tpu.matmul %337, %336, %cst_119 {dimension_numbers = #tpu.dot_dimension_numbers<[1], [0], [0], [1], [0, 0, 1, 1], [], []>} : vector<8x64xbf16>, vector<64x32xbf16>, vector<8x32xf32> -> vector<8x32xf32>
    %339 = arith.addf %324, %338 : vector<8x32xf32>
    %c1_120 = arith.constant 1 : index
    %c0_121 = arith.constant 0 : index
    %c0_122 = arith.constant 0 : index
    %340 = vector.load %arg9[%c1_120, %c0_121, %c0_122] : memref<2x1x32xf32, #tpu.memory_space<vmem>>, vector<1x1x32xf32>
    %341 = vector.shape_cast %340 : vector<1x1x32xf32> to vector<1x32xf32>
    %342 = vector.broadcast %341 : vector<1x32xf32> to vector<8x32xf32>
    %343 = arith.addf %339, %342 : vector<8x32xf32>
    %cst_123 = arith.constant dense<0.000000e+00> : vector<8xf32>
    %344 = vector.multi_reduction <add>, %343, %cst_123 [1] : vector<8x32xf32> to vector<8xf32>
    %345 = vector.shape_cast %344 : vector<8xf32> to vector<8x1xf32>
    %cst_124 = arith.constant 3.200000e+01 : f32
    %346 = vector.broadcast %cst_124 : f32 to vector<8x1xf32>
    %347 = arith.divf %345, %346 : vector<8x1xf32>
    %348 = vector.broadcast %347 : vector<8x1xf32> to vector<8x32xf32>
    %349 = arith.subf %343, %348 : vector<8x32xf32>
    %350 = arith.mulf %349, %349 : vector<8x32xf32>
    %cst_125 = arith.constant dense<0.000000e+00> : vector<8xf32>
    %351 = vector.multi_reduction <add>, %350, %cst_125 [1] : vector<8x32xf32> to vector<8xf32>
    %352 = vector.shape_cast %351 : vector<8xf32> to vector<8x1xf32>
    %cst_126 = arith.constant 3.200000e+01 : f32
    %353 = vector.broadcast %cst_126 : f32 to vector<8x1xf32>
    %354 = arith.divf %352, %353 : vector<8x1xf32>
    %355 = vector.broadcast %347 : vector<8x1xf32> to vector<8x32xf32>
    %356 = arith.subf %343, %355 : vector<8x32xf32>
    %cst_127 = arith.constant 9.99999974E-6 : f32
    %357 = vector.broadcast %cst_127 : f32 to vector<8x1xf32>
    %358 = arith.addf %354, %357 : vector<8x1xf32>
    %359 = math.rsqrt %358 : vector<8x1xf32>
    %360 = vector.broadcast %359 : vector<8x1xf32> to vector<8x32xf32>
    %361 = arith.mulf %356, %360 : vector<8x32xf32>
    %c0_128 = arith.constant 0 : index
    %c0_129 = arith.constant 0 : index
    %362 = vector.load %arg10[%c0_128, %c0_129] : memref<32x128xbf16, #tpu.memory_space<vmem>>, vector<32x128xbf16>
    %363 = arith.truncf %361 : vector<8x32xf32> to vector<8x32xbf16>
    %cst_130 = arith.constant dense<0.000000e+00> : vector<8x128xf32>
    %364 = tpu.matmul %363, %362, %cst_130 {dimension_numbers = #tpu.dot_dimension_numbers<[1], [0], [0], [1], [0, 0, 1, 1], [], []>} : vector<8x32xbf16>, vector<32x128xbf16>, vector<8x128xf32> -> vector<8x128xf32>
    %c0_131 = arith.constant 0 : index
    %c0_132 = arith.constant 0 : index
    %365 = vector.load %arg11[%c0_131, %c0_132] : memref<1x128xf32, #tpu.memory_space<vmem>>, vector<1x128xf32>
    %366 = vector.broadcast %365 : vector<1x128xf32> to vector<8x128xf32>
    %367 = arith.addf %364, %366 : vector<8x128xf32>
    %368 = vector.shape_cast %367 : vector<8x128xf32> to vector<1x8x128xf32>
    %c0_133 = arith.constant 0 : index
    %c0_134 = arith.constant 0 : index
    %c0_135 = arith.constant 0 : index
    %369 = vector.load %arg12[%c0_133, %c0_134, %c0_135] : memref<1x8x128xf32, #tpu.memory_space<vmem>>, vector<1x8x128xf32>
    tpu.vector_store %arg12[%c0_133, %c0_134, %c0_135], %368 {strides = array<i32>} : memref<1x8x128xf32, #tpu.memory_space<vmem>>, vector<1x8x128xf32>,
    return
  }
  func.func @transform_0(%arg0: i32) -> (i32, i32, i32) {
    %c0_i32 = arith.constant 0 : i32
    %c0_i32_0 = arith.constant 0 : i32
    %c0_i32_1 = arith.constant 0 : i32
    return %arg0, %c0_i32, %c0_i32_0 : i32, i32, i32
  }
  func.func @transform_1(%arg0: i32) -> (i32, i32, i32) {
    %c0_i32 = arith.constant 0 : i32
    %c0_i32_0 = arith.constant 0 : i32
    %c0_i32_1 = arith.constant 0 : i32
    %c0_i32_2 = arith.constant 0 : i32
    return %c0_i32, %c0_i32_0, %c0_i32_1 : i32, i32, i32
  }
  func.func @transform_2(%arg0: i32) -> (i32, i32, i32) {
    %c0_i32 = arith.constant 0 : i32
    %c0_i32_0 = arith.constant 0 : i32
    %c0_i32_1 = arith.constant 0 : i32
    %c0_i32_2 = arith.constant 0 : i32
    return %c0_i32, %c0_i32_0, %c0_i32_1 : i32, i32, i32
  }
  func.func @transform_3(%arg0: i32) -> (i32, i32, i32, i32) {
    %c0_i32 = arith.constant 0 : i32
    %c0_i32_0 = arith.constant 0 : i32
    %c0_i32_1 = arith.constant 0 : i32
    %c0_i32_2 = arith.constant 0 : i32
    %c0_i32_3 = arith.constant 0 : i32
    return %c0_i32, %c0_i32_0, %c0_i32_1, %c0_i32_2 : i32, i32, i32, i32
  }
  func.func @transform_4(%arg0: i32) -> (i32, i32, i32) {
    %c0_i32 = arith.constant 0 : i32
    %c0_i32_0 = arith.constant 0 : i32
    %c0_i32_1 = arith.constant 0 : i32
    %c0_i32_2 = arith.constant 0 : i32
    return %c0_i32, %c0_i32_0, %c0_i32_1 : i32, i32, i32
  }
  func.func @transform_5(%arg0: i32) -> (i32, i32, i32) {
    %c0_i32 = arith.constant 0 : i32
    %c0_i32_0 = arith.constant 0 : i32
    %c0_i32_1 = arith.constant 0 : i32
    %c0_i32_2 = arith.constant 0 : i32
    return %c0_i32, %c0_i32_0, %c0_i32_1 : i32, i32, i32
  }
  func.func @transform_6(%arg0: i32) -> (i32, i32, i32) {
    %c0_i32 = arith.constant 0 : i32
    %c0_i32_0 = arith.constant 0 : i32
    %c0_i32_1 = arith.constant 0 : i32
    %c0_i32_2 = arith.constant 0 : i32
    return %c0_i32, %c0_i32_0, %c0_i32_1 : i32, i32, i32
  }
  func.func @transform_7(%arg0: i32) -> (i32, i32, i32) {
    %c0_i32 = arith.constant 0 : i32
    %c0_i32_0 = arith.constant 0 : i32
    %c0_i32_1 = arith.constant 0 : i32
    %c0_i32_2 = arith.constant 0 : i32
    return %c0_i32, %c0_i32_0, %c0_i32_1 : i32, i32, i32
  }
  func.func @transform_8(%arg0: i32) -> (i32, i32, i32) {
    %c0_i32 = arith.constant 0 : i32
    %c0_i32_0 = arith.constant 0 : i32
    %c0_i32_1 = arith.constant 0 : i32
    %c0_i32_2 = arith.constant 0 : i32
    return %c0_i32, %c0_i32_0, %c0_i32_1 : i32, i32, i32
  }
  func.func @transform_9(%arg0: i32) -> (i32, i32) {
    %c0_i32 = arith.constant 0 : i32
    %c0_i32_0 = arith.constant 0 : i32
    %c0_i32_1 = arith.constant 0 : i32
    return %c0_i32, %c0_i32_0 : i32, i32
  }
  func.func @transform_10(%arg0: i32) -> (i32, i32) {
    %c0_i32 = arith.constant 0 : i32
    %c0_i32_0 = arith.constant 0 : i32
    %c0_i32_1 = arith.constant 0 : i32
    return %c0_i32, %c0_i32_0 : i32, i32
  }
  func.func @transform_11(%arg0: i32) -> (i32, i32, i32) {
    %c0_i32 = arith.constant 0 : i32
    %c0_i32_0 = arith.constant 0 : i32
    %c0_i32_1 = arith.constant 0 : i32
    return %arg0, %c0_i32, %c0_i32_0 : i32, i32, i32
  }
}

module attributes {stable_mosaic.version = 11 : i64} {
  func.func @_fused_model_kernel(%arg0: i32, %arg1: memref<1x8x32xf32, #tpu.memory_space<vmem>>, %arg2: memref<2x32x96xbf16, #tpu.memory_space<vmem>>, %arg3: memref<2x1x96xf32, #tpu.memory_space<vmem>>, %arg4: memref<2x4x8x32xbf16, #tpu.memory_space<vmem>>, %arg5: memref<2x1x32xf32, #tpu.memory_space<vmem>>, %arg6: memref<2x32x64xbf16, #tpu.memory_space<vmem>>, %arg7: memref<2x1x64xf32, #tpu.memory_space<vmem>>, %arg8: memref<2x64x32xbf16, #tpu.memory_space<vmem>>, %arg9: memref<2x1x32xf32, #tpu.memory_space<vmem>>, %arg10: memref<32x128xbf16, #tpu.memory_space<vmem>>, %arg11: memref<1x128xf32, #tpu.memory_space<vmem>>, %arg12: memref<1x8x128xf32, #tpu.memory_space<vmem>>) attributes {dimension_semantics = [#tpu.dimension_semantics<parallel>], iteration_bounds = array<i64: 2>, scalar_prefetch = 0 : i64, scratch_operands = 0 : i64, tpu.core_type = #tpu.core_type<tc>, window_params = [{transform_indices = @transform_0, window_bounds = array<i64: 1, 8, 32>}, {pipeline_mode = #tpu.pipeline_mode<synchronous>, transform_indices = @transform_1, window_bounds = array<i64: 2, 32, 96>}, {pipeline_mode = #tpu.pipeline_mode<synchronous>, transform_indices = @transform_2, window_bounds = array<i64: 2, 1, 96>}, {pipeline_mode = #tpu.pipeline_mode<synchronous>, transform_indices = @transform_3, window_bounds = array<i64: 2, 4, 8, 32>}, {pipeline_mode = #tpu.pipeline_mode<synchronous>, transform_indices = @transform_4, window_bounds = array<i64: 2, 1, 32>}, {pipeline_mode = #tpu.pipeline_mode<synchronous>, transform_indices = @transform_5, window_bounds = array<i64: 2, 32, 64>}, {pipeline_mode = #tpu.pipeline_mode<synchronous>, transform_indices = @transform_6, window_bounds = array<i64: 2, 1, 64>}, {pipeline_mode = #tpu.pipeline_mode<synchronous>, transform_indices = @transform_7, window_bounds = array<i64: 2, 64, 32>}, {pipeline_mode = #tpu.pipeline_mode<synchronous>, transform_indices = @transform_8, window_bounds = array<i64: 2, 1, 32>}, {pipeline_mode = #tpu.pipeline_mode<synchronous>, transform_indices = @transform_9, window_bounds = array<i64: 32, 128>}, {pipeline_mode = #tpu.pipeline_mode<synchronous>, transform_indices = @transform_10, window_bounds = array<i64: 1, 128>}, {transform_indices = @transform_11, window_bounds = array<i64: 1, 8, 128>}]} {
    %c0 = arith.constant 0 : index
    %c0_0 = arith.constant 0 : index
    %c0_1 = arith.constant 0 : index
    %0 = vector.load %arg1[%c0, %c0_0, %c0_1] : memref<1x8x32xf32, #tpu.memory_space<vmem>>, vector<1x8x32xf32>
    %1 = vector.shape_cast %0 : vector<1x8x32xf32> to vector<8x32xf32>
    %c0_2 = arith.constant 0 : index
    %c0_3 = arith.constant 0 : index
    %c0_4 = arith.constant 0 : index
    %2 = vector.load %arg2[%c0_2, %c0_3, %c0_4] : memref<2x32x96xbf16, #tpu.memory_space<vmem>>, vector<1x32x96xbf16>
    %3 = vector.shape_cast %2 : vector<1x32x96xbf16> to vector<32x96xbf16>
    %4 = arith.truncf %1 : vector<8x32xf32> to vector<8x32xbf16>
    %cst = arith.constant dense<0.000000e+00> : vector<8x96xf32>
    %5 = tpu.matmul %4, %3, %cst {dimension_numbers = #tpu.dot_dimension_numbers<[1], [0], [0], [1], [0, 0, 1, 1], [], []>} : vector<8x32xbf16>, vector<32x96xbf16>, vector<8x96xf32> -> vector<8x96xf32>
    %c0_5 = arith.constant 0 : index
    %c0_6 = arith.constant 0 : index
    %c0_7 = arith.constant 0 : index
    %6 = vector.load %arg3[%c0_5, %c0_6, %c0_7] : memref<2x1x96xf32, #tpu.memory_space<vmem>>, vector<1x1x96xf32>
    %7 = vector.shape_cast %6 : vector<1x1x96xf32> to vector<1x96xf32>
    %8 = vector.broadcast %7 : vector<1x96xf32> to vector<8x96xf32>
    %9 = arith.addf %5, %8 : vector<8x96xf32>
    %10 = vector.shape_cast %9 : vector<8x96xf32> to vector<1x8x96xf32>
    %c0_8 = arith.constant 0 : index
    %c0_9 = arith.constant 0 : index
    %c0_10 = arith.constant 0 : index
    %c0_11 = arith.constant 0 : index
    %11 = vector.load %arg4[%c0_8, %c0_9, %c0_10, %c0_11] : memref<2x4x8x32xbf16, #tpu.memory_space<vmem>>, vector<1x4x8x32xbf16>
    %12 = vector.shape_cast %11 : vector<1x4x8x32xbf16> to vector<4x8x32xbf16>
    %cst_12 = arith.constant 0.000000e+00 : f32
    %13 = vector.broadcast %cst_12 : f32 to vector<8x32xf32>
    %14 = vector.extract_strided_slice %10 {offsets = [0, 0, 0], sizes = [1, 8, 8], strides = [1, 1, 1]} : vector<1x8x96xf32> to vector<1x8x8xf32>
    %15 = vector.extract_strided_slice %10 {offsets = [0, 0, 32], sizes = [1, 8, 8], strides = [1, 1, 1]} : vector<1x8x96xf32> to vector<1x8x8xf32>
    %16 = vector.extract_strided_slice %10 {offsets = [0, 0, 64], sizes = [1, 8, 8], strides = [1, 1, 1]} : vector<1x8x96xf32> to vector<1x8x8xf32>
    %17 = arith.truncf %14 : vector<1x8x8xf32> to vector<1x8x8xbf16>
    %18 = arith.truncf %15 : vector<1x8x8xf32> to vector<1x8x8xbf16>
    "tpu.trace_start"() <{level = 10 : i32, message = "bqd,bkd->bqk"}> : () -> ()
    %cst_13 = arith.constant dense<0.000000e+00> : vector<1x8x8xf32>
    %19 = tpu.matmul %17, %18, %cst_13 {dimension_numbers = #tpu.dot_dimension_numbers<[2], [2], [1], [1], [0, 0, 0, 1, 1, 1], [0], [0]>} : vector<1x8x8xbf16>, vector<1x8x8xbf16>, vector<1x8x8xf32> -> vector<1x8x8xf32>
    "tpu.trace_stop"() : () -> ()
    %cst_14 = arith.constant 0.353553385 : f32
    %20 = vector.broadcast %cst_14 : f32 to vector<1x8x8xf32>
    %21 = arith.mulf %19, %20 : vector<1x8x8xf32>
    %cst_15 = arith.constant dense<0xFF800000> : vector<1x8xf32>
    %22 = vector.multi_reduction <maximumf>, %21, %cst_15 [2] : vector<1x8x8xf32> to vector<1x8xf32>
    %23 = vector.shape_cast %22 : vector<1x8xf32> to vector<1x8x1xf32>
    %24 = vector.broadcast %23 : vector<1x8x1xf32> to vector<1x8x8xf32>
    %25 = arith.subf %21, %24 : vector<1x8x8xf32>
    %26 = math.exp %25 : vector<1x8x8xf32>
    %cst_16 = arith.constant dense<0.000000e+00> : vector<1x8xf32>
    %27 = vector.multi_reduction <add>, %26, %cst_16 [2] : vector<1x8x8xf32> to vector<1x8xf32>
    %28 = vector.shape_cast %27 : vector<1x8xf32> to vector<1x8x1xf32>
    %29 = tpu.reciprocal %28 {approx = true} : vector<1x8x1xf32> -> vector<1x8x1xf32>
    %30 = vector.broadcast %29 : vector<1x8x1xf32> to vector<1x8x8xf32>
    %31 = arith.mulf %26, %30 : vector<1x8x8xf32>
    %32 = arith.truncf %31 : vector<1x8x8xf32> to vector<1x8x8xbf16>
    %33 = arith.truncf %16 : vector<1x8x8xf32> to vector<1x8x8xbf16>
    "tpu.trace_start"() <{level = 10 : i32, message = "bqk,bkd->bqd"}> : () -> ()
    %cst_17 = arith.constant dense<0.000000e+00> : vector<1x8x8xf32>
    %34 = tpu.matmul %32, %33, %cst_17 {dimension_numbers = #tpu.dot_dimension_numbers<[2], [1], [1], [2], [0, 0, 0, 1, 1, 2], [0], [0]>} : vector<1x8x8xbf16>, vector<1x8x8xbf16>, vector<1x8x8xf32> -> vector<1x8x8xf32>
    "tpu.trace_stop"() : () -> ()
    %35 = vector.shape_cast %34 : vector<1x8x8xf32> to vector<8x8xf32>
    %36 = vector.extract_strided_slice %12 {offsets = [0, 0, 0], sizes = [1, 8, 32], strides = [1, 1, 1]} : vector<4x8x32xbf16> to vector<1x8x32xbf16>
    %37 = vector.shape_cast %36 : vector<1x8x32xbf16> to vector<8x32xbf16>
    %38 = arith.truncf %35 : vector<8x8xf32> to vector<8x8xbf16>
    %cst_18 = arith.constant dense<0.000000e+00> : vector<8x32xf32>
    %39 = tpu.matmul %38, %37, %cst_18 {dimension_numbers = #tpu.dot_dimension_numbers<[1], [0], [0], [1], [0, 0, 1, 1], [], []>} : vector<8x8xbf16>, vector<8x32xbf16>, vector<8x32xf32> -> vector<8x32xf32>
    %40 = arith.addf %13, %39 : vector<8x32xf32>
    %41 = vector.extract_strided_slice %10 {offsets = [0, 0, 8], sizes = [1, 8, 8], strides = [1, 1, 1]} : vector<1x8x96xf32> to vector<1x8x8xf32>
    %42 = vector.extract_strided_slice %10 {offsets = [0, 0, 40], sizes = [1, 8, 8], strides = [1, 1, 1]} : vector<1x8x96xf32> to vector<1x8x8xf32>
    %43 = vector.extract_strided_slice %10 {offsets = [0, 0, 72], sizes = [1, 8, 8], strides = [1, 1, 1]} : vector<1x8x96xf32> to vector<1x8x8xf32>
    %44 = arith.truncf %41 : vector<1x8x8xf32> to vector<1x8x8xbf16>
    %45 = arith.truncf %42 : vector<1x8x8xf32> to vector<1x8x8xbf16>
    "tpu.trace_start"() <{level = 10 : i32, message = "bqd,bkd->bqk"}> : () -> ()
    %cst_19 = arith.constant dense<0.000000e+00> : vector<1x8x8xf32>
    %46 = tpu.matmul %44, %45, %cst_19 {dimension_numbers = #tpu.dot_dimension_numbers<[2], [2], [1], [1], [0, 0, 0, 1, 1, 1], [0], [0]>} : vector<1x8x8xbf16>, vector<1x8x8xbf16>, vector<1x8x8xf32> -> vector<1x8x8xf32>
    "tpu.trace_stop"() : () -> ()
    %cst_20 = arith.constant 0.353553385 : f32
    %47 = vector.broadcast %cst_20 : f32 to vector<1x8x8xf32>
    %48 = arith.mulf %46, %47 : vector<1x8x8xf32>
    %cst_21 = arith.constant dense<0xFF800000> : vector<1x8xf32>
    %49 = vector.multi_reduction <maximumf>, %48, %cst_21 [2] : vector<1x8x8xf32> to vector<1x8xf32>
    %50 = vector.shape_cast %49 : vector<1x8xf32> to vector<1x8x1xf32>
    %51 = vector.broadcast %50 : vector<1x8x1xf32> to vector<1x8x8xf32>
    %52 = arith.subf %48, %51 : vector<1x8x8xf32>
    %53 = math.exp %52 : vector<1x8x8xf32>
    %cst_22 = arith.constant dense<0.000000e+00> : vector<1x8xf32>
    %54 = vector.multi_reduction <add>, %53, %cst_22 [2] : vector<1x8x8xf32> to vector<1x8xf32>
    %55 = vector.shape_cast %54 : vector<1x8xf32> to vector<1x8x1xf32>
    %56 = tpu.reciprocal %55 {approx = true} : vector<1x8x1xf32> -> vector<1x8x1xf32>
    %57 = vector.broadcast %56 : vector<1x8x1xf32> to vector<1x8x8xf32>
    %58 = arith.mulf %53, %57 : vector<1x8x8xf32>
    %59 = arith.truncf %58 : vector<1x8x8xf32> to vector<1x8x8xbf16>
    %60 = arith.truncf %43 : vector<1x8x8xf32> to vector<1x8x8xbf16>
    "tpu.trace_start"() <{level = 10 : i32, message = "bqk,bkd->bqd"}> : () -> ()
    %cst_23 = arith.constant dense<0.000000e+00> : vector<1x8x8xf32>
    %61 = tpu.matmul %59, %60, %cst_23 {dimension_numbers = #tpu.dot_dimension_numbers<[2], [1], [1], [2], [0, 0, 0, 1, 1, 2], [0], [0]>} : vector<1x8x8xbf16>, vector<1x8x8xbf16>, vector<1x8x8xf32> -> vector<1x8x8xf32>
    "tpu.trace_stop"() : () -> ()
    %62 = vector.shape_cast %61 : vector<1x8x8xf32> to vector<8x8xf32>
    %63 = vector.extract_strided_slice %12 {offsets = [1, 0, 0], sizes = [1, 8, 32], strides = [1, 1, 1]} : vector<4x8x32xbf16> to vector<1x8x32xbf16>
    %64 = vector.shape_cast %63 : vector<1x8x32xbf16> to vector<8x32xbf16>
    %65 = arith.truncf %62 : vector<8x8xf32> to vector<8x8xbf16>
    %cst_24 = arith.constant dense<0.000000e+00> : vector<8x32xf32>
    %66 = tpu.matmul %65, %64, %cst_24 {dimension_numbers = #tpu.dot_dimension_numbers<[1], [0], [0], [1], [0, 0, 1, 1], [], []>} : vector<8x8xbf16>, vector<8x32xbf16>, vector<8x32xf32> -> vector<8x32xf32>
    %67 = arith.addf %40, %66 : vector<8x32xf32>
    %68 = vector.extract_strided_slice %10 {offsets = [0, 0, 16], sizes = [1, 8, 8], strides = [1, 1, 1]} : vector<1x8x96xf32> to vector<1x8x8xf32>
    %69 = vector.extract_strided_slice %10 {offsets = [0, 0, 48], sizes = [1, 8, 8], strides = [1, 1, 1]} : vector<1x8x96xf32> to vector<1x8x8xf32>
    %70 = vector.extract_strided_slice %10 {offsets = [0, 0, 80], sizes = [1, 8, 8], strides = [1, 1, 1]} : vector<1x8x96xf32> to vector<1x8x8xf32>
    %71 = arith.truncf %68 : vector<1x8x8xf32> to vector<1x8x8xbf16>
    %72 = arith.truncf %69 : vector<1x8x8xf32> to vector<1x8x8xbf16>
    "tpu.trace_start"() <{level = 10 : i32, message = "bqd,bkd->bqk"}> : () -> ()
    %cst_25 = arith.constant dense<0.000000e+00> : vector<1x8x8xf32>
    %73 = tpu.matmul %71, %72, %cst_25 {dimension_numbers = #tpu.dot_dimension_numbers<[2], [2], [1], [1], [0, 0, 0, 1, 1, 1], [0], [0]>} : vector<1x8x8xbf16>, vector<1x8x8xbf16>, vector<1x8x8xf32> -> vector<1x8x8xf32>
    "tpu.trace_stop"() : () -> ()
    %cst_26 = arith.constant 0.353553385 : f32
    %74 = vector.broadcast %cst_26 : f32 to vector<1x8x8xf32>
    %75 = arith.mulf %73, %74 : vector<1x8x8xf32>
    %cst_27 = arith.constant dense<0xFF800000> : vector<1x8xf32>
    %76 = vector.multi_reduction <maximumf>, %75, %cst_27 [2] : vector<1x8x8xf32> to vector<1x8xf32>
    %77 = vector.shape_cast %76 : vector<1x8xf32> to vector<1x8x1xf32>
    %78 = vector.broadcast %77 : vector<1x8x1xf32> to vector<1x8x8xf32>
    %79 = arith.subf %75, %78 : vector<1x8x8xf32>
    %80 = math.exp %79 : vector<1x8x8xf32>
    %cst_28 = arith.constant dense<0.000000e+00> : vector<1x8xf32>
    %81 = vector.multi_reduction <add>, %80, %cst_28 [2] : vector<1x8x8xf32> to vector<1x8xf32>
    %82 = vector.shape_cast %81 : vector<1x8xf32> to vector<1x8x1xf32>
    %83 = tpu.reciprocal %82 {approx = true} : vector<1x8x1xf32> -> vector<1x8x1xf32>
    %84 = vector.broadcast %83 : vector<1x8x1xf32> to vector<1x8x8xf32>
    %85 = arith.mulf %80, %84 : vector<1x8x8xf32>
    %86 = arith.truncf %85 : vector<1x8x8xf32> to vector<1x8x8xbf16>
    %87 = arith.truncf %70 : vector<1x8x8xf32> to vector<1x8x8xbf16>
    "tpu.trace_start"() <{level = 10 : i32, message = "bqk,bkd->bqd"}> : () -> ()
    %cst_29 = arith.constant dense<0.000000e+00> : vector<1x8x8xf32>
    %88 = tpu.matmul %86, %87, %cst_29 {dimension_numbers = #tpu.dot_dimension_numbers<[2], [1], [1], [2], [0, 0, 0, 1, 1, 2], [0], [0]>} : vector<1x8x8xbf16>, vector<1x8x8xbf16>, vector<1x8x8xf32> -> vector<1x8x8xf32>
    "tpu.trace_stop"() : () -> ()
    %89 = vector.shape_cast %88 : vector<1x8x8xf32> to vector<8x8xf32>
    %90 = vector.extract_strided_slice %12 {offsets = [2, 0, 0], sizes = [1, 8, 32], strides = [1, 1, 1]} : vector<4x8x32xbf16> to vector<1x8x32xbf16>
    %91 = vector.shape_cast %90 : vector<1x8x32xbf16> to vector<8x32xbf16>
    %92 = arith.truncf %89 : vector<8x8xf32> to vector<8x8xbf16>
    %cst_30 = arith.constant dense<0.000000e+00> : vector<8x32xf32>
    %93 = tpu.matmul %92, %91, %cst_30 {dimension_numbers = #tpu.dot_dimension_numbers<[1], [0], [0], [1], [0, 0, 1, 1], [], []>} : vector<8x8xbf16>, vector<8x32xbf16>, vector<8x32xf32> -> vector<8x32xf32>
    %94 = arith.addf %67, %93 : vector<8x32xf32>
    %95 = vector.extract_strided_slice %10 {offsets = [0, 0, 24], sizes = [1, 8, 8], strides = [1, 1, 1]} : vector<1x8x96xf32> to vector<1x8x8xf32>
    %96 = vector.extract_strided_slice %10 {offsets = [0, 0, 56], sizes = [1, 8, 8], strides = [1, 1, 1]} : vector<1x8x96xf32> to vector<1x8x8xf32>
    %97 = vector.extract_strided_slice %10 {offsets = [0, 0, 88], sizes = [1, 8, 8], strides = [1, 1, 1]} : vector<1x8x96xf32> to vector<1x8x8xf32>
    %98 = arith.truncf %95 : vector<1x8x8xf32> to vector<1x8x8xbf16>
    %99 = arith.truncf %96 : vector<1x8x8xf32> to vector<1x8x8xbf16>
    "tpu.trace_start"() <{level = 10 : i32, message = "bqd,bkd->bqk"}> : () -> ()
    %cst_31 = arith.constant dense<0.000000e+00> : vector<1x8x8xf32>
    %100 = tpu.matmul %98, %99, %cst_31 {dimension_numbers = #tpu.dot_dimension_numbers<[2], [2], [1], [1], [0, 0, 0, 1, 1, 1], [0], [0]>} : vector<1x8x8xbf16>, vector<1x8x8xbf16>, vector<1x8x8xf32> -> vector<1x8x8xf32>
    "tpu.trace_stop"() : () -> ()
    %cst_32 = arith.constant 0.353553385 : f32
    %101 = vector.broadcast %cst_32 : f32 to vector<1x8x8xf32>
    %102 = arith.mulf %100, %101 : vector<1x8x8xf32>
    %cst_33 = arith.constant dense<0xFF800000> : vector<1x8xf32>
    %103 = vector.multi_reduction <maximumf>, %102, %cst_33 [2] : vector<1x8x8xf32> to vector<1x8xf32>
    %104 = vector.shape_cast %103 : vector<1x8xf32> to vector<1x8x1xf32>
    %105 = vector.broadcast %104 : vector<1x8x1xf32> to vector<1x8x8xf32>
    %106 = arith.subf %102, %105 : vector<1x8x8xf32>
    %107 = math.exp %106 : vector<1x8x8xf32>
    %cst_34 = arith.constant dense<0.000000e+00> : vector<1x8xf32>
    %108 = vector.multi_reduction <add>, %107, %cst_34 [2] : vector<1x8x8xf32> to vector<1x8xf32>
    %109 = vector.shape_cast %108 : vector<1x8xf32> to vector<1x8x1xf32>
    %110 = tpu.reciprocal %109 {approx = true} : vector<1x8x1xf32> -> vector<1x8x1xf32>
    %111 = vector.broadcast %110 : vector<1x8x1xf32> to vector<1x8x8xf32>
    %112 = arith.mulf %107, %111 : vector<1x8x8xf32>
    %113 = arith.truncf %112 : vector<1x8x8xf32> to vector<1x8x8xbf16>
    %114 = arith.truncf %97 : vector<1x8x8xf32> to vector<1x8x8xbf16>
    "tpu.trace_start"() <{level = 10 : i32, message = "bqk,bkd->bqd"}> : () -> ()
    %cst_35 = arith.constant dense<0.000000e+00> : vector<1x8x8xf32>
    %115 = tpu.matmul %113, %114, %cst_35 {dimension_numbers = #tpu.dot_dimension_numbers<[2], [1], [1], [2], [0, 0, 0, 1, 1, 2], [0], [0]>} : vector<1x8x8xbf16>, vector<1x8x8xbf16>, vector<1x8x8xf32> -> vector<1x8x8xf32>
    "tpu.trace_stop"() : () -> ()
    %116 = vector.shape_cast %115 : vector<1x8x8xf32> to vector<8x8xf32>
    %117 = vector.extract_strided_slice %12 {offsets = [3, 0, 0], sizes = [1, 8, 32], strides = [1, 1, 1]} : vector<4x8x32xbf16> to vector<1x8x32xbf16>
    %118 = vector.shape_cast %117 : vector<1x8x32xbf16> to vector<8x32xbf16>
    %119 = arith.truncf %116 : vector<8x8xf32> to vector<8x8xbf16>
    %cst_36 = arith.constant dense<0.000000e+00> : vector<8x32xf32>
    %120 = tpu.matmul %119, %118, %cst_36 {dimension_numbers = #tpu.dot_dimension_numbers<[1], [0], [0], [1], [0, 0, 1, 1], [], []>} : vector<8x8xbf16>, vector<8x32xbf16>, vector<8x32xf32> -> vector<8x32xf32>
    %121 = arith.addf %94, %120 : vector<8x32xf32>
    %122 = arith.addf %1, %121 : vector<8x32xf32>
    %c0_37 = arith.constant 0 : index
    %c0_38 = arith.constant 0 : index
    %c0_39 = arith.constant 0 : index
    %123 = vector.load %arg5[%c0_37, %c0_38, %c0_39] : memref<2x1x32xf32, #tpu.memory_space<vmem>>, vector<1x1x32xf32>
    %124 = vector.shape_cast %123 : vector<1x1x32xf32> to vector<1x32xf32>
    %125 = vector.broadcast %124 : vector<1x32xf32> to vector<8x32xf32>
    %126 = arith.addf %122, %125 : vector<8x32xf32>
    %cst_40 = arith.constant dense<0.000000e+00> : vector<8xf32>
    %127 = vector.multi_reduction <add>, %126, %cst_40 [1] : vector<8x32xf32> to vector<8xf32>
    %128 = vector.shape_cast %127 : vector<8xf32> to vector<8x1xf32>
    %cst_41 = arith.constant 3.200000e+01 : f32
    %129 = vector.broadcast %cst_41 : f32 to vector<8x1xf32>
    %130 = arith.divf %128, %129 : vector<8x1xf32>
    %131 = vector.broadcast %130 : vector<8x1xf32> to vector<8x32xf32>
    %132 = arith.subf %126, %131 : vector<8x32xf32>
    %133 = arith.mulf %132, %132 : vector<8x32xf32>
    %cst_42 = arith.constant dense<0.000000e+00> : vector<8xf32>
    %134 = vector.multi_reduction <add>, %133, %cst_42 [1] : vector<8x32xf32> to vector<8xf32>
    %135 = vector.shape_cast %134 : vector<8xf32> to vector<8x1xf32>
    %cst_43 = arith.constant 3.200000e+01 : f32
    %136 = vector.broadcast %cst_43 : f32 to vector<8x1xf32>
    %137 = arith.divf %135, %136 : vector<8x1xf32>
    %138 = vector.broadcast %130 : vector<8x1xf32> to vector<8x32xf32>
    %139 = arith.subf %126, %138 : vector<8x32xf32>
    %cst_44 = arith.constant 9.99999974E-6 : f32
    %140 = vector.broadcast %cst_44 : f32 to vector<8x1xf32>
    %141 = arith.addf %137, %140 : vector<8x1xf32>
    %142 = math.rsqrt %141 : vector<8x1xf32>
    %143 = vector.broadcast %142 : vector<8x1xf32> to vector<8x32xf32>
    %144 = arith.mulf %139, %143 : vector<8x32xf32>
    %c0_45 = arith.constant 0 : index
    %c0_46 = arith.constant 0 : index
    %c0_47 = arith.constant 0 : index
    %145 = vector.load %arg6[%c0_45, %c0_46, %c0_47] : memref<2x32x64xbf16, #tpu.memory_space<vmem>>, vector<1x32x64xbf16>
    %146 = vector.shape_cast %145 : vector<1x32x64xbf16> to vector<32x64xbf16>
    %147 = arith.truncf %144 : vector<8x32xf32> to vector<8x32xbf16>
    %cst_48 = arith.constant dense<0.000000e+00> : vector<8x64xf32>
    %148 = tpu.matmul %147, %146, %cst_48 {dimension_numbers = #tpu.dot_dimension_numbers<[1], [0], [0], [1], [0, 0, 1, 1], [], []>} : vector<8x32xbf16>, vector<32x64xbf16>, vector<8x64xf32> -> vector<8x64xf32>
    %c0_49 = arith.constant 0 : index
    %c0_50 = arith.constant 0 : index
    %c0_51 = arith.constant 0 : index
    %149 = vector.load %arg7[%c0_49, %c0_50, %c0_51] : memref<2x1x64xf32, #tpu.memory_space<vmem>>, vector<1x1x64xf32>
    %150 = vector.shape_cast %149 : vector<1x1x64xf32> to vector<1x64xf32>
    %151 = vector.broadcast %150 : vector<1x64xf32> to vector<8x64xf32>
    %152 = arith.addf %148, %151 : vector<8x64xf32>
    %cst_52 = arith.constant 0.000000e+00 : f32
    %153 = vector.broadcast %cst_52 : f32 to vector<8x64xf32>
    %154 = arith.maximumf %152, %153 : vector<8x64xf32>
    %c0_53 = arith.constant 0 : index
    %c0_54 = arith.constant 0 : index
    %c0_55 = arith.constant 0 : index
    %155 = vector.load %arg8[%c0_53, %c0_54, %c0_55] : memref<2x64x32xbf16, #tpu.memory_space<vmem>>, vector<1x64x32xbf16>
    %156 = vector.shape_cast %155 : vector<1x64x32xbf16> to vector<64x32xbf16>
    %157 = arith.truncf %154 : vector<8x64xf32> to vector<8x64xbf16>
    %cst_56 = arith.constant dense<0.000000e+00> : vector<8x32xf32>
    %158 = tpu.matmul %157, %156, %cst_56 {dimension_numbers = #tpu.dot_dimension_numbers<[1], [0], [0], [1], [0, 0, 1, 1], [], []>} : vector<8x64xbf16>, vector<64x32xbf16>, vector<8x32xf32> -> vector<8x32xf32>
    %159 = arith.addf %144, %158 : vector<8x32xf32>
    %c0_57 = arith.constant 0 : index
    %c0_58 = arith.constant 0 : index
    %c0_59 = arith.constant 0 : index
    %160 = vector.load %arg9[%c0_57, %c0_58, %c0_59] : memref<2x1x32xf32, #tpu.memory_space<vmem>>, vector<1x1x32xf32>
    %161 = vector.shape_cast %160 : vector<1x1x32xf32> to vector<1x32xf32>
    %162 = vector.broadcast %161 : vector<1x32xf32> to vector<8x32xf32>
    %163 = arith.addf %159, %162 : vector<8x32xf32>
    %cst_60 = arith.constant dense<0.000000e+00> : vector<8xf32>
    %164 = vector.multi_reduction <add>, %163, %cst_60 [1] : vector<8x32xf32> to vector<8xf32>
    %165 = vector.shape_cast %164 : vector<8xf32> to vector<8x1xf32>
    %cst_61 = arith.constant 3.200000e+01 : f32
    %166 = vector.broadcast %cst_61 : f32 to vector<8x1xf32>
    %167 = arith.divf %165, %166 : vector<8x1xf32>
    %168 = vector.broadcast %167 : vector<8x1xf32> to vector<8x32xf32>
    %169 = arith.subf %163, %168 : vector<8x32xf32>
    %170 = arith.mulf %169, %169 : vector<8x32xf32>
    %cst_62 = arith.constant dense<0.000000e+00> : vector<8xf32>
    %171 = vector.multi_reduction <add>, %170, %cst_62 [1] : vector<8x32xf32> to vector<8xf32>
    %172 = vector.shape_cast %171 : vector<8xf32> to vector<8x1xf32>
    %cst_63 = arith.constant 3.200000e+01 : f32
    %173 = vector.broadcast %cst_63 : f32 to vector<8x1xf32>
    %174 = arith.divf %172, %173 : vector<8x1xf32>
    %175 = vector.broadcast %167 : vector<8x1xf32> to vector<8x32xf32>
    %176 = arith.subf %163, %175 : vector<8x32xf32>
    %cst_64 = arith.constant 9.99999974E-6 : f32
    %177 = vector.broadcast %cst_64 : f32 to vector<8x1xf32>
    %178 = arith.addf %174, %177 : vector<8x1xf32>
    %179 = math.rsqrt %178 : vector<8x1xf32>
    %180 = vector.broadcast %179 : vector<8x1xf32> to vector<8x32xf32>
    %181 = arith.mulf %176, %180 : vector<8x32xf32>
    %c1 = arith.constant 1 : index
    %c0_65 = arith.constant 0 : index
    %c0_66 = arith.constant 0 : index
    %182 = vector.load %arg2[%c1, %c0_65, %c0_66] : memref<2x32x96xbf16, #tpu.memory_space<vmem>>, vector<1x32x96xbf16>
    %183 = vector.shape_cast %182 : vector<1x32x96xbf16> to vector<32x96xbf16>
    %184 = arith.truncf %181 : vector<8x32xf32> to vector<8x32xbf16>
    %cst_67 = arith.constant dense<0.000000e+00> : vector<8x96xf32>
    %185 = tpu.matmul %184, %183, %cst_67 {dimension_numbers = #tpu.dot_dimension_numbers<[1], [0], [0], [1], [0, 0, 1, 1], [], []>} : vector<8x32xbf16>, vector<32x96xbf16>, vector<8x96xf32> -> vector<8x96xf32>
    %c1_68 = arith.constant 1 : index
    %c0_69 = arith.constant 0 : index
    %c0_70 = arith.constant 0 : index
    %186 = vector.load %arg3[%c1_68, %c0_69, %c0_70] : memref<2x1x96xf32, #tpu.memory_space<vmem>>, vector<1x1x96xf32>
    %187 = vector.shape_cast %186 : vector<1x1x96xf32> to vector<1x96xf32>
    %188 = vector.broadcast %187 : vector<1x96xf32> to vector<8x96xf32>
    %189 = arith.addf %185, %188 : vector<8x96xf32>
    %190 = vector.shape_cast %189 : vector<8x96xf32> to vector<1x8x96xf32>
    %c1_71 = arith.constant 1 : index
    %c0_72 = arith.constant 0 : index
    %c0_73 = arith.constant 0 : index
    %c0_74 = arith.constant 0 : index
    %191 = vector.load %arg4[%c1_71, %c0_72, %c0_73, %c0_74] : memref<2x4x8x32xbf16, #tpu.memory_space<vmem>>, vector<1x4x8x32xbf16>
    %192 = vector.shape_cast %191 : vector<1x4x8x32xbf16> to vector<4x8x32xbf16>
    %cst_75 = arith.constant 0.000000e+00 : f32
    %193 = vector.broadcast %cst_75 : f32 to vector<8x32xf32>
    %194 = vector.extract_strided_slice %190 {offsets = [0, 0, 0], sizes = [1, 8, 8], strides = [1, 1, 1]} : vector<1x8x96xf32> to vector<1x8x8xf32>
    %195 = vector.extract_strided_slice %190 {offsets = [0, 0, 32], sizes = [1, 8, 8], strides = [1, 1, 1]} : vector<1x8x96xf32> to vector<1x8x8xf32>
    %196 = vector.extract_strided_slice %190 {offsets = [0, 0, 64], sizes = [1, 8, 8], strides = [1, 1, 1]} : vector<1x8x96xf32> to vector<1x8x8xf32>
    %197 = arith.truncf %194 : vector<1x8x8xf32> to vector<1x8x8xbf16>
    %198 = arith.truncf %195 : vector<1x8x8xf32> to vector<1x8x8xbf16>
    "tpu.trace_start"() <{level = 10 : i32, message = "bqd,bkd->bqk"}> : () -> ()
    %cst_76 = arith.constant dense<0.000000e+00> : vector<1x8x8xf32>
    %199 = tpu.matmul %197, %198, %cst_76 {dimension_numbers = #tpu.dot_dimension_numbers<[2], [2], [1], [1], [0, 0, 0, 1, 1, 1], [0], [0]>} : vector<1x8x8xbf16>, vector<1x8x8xbf16>, vector<1x8x8xf32> -> vector<1x8x8xf32>
    "tpu.trace_stop"() : () -> ()
    %cst_77 = arith.constant 0.353553385 : f32
    %200 = vector.broadcast %cst_77 : f32 to vector<1x8x8xf32>
    %201 = arith.mulf %199, %200 : vector<1x8x8xf32>
    %cst_78 = arith.constant dense<0xFF800000> : vector<1x8xf32>
    %202 = vector.multi_reduction <maximumf>, %201, %cst_78 [2] : vector<1x8x8xf32> to vector<1x8xf32>
    %203 = vector.shape_cast %202 : vector<1x8xf32> to vector<1x8x1xf32>
    %204 = vector.broadcast %203 : vector<1x8x1xf32> to vector<1x8x8xf32>
    %205 = arith.subf %201, %204 : vector<1x8x8xf32>
    %206 = math.exp %205 : vector<1x8x8xf32>
    %cst_79 = arith.constant dense<0.000000e+00> : vector<1x8xf32>
    %207 = vector.multi_reduction <add>, %206, %cst_79 [2] : vector<1x8x8xf32> to vector<1x8xf32>
    %208 = vector.shape_cast %207 : vector<1x8xf32> to vector<1x8x1xf32>
    %209 = tpu.reciprocal %208 {approx = true} : vector<1x8x1xf32> -> vector<1x8x1xf32>
    %210 = vector.broadcast %209 : vector<1x8x1xf32> to vector<1x8x8xf32>
    %211 = arith.mulf %206, %210 : vector<1x8x8xf32>
    %212 = arith.truncf %211 : vector<1x8x8xf32> to vector<1x8x8xbf16>
    %213 = arith.truncf %196 : vector<1x8x8xf32> to vector<1x8x8xbf16>
    "tpu.trace_start"() <{level = 10 : i32, message = "bqk,bkd->bqd"}> : () -> ()
    %cst_80 = arith.constant dense<0.000000e+00> : vector<1x8x8xf32>
    %214 = tpu.matmul %212, %213, %cst_80 {dimension_numbers = #tpu.dot_dimension_numbers<[2], [1], [1], [2], [0, 0, 0, 1, 1, 2], [0], [0]>} : vector<1x8x8xbf16>, vector<1x8x8xbf16>, vector<1x8x8xf32> -> vector<1x8x8xf32>
    "tpu.trace_stop"() : () -> ()
    %215 = vector.shape_cast %214 : vector<1x8x8xf32> to vector<8x8xf32>
    %216 = vector.extract_strided_slice %192 {offsets = [0, 0, 0], sizes = [1, 8, 32], strides = [1, 1, 1]} : vector<4x8x32xbf16> to vector<1x8x32xbf16>
    %217 = vector.shape_cast %216 : vector<1x8x32xbf16> to vector<8x32xbf16>
    %218 = arith.truncf %215 : vector<8x8xf32> to vector<8x8xbf16>
    %cst_81 = arith.constant dense<0.000000e+00> : vector<8x32xf32>
    %219 = tpu.matmul %218, %217, %cst_81 {dimension_numbers = #tpu.dot_dimension_numbers<[1], [0], [0], [1], [0, 0, 1, 1], [], []>} : vector<8x8xbf16>, vector<8x32xbf16>, vector<8x32xf32> -> vector<8x32xf32>
    %220 = arith.addf %193, %219 : vector<8x32xf32>
    %221 = vector.extract_strided_slice %190 {offsets = [0, 0, 8], sizes = [1, 8, 8], strides = [1, 1, 1]} : vector<1x8x96xf32> to vector<1x8x8xf32>
    %222 = vector.extract_strided_slice %190 {offsets = [0, 0, 40], sizes = [1, 8, 8], strides = [1, 1, 1]} : vector<1x8x96xf32> to vector<1x8x8xf32>
    %223 = vector.extract_strided_slice %190 {offsets = [0, 0, 72], sizes = [1, 8, 8], strides = [1, 1, 1]} : vector<1x8x96xf32> to vector<1x8x8xf32>
    %224 = arith.truncf %221 : vector<1x8x8xf32> to vector<1x8x8xbf16>
    %225 = arith.truncf %222 : vector<1x8x8xf32> to vector<1x8x8xbf16>
    "tpu.trace_start"() <{level = 10 : i32, message = "bqd,bkd->bqk"}> : () -> ()
    %cst_82 = arith.constant dense<0.000000e+00> : vector<1x8x8xf32>
    %226 = tpu.matmul %224, %225, %cst_82 {dimension_numbers = #tpu.dot_dimension_numbers<[2], [2], [1], [1], [0, 0, 0, 1, 1, 1], [0], [0]>} : vector<1x8x8xbf16>, vector<1x8x8xbf16>, vector<1x8x8xf32> -> vector<1x8x8xf32>
    "tpu.trace_stop"() : () -> ()
    %cst_83 = arith.constant 0.353553385 : f32
    %227 = vector.broadcast %cst_83 : f32 to vector<1x8x8xf32>
    %228 = arith.mulf %226, %227 : vector<1x8x8xf32>
    %cst_84 = arith.constant dense<0xFF800000> : vector<1x8xf32>
    %229 = vector.multi_reduction <maximumf>, %228, %cst_84 [2] : vector<1x8x8xf32> to vector<1x8xf32>
    %230 = vector.shape_cast %229 : vector<1x8xf32> to vector<1x8x1xf32>
    %231 = vector.broadcast %230 : vector<1x8x1xf32> to vector<1x8x8xf32>
    %232 = arith.subf %228, %231 : vector<1x8x8xf32>
    %233 = math.exp %232 : vector<1x8x8xf32>
    %cst_85 = arith.constant dense<0.000000e+00> : vector<1x8xf32>
    %234 = vector.multi_reduction <add>, %233, %cst_85 [2] : vector<1x8x8xf32> to vector<1x8xf32>
    %235 = vector.shape_cast %234 : vector<1x8xf32> to vector<1x8x1xf32>
    %236 = tpu.reciprocal %235 {approx = true} : vector<1x8x1xf32> -> vector<1x8x1xf32>
    %237 = vector.broadcast %236 : vector<1x8x1xf32> to vector<1x8x8xf32>
    %238 = arith.mulf %233, %237 : vector<1x8x8xf32>
    %239 = arith.truncf %238 : vector<1x8x8xf32> to vector<1x8x8xbf16>
    %240 = arith.truncf %223 : vector<1x8x8xf32> to vector<1x8x8xbf16>
    "tpu.trace_start"() <{level = 10 : i32, message = "bqk,bkd->bqd"}> : () -> ()
    %cst_86 = arith.constant dense<0.000000e+00> : vector<1x8x8xf32>
    %241 = tpu.matmul %239, %240, %cst_86 {dimension_numbers = #tpu.dot_dimension_numbers<[2], [1], [1], [2], [0, 0, 0, 1, 1, 2], [0], [0]>} : vector<1x8x8xbf16>, vector<1x8x8xbf16>, vector<1x8x8xf32> -> vector<1x8x8xf32>
    "tpu.trace_stop"() : () -> ()
    %242 = vector.shape_cast %241 : vector<1x8x8xf32> to vector<8x8xf32>
    %243 = vector.extract_strided_slice %192 {offsets = [1, 0, 0], sizes = [1, 8, 32], strides = [1, 1, 1]} : vector<4x8x32xbf16> to vector<1x8x32xbf16>
    %244 = vector.shape_cast %243 : vector<1x8x32xbf16> to vector<8x32xbf16>
    %245 = arith.truncf %242 : vector<8x8xf32> to vector<8x8xbf16>
    %cst_87 = arith.constant dense<0.000000e+00> : vector<8x32xf32>
    %246 = tpu.matmul %245, %244, %cst_87 {dimension_numbers = #tpu.dot_dimension_numbers<[1], [0], [0], [1], [0, 0, 1, 1], [], []>} : vector<8x8xbf16>, vector<8x32xbf16>, vector<8x32xf32> -> vector<8x32xf32>
    %247 = arith.addf %220, %246 : vector<8x32xf32>
    %248 = vector.extract_strided_slice %190 {offsets = [0, 0, 16], sizes = [1, 8, 8], strides = [1, 1, 1]} : vector<1x8x96xf32> to vector<1x8x8xf32>
    %249 = vector.extract_strided_slice %190 {offsets = [0, 0, 48], sizes = [1, 8, 8], strides = [1, 1, 1]} : vector<1x8x96xf32> to vector<1x8x8xf32>
    %250 = vector.extract_strided_slice %190 {offsets = [0, 0, 80], sizes = [1, 8, 8], strides = [1, 1, 1]} : vector<1x8x96xf32> to vector<1x8x8xf32>
    %251 = arith.truncf %248 : vector<1x8x8xf32> to vector<1x8x8xbf16>
    %252 = arith.truncf %249 : vector<1x8x8xf32> to vector<1x8x8xbf16>
    "tpu.trace_start"() <{level = 10 : i32, message = "bqd,bkd->bqk"}> : () -> ()
    %cst_88 = arith.constant dense<0.000000e+00> : vector<1x8x8xf32>
    %253 = tpu.matmul %251, %252, %cst_88 {dimension_numbers = #tpu.dot_dimension_numbers<[2], [2], [1], [1], [0, 0, 0, 1, 1, 1], [0], [0]>} : vector<1x8x8xbf16>, vector<1x8x8xbf16>, vector<1x8x8xf32> -> vector<1x8x8xf32>
    "tpu.trace_stop"() : () -> ()
    %cst_89 = arith.constant 0.353553385 : f32
    %254 = vector.broadcast %cst_89 : f32 to vector<1x8x8xf32>
    %255 = arith.mulf %253, %254 : vector<1x8x8xf32>
    %cst_90 = arith.constant dense<0xFF800000> : vector<1x8xf32>
    %256 = vector.multi_reduction <maximumf>, %255, %cst_90 [2] : vector<1x8x8xf32> to vector<1x8xf32>
    %257 = vector.shape_cast %256 : vector<1x8xf32> to vector<1x8x1xf32>
    %258 = vector.broadcast %257 : vector<1x8x1xf32> to vector<1x8x8xf32>
    %259 = arith.subf %255, %258 : vector<1x8x8xf32>
    %260 = math.exp %259 : vector<1x8x8xf32>
    %cst_91 = arith.constant dense<0.000000e+00> : vector<1x8xf32>
    %261 = vector.multi_reduction <add>, %260, %cst_91 [2] : vector<1x8x8xf32> to vector<1x8xf32>
    %262 = vector.shape_cast %261 : vector<1x8xf32> to vector<1x8x1xf32>
    %263 = tpu.reciprocal %262 {approx = true} : vector<1x8x1xf32> -> vector<1x8x1xf32>
    %264 = vector.broadcast %263 : vector<1x8x1xf32> to vector<1x8x8xf32>
    %265 = arith.mulf %260, %264 : vector<1x8x8xf32>
    %266 = arith.truncf %265 : vector<1x8x8xf32> to vector<1x8x8xbf16>
    %267 = arith.truncf %250 : vector<1x8x8xf32> to vector<1x8x8xbf16>
    "tpu.trace_start"() <{level = 10 : i32, message = "bqk,bkd->bqd"}> : () -> ()
    %cst_92 = arith.constant dense<0.000000e+00> : vector<1x8x8xf32>
    %268 = tpu.matmul %266, %267, %cst_92 {dimension_numbers = #tpu.dot_dimension_numbers<[2], [1], [1], [2], [0, 0, 0, 1, 1, 2], [0], [0]>} : vector<1x8x8xbf16>, vector<1x8x8xbf16>, vector<1x8x8xf32> -> vector<1x8x8xf32>
    "tpu.trace_stop"() : () -> ()
    %269 = vector.shape_cast %268 : vector<1x8x8xf32> to vector<8x8xf32>
    %270 = vector.extract_strided_slice %192 {offsets = [2, 0, 0], sizes = [1, 8, 32], strides = [1, 1, 1]} : vector<4x8x32xbf16> to vector<1x8x32xbf16>
    %271 = vector.shape_cast %270 : vector<1x8x32xbf16> to vector<8x32xbf16>
    %272 = arith.truncf %269 : vector<8x8xf32> to vector<8x8xbf16>
    %cst_93 = arith.constant dense<0.000000e+00> : vector<8x32xf32>
    %273 = tpu.matmul %272, %271, %cst_93 {dimension_numbers = #tpu.dot_dimension_numbers<[1], [0], [0], [1], [0, 0, 1, 1], [], []>} : vector<8x8xbf16>, vector<8x32xbf16>, vector<8x32xf32> -> vector<8x32xf32>
    %274 = arith.addf %247, %273 : vector<8x32xf32>
    %275 = vector.extract_strided_slice %190 {offsets = [0, 0, 24], sizes = [1, 8, 8], strides = [1, 1, 1]} : vector<1x8x96xf32> to vector<1x8x8xf32>
    %276 = vector.extract_strided_slice %190 {offsets = [0, 0, 56], sizes = [1, 8, 8], strides = [1, 1, 1]} : vector<1x8x96xf32> to vector<1x8x8xf32>
    %277 = vector.extract_strided_slice %190 {offsets = [0, 0, 88], sizes = [1, 8, 8], strides = [1, 1, 1]} : vector<1x8x96xf32> to vector<1x8x8xf32>
    %278 = arith.truncf %275 : vector<1x8x8xf32> to vector<1x8x8xbf16>
    %279 = arith.truncf %276 : vector<1x8x8xf32> to vector<1x8x8xbf16>
    "tpu.trace_start"() <{level = 10 : i32, message = "bqd,bkd->bqk"}> : () -> ()
    %cst_94 = arith.constant dense<0.000000e+00> : vector<1x8x8xf32>
    %280 = tpu.matmul %278, %279, %cst_94 {dimension_numbers = #tpu.dot_dimension_numbers<[2], [2], [1], [1], [0, 0, 0, 1, 1, 1], [0], [0]>} : vector<1x8x8xbf16>, vector<1x8x8xbf16>, vector<1x8x8xf32> -> vector<1x8x8xf32>
    "tpu.trace_stop"() : () -> ()
    %cst_95 = arith.constant 0.353553385 : f32
    %281 = vector.broadcast %cst_95 : f32 to vector<1x8x8xf32>
    %282 = arith.mulf %280, %281 : vector<1x8x8xf32>
    %cst_96 = arith.constant dense<0xFF800000> : vector<1x8xf32>
    %283 = vector.multi_reduction <maximumf>, %282, %cst_96 [2] : vector<1x8x8xf32> to vector<1x8xf32>
    %284 = vector.shape_cast %283 : vector<1x8xf32> to vector<1x8x1xf32>
    %285 = vector.broadcast %284 : vector<1x8x1xf32> to vector<1x8x8xf32>
    %286 = arith.subf %282, %285 : vector<1x8x8xf32>
    %287 = math.exp %286 : vector<1x8x8xf32>
    %cst_97 = arith.constant dense<0.000000e+00> : vector<1x8xf32>
    %288 = vector.multi_reduction <add>, %287, %cst_97 [2] : vector<1x8x8xf32> to vector<1x8xf32>
    %289 = vector.shape_cast %288 : vector<1x8xf32> to vector<1x8x1xf32>
    %290 = tpu.reciprocal %289 {approx = true} : vector<1x8x1xf32> -> vector<1x8x1xf32>
    %291 = vector.broadcast %290 : vector<1x8x1xf32> to vector<1x8x8xf32>
    %292 = arith.mulf %287, %291 : vector<1x8x8xf32>
    %293 = arith.truncf %292 : vector<1x8x8xf32> to vector<1x8x8xbf16>
    %294 = arith.truncf %277 : vector<1x8x8xf32> to vector<1x8x8xbf16>
    "tpu.trace_start"() <{level = 10 : i32, message = "bqk,bkd->bqd"}> : () -> ()
    %cst_98 = arith.constant dense<0.000000e+00> : vector<1x8x8xf32>
    %295 = tpu.matmul %293, %294, %cst_98 {dimension_numbers = #tpu.dot_dimension_numbers<[2], [1], [1], [2], [0, 0, 0, 1, 1, 2], [0], [0]>} : vector<1x8x8xbf16>, vector<1x8x8xbf16>, vector<1x8x8xf32> -> vector<1x8x8xf32>
    "tpu.trace_stop"() : () -> ()
    %296 = vector.shape_cast %295 : vector<1x8x8xf32> to vector<8x8xf32>
    %297 = vector.extract_strided_slice %192 {offsets = [3, 0, 0], sizes = [1, 8, 32], strides = [1, 1, 1]} : vector<4x8x32xbf16> to vector<1x8x32xbf16>
    %298 = vector.shape_cast %297 : vector<1x8x32xbf16> to vector<8x32xbf16>
    %299 = arith.truncf %296 : vector<8x8xf32> to vector<8x8xbf16>
    %cst_99 = arith.constant dense<0.000000e+00> : vector<8x32xf32>
    %300 = tpu.matmul %299, %298, %cst_99 {dimension_numbers = #tpu.dot_dimension_numbers<[1], [0], [0], [1], [0, 0, 1, 1], [], []>} : vector<8x8xbf16>, vector<8x32xbf16>, vector<8x32xf32> -> vector<8x32xf32>
    %301 = arith.addf %274, %300 : vector<8x32xf32>
    %302 = arith.addf %181, %301 : vector<8x32xf32>
    %c1_100 = arith.constant 1 : index
    %c0_101 = arith.constant 0 : index
    %c0_102 = arith.constant 0 : index
    %303 = vector.load %arg5[%c1_100, %c0_101, %c0_102] : memref<2x1x32xf32, #tpu.memory_space<vmem>>, vector<1x1x32xf32>
    %304 = vector.shape_cast %303 : vector<1x1x32xf32> to vector<1x32xf32>
    %305 = vector.broadcast %304 : vector<1x32xf32> to vector<8x32xf32>
    %306 = arith.addf %302, %305 : vector<8x32xf32>
    %cst_103 = arith.constant dense<0.000000e+00> : vector<8xf32>
    %307 = vector.multi_reduction <add>, %306, %cst_103 [1] : vector<8x32xf32> to vector<8xf32>
    %308 = vector.shape_cast %307 : vector<8xf32> to vector<8x1xf32>
    %cst_104 = arith.constant 3.200000e+01 : f32
    %309 = vector.broadcast %cst_104 : f32 to vector<8x1xf32>
    %310 = arith.divf %308, %309 : vector<8x1xf32>
    %311 = vector.broadcast %310 : vector<8x1xf32> to vector<8x32xf32>
    %312 = arith.subf %306, %311 : vector<8x32xf32>
    %313 = arith.mulf %312, %312 : vector<8x32xf32>
    %cst_105 = arith.constant dense<0.000000e+00> : vector<8xf32>
    %314 = vector.multi_reduction <add>, %313, %cst_105 [1] : vector<8x32xf32> to vector<8xf32>
    %315 = vector.shape_cast %314 : vector<8xf32> to vector<8x1xf32>
    %cst_106 = arith.constant 3.200000e+01 : f32
    %316 = vector.broadcast %cst_106 : f32 to vector<8x1xf32>
    %317 = arith.divf %315, %316 : vector<8x1xf32>
    %318 = vector.broadcast %310 : vector<8x1xf32> to vector<8x32xf32>
    %319 = arith.subf %306, %318 : vector<8x32xf32>
    %cst_107 = arith.constant 9.99999974E-6 : f32
    %320 = vector.broadcast %cst_107 : f32 to vector<8x1xf32>
    %321 = arith.addf %317, %320 : vector<8x1xf32>
    %322 = math.rsqrt %321 : vector<8x1xf32>
    %323 = vector.broadcast %322 : vector<8x1xf32> to vector<8x32xf32>
    %324 = arith.mulf %319, %323 : vector<8x32xf32>
    %c1_108 = arith.constant 1 : index
    %c0_109 = arith.constant 0 : index
    %c0_110 = arith.constant 0 : index
    %325 = vector.load %arg6[%c1_108, %c0_109, %c0_110] : memref<2x32x64xbf16, #tpu.memory_space<vmem>>, vector<1x32x64xbf16>
    %326 = vector.shape_cast %325 : vector<1x32x64xbf16> to vector<32x64xbf16>
    %327 = arith.truncf %324 : vector<8x32xf32> to vector<8x32xbf16>
    %cst_111 = arith.constant dense<0.000000e+00> : vector<8x64xf32>
    %328 = tpu.matmul %327, %326, %cst_111 {dimension_numbers = #tpu.dot_dimension_numbers<[1], [0], [0], [1], [0, 0, 1, 1], [], []>} : vector<8x32xbf16>, vector<32x64xbf16>, vector<8x64xf32> -> vector<8x64xf32>
    %c1_112 = arith.constant 1 : index
    %c0_113 = arith.constant 0 : index
    %c0_114 = arith.constant 0 : index
    %329 = vector.load %arg7[%c1_112, %c0_113, %c0_114] : memref<2x1x64xf32, #tpu.memory_space<vmem>>, vector<1x1x64xf32>
    %330 = vector.shape_cast %329 : vector<1x1x64xf32> to vector<1x64xf32>
    %331 = vector.broadcast %330 : vector<1x64xf32> to vector<8x64xf32>
    %332 = arith.addf %328, %331 : vector<8x64xf32>
    %cst_115 = arith.constant 0.000000e+00 : f32
    %333 = vector.broadcast %cst_115 : f32 to vector<8x64xf32>
    %334 = arith.maximumf %332, %333 : vector<8x64xf32>
    %c1_116 = arith.constant 1 : index
    %c0_117 = arith.constant 0 : index
    %c0_118 = arith.constant 0 : index
    %335 = vector.load %arg8[%c1_116, %c0_117, %c0_118] : memref<2x64x32xbf16, #tpu.memory_space<vmem>>, vector<1x64x32xbf16>
    %336 = vector.shape_cast %335 : vector<1x64x32xbf16> to vector<64x32xbf16>
    %337 = arith.truncf %334 : vector<8x64xf32> to vector<8x64xbf16>
    %cst_119 = arith.constant dense<0.000000e+00> : vector<8x32xf32>
    %338 = tpu.matmul %337, %336, %cst_119 {dimension_numbers = #tpu.dot_dimension_numbers<[1], [0], [0], [1], [0, 0, 1, 1], [], []>} : vector<8x64xbf16>, vector<64x32xbf16>, vector<8x32xf32> -> vector<8x32xf32>
    %339 = arith.addf %324, %338 : vector<8x32xf32>
    %c1_120 = arith.constant 1 : index
    %c0_121 = arith.constant 0 : index
    %c0_122 = arith.constant 0 : index
    %340 = vector.load %arg9[%c1_120, %c0_121, %c0_122] : memref<2x1x32xf32, #tpu.memory_space<vmem>>, vector<1x1x32xf32>
    %341 = vector.shape_cast %340 : vector<1x1x32xf32> to vector<1x32xf32>
    %342 = vector.broadcast %341 : vector<1x32xf32> to vector<8x32xf32>
    %343 = arith.addf %339, %342 : vector<8x32xf32>
    %cst_123 = arith.constant dense<0.000000e+00> : vector<8xf32>
    %344 = vector.multi_reduction <add>, %343, %cst_123 [1] : vector<8x32xf32> to vector<8xf32>
    %345 = vector.shape_cast %344 : vector<8xf32> to vector<8x1xf32>
    %cst_124 = arith.constant 3.200000e+01 : f32
    %346 = vector.broadcast %cst_124 : f32 to vector<8x1xf32>
    %347 = arith.divf %345, %346 : vector<8x1xf32>
    %348 = vector.broadcast %347 : vector<8x1xf32> to vector<8x32xf32>
    %349 = arith.subf %343, %348 : vector<8x32xf32>
    %350 = arith.mulf %349, %349 : vector<8x32xf32>
    %cst_125 = arith.constant dense<0.000000e+00> : vector<8xf32>
    %351 = vector.multi_reduction <add>, %350, %cst_125 [1] : vector<8x32xf32> to vector<8xf32>
    %352 = vector.shape_cast %351 : vector<8xf32> to vector<8x1xf32>
    %cst_126 = arith.constant 3.200000e+01 : f32
    %353 = vector.broadcast %cst_126 : f32 to vector<8x1xf32>
    %354 = arith.divf %352, %353 : vector<8x1xf32>
    %355 = vector.broadcast %347 : vector<8x1xf32> to vector<8x32xf32>
    %356 = arith.subf %343, %355 : vector<8x32xf32>
    %cst_127 = arith.constant 9.99999974E-6 : f32
    %357 = vector.broadcast %cst_127 : f32 to vector<8x1xf32>
    %358 = arith.addf %354, %357 : vector<8x1xf32>
    %359 = math.rsqrt %358 : vector<8x1xf32>
    %360 = vector.broadcast %359 : vector<8x1xf32> to vector<8x32xf32>
    %361 = arith.mulf %356, %360 : vector<8x32xf32>
    %c0_128 = arith.constant 0 : index
    %c0_129 = arith.constant 0 : index
    %362 = vector.load %arg10[%c0_128, %c0_129] : memref<32x128xbf16, #tpu.memory_space<vmem>>, vector<32x128xbf16>
    %363 = arith.truncf %361 : vector<8x32xf32> to vector<8x32xbf16>
    %cst_130 = arith.constant dense<0.000000e+00> : vector<8x128xf32>
    %364 = tpu.matmul %363, %362, %cst_130 {dimension_numbers = #tpu.dot_dimension_numbers<[1], [0], [0], [1], [0, 0, 1, 1], [], []>} : vector<8x32xbf16>, vector<32x128xbf16>, vector<8x128xf32> -> vector<8x128xf32>
    %c0_131 = arith.constant 0 : index
    %c0_132 = arith.constant 0 : index
    %365 = vector.load %arg11[%c0_131, %c0_132] : memref<1x128xf32, #tpu.memory_space<vmem>>, vector<1x128xf32>
    %366 = vector.broadcast %365 : vector<1x128xf32> to vector<8x128xf32>
    %367 = arith.addf %364, %366 : vector<8x128xf32>
    %368 = vector.shape_cast %367 : vector<8x128xf32> to vector<1x8x128xf32>
    %c0_133 = arith.constant 0 : index
    %c0_134 = arith.constant 0 : index
    %c0_135 = arith.constant 0 : index
    %369 = vector.load %arg12[%c0_133, %c0_134, %c0_135] : memref<1x8x128xf32, #tpu.memory_space<vmem>>, vector<1x8x128xf32>
    tpu.vector_store %arg12[%c0_133, %c0_134, %c0_135], %368 {strides = array<i32>} : memref<1x8x128xf32, #tpu.memory_space<vmem>>, vector<1x8x128xf32>,
    return
  }
  func.func @transform_0(%arg0: i32) -> (i32, i32, i32) {
    %c0_i32 = arith.constant 0 : i32
    %c0_i32_0 = arith.constant 0 : i32
    %c0_i32_1 = arith.constant 0 : i32
    return %arg0, %c0_i32, %c0_i32_0 : i32, i32, i32
  }
  func.func @transform_1(%arg0: i32) -> (i32, i32, i32) {
    %c0_i32 = arith.constant 0 : i32
    %c0_i32_0 = arith.constant 0 : i32
    %c0_i32_1 = arith.constant 0 : i32
    %c0_i32_2 = arith.constant 0 : i32
    return %c0_i32, %c0_i32_0, %c0_i32_1 : i32, i32, i32
  }
  func.func @transform_2(%arg0: i32) -> (i32, i32, i32) {
    %c0_i32 = arith.constant 0 : i32
    %c0_i32_0 = arith.constant 0 : i32
    %c0_i32_1 = arith.constant 0 : i32
    %c0_i32_2 = arith.constant 0 : i32
    return %c0_i32, %c0_i32_0, %c0_i32_1 : i32, i32, i32
  }
  func.func @transform_3(%arg0: i32) -> (i32, i32, i32, i32) {
    %c0_i32 = arith.constant 0 : i32
    %c0_i32_0 = arith.constant 0 : i32
    %c0_i32_1 = arith.constant 0 : i32
    %c0_i32_2 = arith.constant 0 : i32
    %c0_i32_3 = arith.constant 0 : i32
    return %c0_i32, %c0_i32_0, %c0_i32_1, %c0_i32_2 : i32, i32, i32, i32
  }
  func.func @transform_4(%arg0: i32) -> (i32, i32, i32) {
    %c0_i32 = arith.constant 0 : i32
    %c0_i32_0 = arith.constant 0 : i32
    %c0_i32_1 = arith.constant 0 : i32
    %c0_i32_2 = arith.constant 0 : i32
    return %c0_i32, %c0_i32_0, %c0_i32_1 : i32, i32, i32
  }
  func.func @transform_5(%arg0: i32) -> (i32, i32, i32) {
    %c0_i32 = arith.constant 0 : i32
    %c0_i32_0 = arith.constant 0 : i32
    %c0_i32_1 = arith.constant 0 : i32
    %c0_i32_2 = arith.constant 0 : i32
    return %c0_i32, %c0_i32_0, %c0_i32_1 : i32, i32, i32
  }
  func.func @transform_6(%arg0: i32) -> (i32, i32, i32) {
    %c0_i32 = arith.constant 0 : i32
    %c0_i32_0 = arith.constant 0 : i32
    %c0_i32_1 = arith.constant 0 : i32
    %c0_i32_2 = arith.constant 0 : i32
    return %c0_i32, %c0_i32_0, %c0_i32_1 : i32, i32, i32
  }
  func.func @transform_7(%arg0: i32) -> (i32, i32, i32) {
    %c0_i32 = arith.constant 0 : i32
    %c0_i32_0 = arith.constant 0 : i32
    %c0_i32_1 = arith.constant 0 : i32
    %c0_i32_2 = arith.constant 0 : i32
    return %c0_i32, %c0_i32_0, %c0_i32_1 : i32, i32, i32
  }
  func.func @transform_8(%arg0: i32) -> (i32, i32, i32) {
    %c0_i32 = arith.constant 0 : i32
    %c0_i32_0 = arith.constant 0 : i32
    %c0_i32_1 = arith.constant 0 : i32
    %c0_i32_2 = arith.constant 0 : i32
    return %c0_i32, %c0_i32_0, %c0_i32_1 : i32, i32, i32
  }
  func.func @transform_9(%arg0: i32) -> (i32, i32) {
    %c0_i32 = arith.constant 0 : i32
    %c0_i32_0 = arith.constant 0 : i32
    %c0_i32_1 = arith.constant 0 : i32
    return %c0_i32, %c0_i32_0 : i32, i32
  }
  func.func @transform_10(%arg0: i32) -> (i32, i32) {
    %c0_i32 = arith.constant 0 : i32
    %c0_i32_0 = arith.constant 0 : i32
    %c0_i32_1 = arith.constant 0 : i32
    return %c0_i32, %c0_i32_0 : i32, i32
  }
  func.func @transform_11(%arg0: i32) -> (i32, i32, i32) {
    %c0_i32 = arith.constant 0 : i32
    %c0_i32_0 = arith.constant 0 : i32
    %c0_i32_1 = arith.constant 0 : i32
    return %arg0, %c0_i32, %c0_i32_0 : i32, i32, i32
  }
}

</mosaic_0001>

<bundles_post_ra>
// kernel: radioml_transformer_forward.1
= control target key start
LH: loop header
LB: loop body
LE: loop exit
PB: predicated region body
PF: predicated region fallthrough
CT: control target
= control target key end

     0   :  { %s3914_s0 = inlined_call_operand.hbm [shape: f32[2,8,32], index: 0, kind: input, shape index: {}]   ;;  %s3915_s1 = inlined_call_operand.vmem [shape: bf16[2,32,96], index: 1, kind: input, shape index: {}]   ;;  %s3916_s2 = inlined_call_operand.vmem [shape: f32[2,1,96], index: 2, kind: input, shape index: {}]   ;;  %s3917_s3 = inlined_call_operand.vmem [shape: bf16[2,4,8,32], index: 3, kind: input, shape index: {}]   ;;  %s3918_s4 = inlined_call_operand.hbm [shape: f32[2,1,32], index: 4, kind: input, shape index: {}]   ;;  %s3919_s5 = inlined_call_operand.vmem [shape: bf16[2,32,64], index: 5, kind: input, shape index: {}]   ;;  %s3920_s6 = inlined_call_operand.hbm [shape: f32[2,1,64], index: 6, kind: input, shape index: {}]   ;;  %s3921_s7 = inlined_call_operand.vmem [shape: bf16[2,64,32], index: 7, kind: input, shape index: {}]   ;;  %s3922_s8 = inlined_call_operand.hbm [shape: f32[2,1,32], index: 8, kind: input, shape index: {}]   ;;  %s3923_s9 = inlined_call_operand.vmem [shape: bf16[32,128], index: 9, kind: input, shape index: {}]   ;;  %s3924_s10 = inlined_call_operand.hbm [shape: f32[1,128], index: 10, kind: input, shape index: {}]   ;;  %s3925_s11 = inlined_call_operand.hbm [shape: f32[2,8,128], index: 11, kind: output, shape index: {}]  }
   0x1   :  { %3940 = sst [smem:[#allocation16_spill]] %s3918_s4 }
   0x2   :  { %3941 = sst [smem:[#allocation17_spill]] %s3921_s7 }
   0x3   :  { %3942 = sst [smem:[#allocation18_spill]] %s3923_s9 }
   0x4   :  { %3943 = sst [smem:[#allocation19_spill]] %s3925_s11 }
   0x5   :  { %16 = vsyncpa [#allocation3], 0 }
   0x6   :  { %18 = vsyncpa [#allocation3 + $0x1], 0 }
   0x7   :  { %19 = vsyncpa [#allocation6], 0 }
   0x8   :  { %20 = vsyncpa [#allocation9], 0 }
   0x9   :  { %21 = vsyncpa [#allocation4], 0 }
   0xa   :  { %23 = vsyncpa [#allocation4 + $0x1], 0  ;;  %s3288_s17 = smov 0   ;;  %s3290_s18 = smov 0  }
   0xb   :  { %s3292_s19 = smov 0   ;;  %s3294_s20 = smov 0  }
   0xc LB: > { %s3207_s21 = smov [#allocation5]   ;;  %s3309_s23 = sadd.s32 4294967295, %s3205_s20   ;;  %s3205_s20 = sphi %s3294_s20, %s3976_s20   ;;  %s3201_s19 = sphi %s3292_s19, %s3975_s19   ;;  %s3197_s18 = sphi %s3290_s18, %s3974_s18   ;;  %s3193_s17 = sphi %s3288_s17, %s3973_s17  }
   0xd   : > { %s317_s22 = sshll.u32 %s3207_s21, 4  ;;  %p2450_p0 = scmp.ge.s32.totalorder %s3205_s20, 1  ;;  %s3314_s22 = int_to_ptr.vmem [resolvable:$true] %s317_s22 }
   0xe   : > { %p3929_p1 = scmp.eq.s32.totalorder %s3309_s23, 0  ;;  %p296_p2 = scmp.lt.s32.totalorder %s3205_s20, 3 }
   0xf   : > { %s3208_s25 = smov [#allocation8]   ;;  %s3209_s28 = smov [#allocation7]  }
  0x10   : > { %p3316_p3 = pnand %p2450_p0, %p296_p2  ;;  %s349_s26 = sshll.u32 %s3208_s25, 4  ;;  %s3329_s26 = int_to_ptr.vmem [resolvable:$true] %s349_s26 }
  0x11   : > { %s333_s29 = sshll.u32 %s3209_s28, 4  ;;  %s3946_s4 = sld [smem:[#allocation16_spill]]  ;;  %s3331_s29 = int_to_ptr.vmem [resolvable:$true] %s333_s29 }
  0x12   : > { %s3944_s24 = scalar_select %p3316_p3, 1, 0 }
  0x13   : > { %p2849_p5 = pneg %p3316_p3 }
  0x15   : > { %p3325_p6 = pnand %p2849_p5, %p3929_p1 }
  0x17   : > { %s2989_s13 = scalar_lea.hbm %s3946_s4, 32  ;;  %p3341_p8 = pneg %p3325_p6 }
  0x18   : > { %p2990_p7 = scmp.ne.s32.totalorder %s3946_s4, %s2989_s13  ;;  %p2996_p11 = scmp.lt.u32.totalorder %s2989_s13, %s3946_s4 }
  0x1a   : > { %p2992_p9 = pnand %p3341_p8, %p2990_p7 }
  0x1c   : > { %p2993_p10 = pneg %p2992_p9 }
  0x1e   : > { %p2998_p12 = pnand %p2996_p11, %p2993_p10 }
  0x20   : > { %3001 = shalt.err (!%p2998_p12)
}
  0x21   : > { %s3002_s28 = scalar_lea.vmem %s3314_s22, 32  ;;  %p3010_p5 = scmp.lt.s32.totalorder %s3314_s22, %s3314_s22 }
  0x22   : > { %p3003_p13 = scmp.ne.s32.totalorder %s3314_s22, %s3002_s28  ;;  %p3011_p4 = scmp.lt.s32.totalorder %s3002_s28, %s3002_s28 }
  0x24   : > { %p3005_p0 = pnand %p3003_p13, %p3341_p8  ;;  %p3012_p7 = por %p3011_p4, %p3010_p5 }
  0x26   : > { %p3006_p2 = pneg %p3005_p0 }
  0x28   : > { %p3013_p9 = pnand %p3012_p7, %p3006_p2 }
  0x2a   : > { %3016 = shalt.err (!%p3013_p9)
}
  0x2b   : > { %s3210_s30 = smov 16   ;;  %s3211_s12 = smov 1  }
  0x2c   : > { %2852 = dma.hbm_to_vmem [thread:$0]  (!%p3325_p6), %s3946_s4, 32, %s3314_s22, [#allocation6], %s3210_s30, %s3210_s30, %s3211_s12  }
  0x2d   : > { %s3017_s25 = scalar_lea.hbm %s3922_s8, 32 }
  0x2e   : > { %p3018_p4 = scmp.ne.s32.totalorder %s3922_s8, %s3017_s25  ;;  %p3024_p12 = scmp.lt.u32.totalorder %s3017_s25, %s3922_s8 }
  0x30   : > { %p3020_p10 = pnand %p3018_p4, %p3341_p8 }
  0x32   : > { %p3021_p11 = pneg %p3020_p10 }
  0x34   : > { %p3026_p13 = pnand %p3024_p12, %p3021_p11 }
  0x36   : > { %3029 = shalt.err (!%p3026_p13)
}
  0x37   : > { %s3030_s22 = scalar_lea.vmem %s3329_s26, 32  ;;  %p3038_p7 = scmp.lt.s32.totalorder %s3329_s26, %s3329_s26 }
  0x38   : > { %p3031_p0 = scmp.ne.s32.totalorder %s3329_s26, %s3030_s22  ;;  %p3039_p9 = scmp.lt.s32.totalorder %s3030_s22, %s3030_s22 }
  0x3a   : > { %p3033_p2 = pnand %p3031_p0, %p3341_p8  ;;  %p3040_p4 = por %p3039_p9, %p3038_p7 }
  0x3c   : > { %p3034_p5 = pneg %p3033_p2 }
  0x3e   : > { %p3041_p10 = pnand %p3040_p4, %p3034_p5 }
  0x40   : > { %3044 = shalt.err (!%p3041_p10)
}
  0x41   : > { %2858 = dma.hbm_to_vmem [thread:$0]  (!%p3325_p6), %s3922_s8, 32, %s3329_s26, [#allocation9], %s3210_s30, %s3210_s30, %s3211_s12  }
  0x42   : > { %s3045_s14 = scalar_lea.hbm %s3920_s6, 32 }
  0x43   : > { %p3046_p11 = scmp.ne.s32.totalorder %s3920_s6, %s3045_s14  ;;  %p3052_p0 = scmp.lt.u32.totalorder %s3045_s14, %s3920_s6 }
  0x45   : > { %p3048_p12 = pnand %p3046_p11, %p3341_p8 }
  0x47   : > { %p3049_p13 = pneg %p3048_p12 }
  0x49   : > { %p3054_p2 = pnand %p3052_p0, %p3049_p13 }
  0x4b   : > { %3057 = shalt.err (!%p3054_p2)
}
  0x4c   : > { %s3058_s26 = scalar_lea.vmem %s3331_s29, 32  ;;  %p3066_p4 = scmp.lt.s32.totalorder %s3331_s29, %s3331_s29 }
  0x4d   : > { %p3059_p5 = scmp.ne.s32.totalorder %s3331_s29, %s3058_s26  ;;  %p3067_p10 = scmp.lt.s32.totalorder %s3058_s26, %s3058_s26 }
  0x4f   : > { %p3061_p7 = pnand %p3059_p5, %p3341_p8  ;;  %p3068_p11 = por %p3067_p10, %p3066_p4 }
  0x51   : > { %p3062_p9 = pneg %p3061_p7 }
  0x53   : > { %p3069_p12 = pnand %p3068_p11, %p3062_p9 }
  0x55   : > { %3072 = shalt.err (!%p3069_p12)
}
  0x56   : > { %2855 = dma.hbm_to_vmem [thread:$0]  (!%p3325_p6), %s3920_s6, 32, %s3331_s29, [#allocation6], %s3210_s30, %s3210_s30, %s3211_s12  }
  0x57   : > { %s3212_s9 = smov [#allocation10]   ;;  %s3073_s15 = scalar_lea.hbm %s3924_s10, 16 }
  0x58   : > { %s366_s11 = sshll.u32 %s3212_s9, 4  ;;  %p3074_p13 = scmp.ne.s32.totalorder %s3924_s10, %s3073_s15  ;;  %s367_s11 = int_to_ptr.vmem [resolvable:$true] %s366_s11 }
  0x59   : > { %p3080_p5 = scmp.lt.u32.totalorder %s3073_s15, %s3924_s10 }
  0x5a   : > { %p3076_p0 = pnand %p3074_p13, %p3341_p8 }
  0x5c   : > { %p3077_p2 = pneg %p3076_p0 }
  0x5e   : > { %p3082_p7 = pnand %p3080_p5, %p3077_p2 }
  0x60   : > { %3085 = shalt.err (!%p3082_p7)
}
  0x61   : > { %s3086_s29 = scalar_lea.vmem %s367_s11, 16  ;;  %s3093_s30 = scalar_lea.vmem %s367_s11, 32 }
  0x62   : > { %p3087_p9 = scmp.ne.s32.totalorder %s367_s11, %s3086_s29  ;;  %p3094_p11 = scmp.lt.s32.totalorder %s367_s11, %s367_s11 }
  0x63   : > { %p3095_p12 = scmp.lt.s32.totalorder %s3093_s30, %s3086_s29 }
  0x64   : > { %p3089_p4 = pnand %p3087_p9, %p3341_p8 }
  0x65   : > { %p3096_p1 = por %p3095_p12, %p3094_p11 }
  0x66   : > { %p3090_p10 = pneg %p3089_p4 }
  0x68   : > { %p3097_p3 = pnand %p3096_p1, %p3090_p10 }
  0x6a   : > { %3100 = shalt.err (!%p3097_p3)
}
  0x6b   : > { %2861 = dma.hbm_to_vmem [thread:$0]  (!%p3325_p6), %s3924_s10, 16, %s367_s11, [#allocation9]  }
  0x6c   : > { %s2449_s16 = sadd.s32 4294967294, %s3205_s20   ;;  %s3437_s27 = sadd.s32 1, %s3205_s20  }
  0x6d   : > { %s33_s7 = ssub.s32 %s3205_s20, %s3437_s27  ;;  %s36_s9 = sadd.s32 1, %s3201_s19 }
  0x6e   : > { %p34_p1 = scmp.eq.s32.totalorder %s33_s7, 0  ;;  %p43_p3 = scmp.ne.s32.totalorder %s3201_s19, %s3197_s18 }
  0x6f   : > { %p44_p8 = scmp.eq.s32.totalorder %s3205_s20, 0  ;;  %p49_p13 = scmp.ne.s32.totalorder %s3197_s18, %s3193_s17 }
  0x70   : > { %s3448_s13 = scalar_select %p34_p1, %s3201_s19, %s36_s9  }
  0x71   : > { %p3450_p0 = por %p44_p8, %p43_p3  ;;  %p3949_p2 = scmp.eq.s32.totalorder %s3309_s23, 0 }
  0x72   : > { %p283_p5 = scmp.eq.s32.totalorder %s3309_s23, 1  ;;  %p289_p7 = scmp.eq.s32.totalorder %s2449_s16, 1 }
  0x73   : > { %p3456_p6 = por %p3949_p2, %p49_p13  ;;  %p2874_p9 = scmp.lt.s32.totalorder %s3205_s20, 2 }
  0x74   : > { %s377_s15 = sand.u32 1, %s3201_s19   ;;  %p3463_p4 = por %p283_p5, %p43_p3 }
  0x75   : > { %p3467_p10 = por %p289_p7, %p49_p13  ;;  %s2456_s28 = sshll.u32 %s377_s15, 3 }
  0x76   : > { %s3951_s21 = scalar_select %p3463_p4, 1, 0 }
  0x77   : > { %s3952_s25 = scalar_select %p3467_p10, 1, 0 }
  0x78   : > { %s2457_s26 = sshll.u32 %s3205_s20, 7  ;;  %s381_s22 = scalar_lea.vmem [#allocation2], %s2456_s28 }
  0x79   : > { %s3475_s12 = scalar_lea.hbm %s3914_s0, %s2457_s26  ;;  %s388_s16 = sshll.u32 %s381_s22, 4  ;;  %s3477_s16 = int_to_ptr.vmem [resolvable:$true] %s388_s16 }
  0x7a   : > { %p3481_p11 = pnand %p2874_p9, %p3450_p0  ;;  %s378_s9 = scalar_lea.sflag [#allocation3], %s377_s15 }
  0x7b   : > { %s3101_s4 = scalar_lea.hbm %s3475_s12, 128  ;;  %s3106_s29 = scalar_lea.hbm %s3914_s0, 256 }
  0x7c   : > { %p3102_p12 = scmp.ne.s32.totalorder %s3475_s12, %s3101_s4  ;;  %p3103_p1 = pneg %p3481_p11 }
  0x7d   : > { %p3107_p13 = scmp.lt.u32.totalorder %s3475_s12, %s3914_s0  ;;  %p3108_p0 = scmp.lt.u32.totalorder %s3106_s29, %s3101_s4 }
  0x7e   : > { %p3104_p3 = pnand %p3103_p1, %p3102_p12  ;;  %p3110_p5 = scmp.lt.u32.totalorder %s3101_s4, %s3475_s12 }
  0x7f   : > { %p3109_p2 = por %p3108_p0, %p3107_p13 }
  0x80   : > { %p3105_p8 = pneg %p3104_p3 }
  0x81   : > { %p3111_p7 = por %p3110_p5, %p3109_p2 }
  0x83   : > { %p3112_p9 = pnand %p3111_p7, %p3105_p8 }
  0x85   : > { %3115 = shalt.err (!%p3112_p9)
}
  0x86   : > { %s3116_s15 = scalar_lea.vmem %s3477_s16, 128  ;;  %s3213_s22 = smov [#allocation2]  }
  0x87   : > { %p3117_p12 = scmp.ne.s32.totalorder %s3477_s16, %s3116_s15  ;;  %s3121_s28 = sshll.u32 %s3213_s22, 4  ;;  %s3122_s28 = int_to_ptr.vmem [resolvable:$false] %s3121_s28 }
  0x88   : > { %s3123_s26 = scalar_lea.vmem %s3122_s28, 256  ;;  %p3124_p4 = scmp.lt.s32.totalorder %s3477_s16, %s3122_s28 }
  0x89   : > { %p3119_p3 = pnand %p3117_p12, %p3103_p1  ;;  %p3125_p13 = scmp.lt.s32.totalorder %s3123_s26, %s3116_s15 }
  0x8b   : > { %p3120_p10 = pneg %p3119_p3  ;;  %p3126_p0 = por %p3125_p13, %p3124_p4 }
  0x8d   : > { %p3127_p2 = pnand %p3126_p0, %p3120_p10 }
  0x8f   : > { %3130 = shalt.err (!%p3127_p2)
}
  0x90   : > { %2865 = dma.hbm_to_vmem [thread:$0]  (!%p3481_p11), %s3475_s12, 128, %s3477_s16, %s378_s9  }
  0x91   : > { %p3954_p8 = scmp.ne.s32.totalorder %s3944_s24, 0 }
  0x92   : > { %s3513_s4 = sand.u32 (!%p3954_p8), 1, %s3197_s18  }
  0x93   : > { %397 = sbr.rel (%p3954_p8) target bundleno = 7710 (0x1e1e), region = 64  ;;  %s3932_s29 = sshll.u32 (!%p3954_p8), %s3513_s4, 3 }
  0x94   : > { %s400_s14 = scalar_lea.sflag (!%p3954_p8), [#allocation3], %s3513_s4  ;;  %s403_s30 = scalar_lea.vmem (!%p3954_p8), [#allocation2], %s3932_s29 }
  0x9a   : > { %3176 = dma.done.wait (%p3456_p6), %s400_s14, 128  }
  0x9b   : > { %3178 = vsyncadd (%p3456_p6), %s400_s14, 4294967168  ;;  %p3955_p4 = scmp.eq.s32.totalorder %s3309_s23, 0 }
  0x9d   : > { %3180 = dma.done.wait (%p3955_p4), [#allocation6], 64   ;;  %p3956_p10 = pmov %p3955_p4 }
  0x9e   : > { %p3957_p11 = pmov %p3955_p4 }
  0x9f   : > { %3182 = vsyncadd (%p3956_p10), [#allocation6], 4294967232 }
  0xa0   : > { %3184 = dma.done.wait (%p3957_p11), [#allocation9], 48   ;;  %p3958_p1 = pmov %p3955_p4 }
  0xa1   : > { %v3214_v0 = vmov 0.0   ;;  %vm3215_vm0 = vmmov 0   ;;  %v2931_v1 = vld [vmem:[%s3915_s1] sm:$0xff]   ;;  %v2932_v2 = vld [vmem:[%s3915_s1 + $0x8] sm:$0xff]   ;;  %vm484_vm1 = vcmask 261120   ;;  %s3216_s15 = smov 120  }
  0xa2   : > { %3186 = vsyncadd (%p3958_p1), [#allocation9], 4294967248  ;;  %2621 = vmatprep.subr.bf16.mxu0 %v3214_v0  ;;  %2625 = vmatprep.mubr.msk.bf16.mxu0 %vm3215_vm0, %v3214_v0  ;;  %v3543_v3 = vld [vmem:[%s403_s30] sm:$0xff]  ;;  %s3217_s22 = smov 96   ;;  %s3218_s28 = smov 88   ;;  %vm536_vm2 = vcmask 64512  }
  0xa3   : > { %2629 = vmatprep.subr.bf16.mxu1 %v3214_v0  ;;  %2631 = vmatprep.mubr.msk.bf16.mxu1 %vm3215_vm0, %v3214_v0  ;;  %v464_v4 = vpack.c.bf16 %v3543_v3, %v3543_v3  ;;  %v2465_v5 = vld [vmem:[%s3916_s2] ss:$0 sm:$0xff]  ;;  %s3938_s26 = smov 64   ;;  %s3220_s14 = smov 56   ;;  %vm601_vm3 = vcmask 1043456   ;;  %vm1292_vm4 = vcmask 523264  }
  0xa4   : > { %2622 = vmatpush3.bf16.msra.mxu0 %v2931_v1  ;;  %s3939_s30 = smov 112   ;;  %s3937_s24 = smov 80   ;;  %v528_v51 = vld [vmem:[%s3917_s3] sm:$0xf]  ;;  %v529_v53 = vld [vmem:[%s3917_s3 + $0x4] sm:$0xf] }
  0xa5   : > { %2623 = vmatprep.subr.bf16.mxu0 %v3214_v0  ;;  %v808_v52 = vsel %vm601_vm3, %v528_v51, 0  ;;  %v762_v54 = vsel %vm601_vm3, %v529_v53, 0  ;;  %s3934_s9 = smov 72   ;;  %s3935_s11 = smov 104  }
  0xa6   : > { %s3936_s12 = smov 48   ;;  %s3933_s16 = smov 40  }
  0xa7   : > { %s3964_s29 = smov 104   ;;  %s3965_s7 = smov 72  }
  0xa8   : > { %2624 = vmatpush3.bf16.msra.mxu0 %v2932_v2  ;;  %p3970_p5 = scmp.ne.s32.totalorder %s3951_s21, 0 }
  0xa9   : > { %2635 = vmatprep.subr.bf16.mxu0 %v3214_v0 }
  0xab   : > { %2626 = vmatmul.mubr.msk.bf16.vlgmr.msra.gmra.mrb[0].mxu0 %vm484_vm1, %v464_v4 }
  0xac   : > { %2637 = vmatprep.mubr.msk.bf16.mxu0 %vm3215_vm0, %v3214_v0 }
 0x17e   : > { %v522_v6 = vpop.f32.mrb[0].mxu0 }
 0x17f   : > { %v523_v7 = vadd.f32 %v2465_v5, %v522_v6  ;;  %v2627_v8 = vpop.f32.mrb[1].mxu0 }
 0x180   : > { %v525_v9 = vpop.f32.mrb[2].mxu0 }
 0x181   : > { %v3555_v10 = vpack.c.bf16 %v523_v7, %v523_v7  ;;  %v2628_v11 = vpop.f32.mrb[3].mxu0 }
 0x183   : > { %646 = vrot.lane.b32.xlu1 %v3555_v10, %s3216_s15  ;;  %534 = vrot.lane.b32.xlu0 %v3555_v10, %s3217_s22 }
 0x187   : > { %648 = vrot.lane.b32.xlu0 %v3555_v10, %s3218_s28 }
 0x1f5   : > { %v535_v12 = vpop.permute.xlu0 %534  ;;  %v647_v16 = vpop.permute.xlu1 %646 }
 0x1f6   : > { %v541_v13 = vsel %vm536_vm2, %v535_v12, 0 }
 0x1f7   : > { %2630 = vmatpush3.bf16.xpose.msra.mxu1 %v541_v13 }
 0x1f8   : > { %2641 = vmatprep.subr.bf16.mxu1 %v3214_v0 }
 0x1f9   : > { %v649_v14 = vpop.permute.xlu0 %648 }
 0x1fa   : > { %v654_v15 = vsel %vm536_vm2, %v649_v14, 0 }
 0x1fe   : > { %2632 = vmatmul.mubr.msk.bf16.vlgmr.msra.gmra.mrb[0].mxu1 %vm536_vm2, %v3555_v10 }
 0x1ff   : > { %2642 = vmatpush3.bf16.xpose.msra.mxu1 %v654_v15  ;;  %2643 = vmatprep.mubr.msk.bf16.mxu1 %vm3215_vm0, %v3214_v0 }
 0x200   : > { %2653 = vmatprep.subr.bf16.mxu1 %v3214_v0 }
 0x206   : > { %2644 = vmatmul.mubr.msk.bf16.vlgmr.msra.gmra.mrb[4].mxu1 %vm536_vm2, %v647_v16 }
 0x207   : > { %2655 = vmatprep.mubr.msk.bf16.mxu1 %vm3215_vm0, %v3214_v0  ;;  %2654 = vmatpush3.bf16.msra.mxu1 %v762_v54 }
 0x208   : > { %2665 = vmatprep.subr.bf16.mxu1 %v3214_v0 }
 0x2d1   : > { %v577_v17 = vpop.f32.mrb[0].mxu1 }
 0x2d2   : > { %v583_v18 = vmul.f32 0.35355338, %v577_v17  ;;  %v2633_v19 = vpop.f32.mrb[1].mxu1 }
 0x2d3   : > { %v580_v20 = vpop.f32.mrb[2].mxu1 }
 0x2d4   : > { %v2634_v21 = vpop.f32.mrb[3].mxu1  ;;  %v584_v22 = vsel %vm536_vm2, %v583_v18, -inf }
 0x2d5   : > { %585 = vmax.xlane.f32.xlu1 %v584_v22 }
 0x2d9   : > { %v690_v23 = vpop.f32.mrb[4].mxu1 }
 0x2da   : > { %v696_v24 = vmul.f32 0.35355338, %v690_v23  ;;  %v2645_v25 = vpop.f32.mrb[5].mxu1 }
 0x2db   : > { %v693_v26 = vpop.f32.mrb[6].mxu1 }
 0x2dc   : > { %v2646_v27 = vpop.f32.mrb[7].mxu1  ;;  %v697_v28 = vsel %vm536_vm2, %v696_v24, -inf }
 0x2dd   : > { %698 = vmax.xlane.f32.xlu0 %v697_v28 }
 0x362   : > { %v586_v29 = vpop.xlane.xlu1 %585 }
 0x363   : > { %v587_v30 = vsub.f32 %v583_v18, %v586_v29 }
 0x365   : > { %v588_v31 = vmul.f32 1.442695, %v587_v30 }
 0x367   : > { %2949 = vpow2.f32 %v588_v31 }
 0x36a   : > { %v699_v32 = vpop.xlane.xlu0 %698 }
 0x36b   : > { %v700_v33 = vsub.f32 %v696_v24, %v699_v32 }
 0x36d   : > { %v701_v34 = vmul.f32 1.442695, %v700_v33 }
 0x36f   : > { %2951 = vpow2.f32 %v701_v34 }
 0x371   : > { %v2950_v35 = vpop.eup %2949 }
 0x372   : > { %v590_v36 = vsel %vm536_vm2, %v2950_v35, 0.0 }
 0x373   : > { %591 = vadd.xlane.f32.xlu0 %v590_v36  ;;  %v530_v36 = vld [vmem:[%s3917_s3 + $0x8] sm:$0xf] }
 0x379   : > { %v2952_v37 = vpop.eup %2951 }
 0x37a   : > { %v703_v38 = vsel %vm536_vm2, %v2952_v37, 0.0 }
 0x37b   : > { %704 = vadd.xlane.f32.xlu1 %v703_v38 }
 0x389   : > { %596 = vrot.lane.b32.xlu0 %v3555_v10, %s3938_s26 }
 0x38c   : > { %709 = vrot.lane.b32.xlu1 %v3555_v10, %s3220_s14 }
 0x38d   : > { %850 = vrot.lane.b32.xlu0 %v3555_v10, %s3939_s30 }
 0x390   : > { %852 = vrot.lane.b32.xlu1 %v3555_v10, %s3937_s24  ;;  %s3959_s24 = sld [smem:[#allocation17_spill]] }
 0x400   : > { %v592_v39 = vpop.xlane.xlu0 %591 }
 0x401   : > { %2953 = vrcp.f32 %v592_v39 }
 0x404   : > { %v597_v40 = vpop.permute.xlu0 %596 }
 0x405   : > { %v603_v41 = vsel %vm601_vm3, %v597_v40, 0 }
 0x406   : > { %2636 = vmatpush3.bf16.msra.mxu0 %v603_v41 }
 0x407   : > { %2647 = vmatprep.subr.bf16.mxu0 %v3214_v0 }
 0x408   : > { %v705_v42 = vpop.xlane.xlu1 %704  ;;  %v851_v5 = vpop.permute.xlu0 %850 }
 0x409   : > { %2955 = vrcp.f32 %v705_v42 }
 0x40b   : > { %v2954_v43 = vpop.eup %2953 }
 0x40c   : > { %v594_v44 = vmul.f32 %v2954_v43, %v2950_v35  ;;  %v710_v45 = vpop.permute.xlu1 %709 }
 0x40d   : > { %v715_v47 = vsel %vm601_vm3, %v710_v45, 0 }
 0x40e   : > { %v595_v46 = vpack.c.bf16 %v594_v44, %v594_v44 }
 0x410   : > { %2638 = vmatmul.mubr.msk.bf16.vlgmr.msra.gmra.mrb[4].mxu0 %vm536_vm2, %v595_v46  ;;  %v853_v60 = vpop.permute.xlu1 %852 }
 0x411   : > { %2648 = vmatpush3.bf16.msra.mxu0 %v715_v47  ;;  %2649 = vmatprep.mubr.msk.bf16.mxu0 %vm3215_vm0, %v3214_v0  ;;  %v858_v2 = vsel %vm536_vm2, %v853_v60, 0 }
 0x412   : > { %2659 = vmatprep.subr.bf16.mxu0 %v3214_v0 }
 0x413   : > { %v2956_v48 = vpop.eup %2955 }
 0x414   : > { %v707_v49 = vmul.f32 %v2956_v48, %v2952_v37  ;;  %v966_v37 = vsel %vm601_vm3, %v530_v36, 0 }
 0x416   : > { %v708_v50 = vpack.c.bf16 %v707_v49, %v707_v49 }
 0x418   : > { %2650 = vmatmul.mubr.msk.bf16.vlgmr.msra.gmra.mrb[8].mxu0 %vm536_vm2, %v708_v50 }
 0x419   : > { %2661 = vmatprep.mubr.msk.bf16.mxu0 %vm3215_vm0, %v3214_v0  ;;  %2660 = vmatpush3.bf16.msra.mxu0 %v808_v52 }
 0x41a   : > { %2671 = vmatprep.subr.bf16.mxu0 %v3214_v0 }
 0x4e3   : > { %v639_v55 = vpop.f32.mrb[4].mxu0 }
 0x4e4   : > { %v645_v56 = vpack.c.bf16 %v639_v55, %v639_v55  ;;  %v2639_v57 = vpop.f32.mrb[5].mxu0 }
 0x4e5   : > { %v642_v58 = vpop.f32.mrb[6].mxu0 }
 0x4e6   : > { %v2640_v59 = vpop.f32.mrb[7].mxu0  ;;  %2662 = vmatmul.mubr.msk.bf16.vlgmr.msra.gmra.mrb[12].mxu0 %vm536_vm2, %v645_v56 }
 0x4e7   : > { %2673 = vmatprep.mubr.msk.bf16.mxu0 %vm3215_vm0, %v3214_v0 }
 0x4eb   : > { %v751_v61 = vpop.f32.mrb[8].mxu0 }
 0x4ec   : > { %v757_v62 = vpack.c.bf16 %v751_v61, %v751_v61  ;;  %v2651_v63 = vpop.f32.mrb[9].mxu0 }
 0x4ed   : > { %v754_v1 = vpop.f32.mrb[10].mxu0 }
 0x4ee   : > { %v2652_v4 = vpop.f32.mrb[11].mxu0  ;;  %2656 = vmatmul.mubr.msk.bf16.vlgmr.msra.gmra.mrb[8].mxu1 %vm536_vm2, %v757_v62  ;;  %v531_v1 = vld [vmem:[%s3917_s3 + $0xc] sm:$0xf] }
 0x4ef   : > { %2666 = vmatpush3.bf16.xpose.msra.mxu1 %v858_v2  ;;  %2667 = vmatprep.mubr.msk.bf16.mxu1 %vm3215_vm0, %v3214_v0  ;;  %v1125_v2 = vsel %vm601_vm3, %v531_v1, 0 }
 0x4f0   : > { %2677 = vmatprep.subr.bf16.mxu1 %v3214_v0 }
 0x4f6   : > { %2668 = vmatmul.mubr.msk.bf16.vlgmr.msra.gmra.mrb[12].mxu1 %vm536_vm2, %v851_v5 }
 0x4f7   : > { %2679 = vmatprep.mubr.msk.bf16.mxu1 %vm3215_vm0, %v3214_v0  ;;  %2678 = vmatpush3.bf16.msra.mxu1 %v966_v37 }
 0x4f8   : > { %2689 = vmatprep.subr.bf16.mxu1 %v3214_v0 }
 0x5b9   : > { %v844_v6 = vpop.f32.mrb[12].mxu0 }
 0x5ba   : > { %v2663_v7 = vpop.f32.mrb[13].mxu0 }
 0x5bb   : > { %v847_v8 = vpop.f32.mrb[14].mxu0 }
 0x5bc   : > { %v2664_v9 = vpop.f32.mrb[15].mxu0 }
 0x5c1   : > { %v798_v11 = vpop.f32.mrb[8].mxu1 }
 0x5c2   : > { %v3617_v12 = vadd.f32 %v844_v6, %v798_v11  ;;  %v2657_v13 = vpop.f32.mrb[9].mxu1 }
 0x5c3   : > { %v801_v14 = vpop.f32.mrb[10].mxu1 }
 0x5c4   : > { %v2658_v15 = vpop.f32.mrb[11].mxu1  ;;  %v2481_v14 = vld [vmem:[#allocation5] ss:$0 sm:$0xff] }
 0x5c9   : > { %v894_v16 = vpop.f32.mrb[12].mxu1 }
 0x5ca   : > { %v900_v17 = vmul.f32 0.35355338, %v894_v16  ;;  %v2669_v18 = vpop.f32.mrb[13].mxu1 }
 0x5cb   : > { %v897_v19 = vpop.f32.mrb[14].mxu1 }
 0x5cc   : > { %v2670_v20 = vpop.f32.mrb[15].mxu1  ;;  %v901_v21 = vsel %vm536_vm2, %v900_v17, -inf }
 0x5cd   : > { %902 = vmax.xlane.f32.xlu1 %v901_v21 }
 0x5de   : > { %1011 = vrot.lane.b32.xlu1 %v3555_v10, %s3934_s9 }
 0x5e2   : > { %1009 = vrot.lane.b32.xlu1 %v3555_v10, %s3935_s11  ;;  %s3967_s11 = sld [smem:[#allocation18_spill]] }
 0x65a   : > { %v903_v22 = vpop.xlane.xlu1 %902 }
 0x65b   : > { %v904_v23 = vsub.f32 %v900_v17, %v903_v22 }
 0x65d   : > { %v905_v24 = vmul.f32 1.442695, %v904_v23 }
 0x65e   : > { %v1012_v32 = vpop.permute.xlu1 %1011 }
 0x65f   : > { %2957 = vpow2.f32 %v905_v24  ;;  %v1017_v34 = vsel %vm536_vm2, %v1012_v32, 0  ;;  %v2933_v24 = vld [vmem:[%s3919_s5] sm:$0xff]  }
 0x662   : > { %v1010_v35 = vpop.permute.xlu1 %1009 }
 0x669   : > { %v2958_v25 = vpop.eup %2957 }
 0x66a   : > { %v907_v26 = vsel %vm536_vm2, %v2958_v25, 0.0 }
 0x66b   : > { %908 = vadd.xlane.f32.xlu0 %v907_v26  ;;  %v2936_v26 = vld [vmem:[%s3959_s24 + $0x8] sm:$0xff]  }
 0x681   : > { %913 = vrot.lane.b32.xlu0 %v3555_v10, %s3936_s12  ;;  %s3227_s12 = smov [#allocation11]  }
 0x6f8   : > { %v909_v27 = vpop.xlane.xlu0 %908 }
 0x6f9   : > { %2959 = vrcp.f32 %v909_v27 }
 0x6fc   : > { %v914_v28 = vpop.permute.xlu0 %913 }
 0x6fd   : > { %v919_v29 = vsel %vm601_vm3, %v914_v28, 0 }
 0x6fe   : > { %2672 = vmatpush3.bf16.msra.mxu0 %v919_v29 }
 0x6ff   : > { %2683 = vmatprep.subr.bf16.mxu0 %v3214_v0 }
 0x703   : > { %v2960_v30 = vpop.eup %2959 }
 0x704   : > { %v911_v31 = vmul.f32 %v2960_v30, %v2958_v25  ;;  %v2935_v25 = vld [vmem:[%s3959_s24] sm:$0xff]  }
 0x706   : > { %v912_v33 = vpack.c.bf16 %v911_v31, %v911_v31 }
 0x708   : > { %2674 = vmatmul.mubr.msk.bf16.vlgmr.msra.gmra.mrb[16].mxu0 %vm536_vm2, %v912_v33  ;;  %v2937_v33 = vld [vmem:[%s3959_s24 + $0x10] sm:$0xff]  }
 0x709   : > { %2684 = vmatpush3.bf16.xpose.msra.mxu0 %v1017_v34  ;;  %2685 = vmatprep.mubr.msk.bf16.mxu0 %vm3215_vm0, %v3214_v0  ;;  %v2938_v34 = vld [vmem:[%s3959_s24 + $0x18] sm:$0xff]  }
 0x70a   : > { %2695 = vmatprep.subr.bf16.mxu0 %v3214_v0 }
 0x710   : > { %2686 = vmatmul.mubr.msk.bf16.vlgmr.msra.gmra.mrb[20].mxu0 %vm536_vm2, %v1010_v35  ;;  %v2482_v35 = vld [vmem:[#allocation7] ss:$0 sm:$0xff] }
 0x711   : > { %2697 = vmatprep.mubr.msk.bf16.mxu0 %vm3215_vm0, %v3214_v0  ;;  %2696 = vmatpush3.bf16.msra.mxu0 %v1125_v2 }
 0x712   : > { %2709 = vmatprep.subr.bf16.mxu0 %v3214_v0 }
 0x7db   : > { %v955_v38 = vpop.f32.mrb[16].mxu0 }
 0x7dc   : > { %v961_v39 = vpack.c.bf16 %v955_v38, %v955_v38  ;;  %v2675_v40 = vpop.f32.mrb[17].mxu0 }
 0x7dd   : > { %v958_v41 = vpop.f32.mrb[18].mxu0 }
 0x7de   : > { %v2676_v42 = vpop.f32.mrb[19].mxu0  ;;  %2680 = vmatmul.mubr.msk.bf16.vlgmr.msra.gmra.mrb[16].mxu1 %vm536_vm2, %v961_v39 }
 0x7df   : > { %2691 = vmatprep.mubr.msk.bf16.mxu1 %vm3215_vm0, %v3214_v0 }
 0x7e3   : > { %v1053_v43 = vpop.f32.mrb[20].mxu0 }
 0x7e4   : > { %v1059_v44 = vmul.f32 0.35355338, %v1053_v43  ;;  %v2687_v45 = vpop.f32.mrb[21].mxu0 }
 0x7e5   : > { %v1056_v46 = vpop.f32.mrb[22].mxu0 }
 0x7e6   : > { %v2688_v47 = vpop.f32.mrb[23].mxu0  ;;  %v1060_v48 = vsel %vm536_vm2, %v1059_v44, -inf }
 0x7e7   : > { %1061 = vmax.xlane.f32.xlu0 %v1060_v48 }
 0x7fd   : > { %1072 = vrot.lane.b32.xlu0 %v3555_v10, %s3933_s16  ;;  %s3963_s16 = smov 48  }
 0x874   : > { %v1062_v49 = vpop.xlane.xlu0 %1061 }
 0x875   : > { %v1063_v50 = vsub.f32 %v1059_v44, %v1062_v49  ;;  %v2491_v44 = vld [vmem:[#allocation8] ss:$0 sm:$0xff] }
 0x877   : > { %v1064_v51 = vmul.f32 1.442695, %v1063_v50 }
 0x878   : > { %v1073_v52 = vpop.permute.xlu0 %1072 }
 0x879   : > { %2961 = vpow2.f32 %v1064_v51  ;;  %v1078_v53 = vsel %vm601_vm3, %v1073_v52, 0 }
 0x87a   : > { %2690 = vmatpush3.bf16.msra.mxu1 %v1078_v53 }
 0x87b   : > { %2701 = vmatprep.subr.bf16.mxu1 %v3214_v0 }
 0x883   : > { %v2962_v54 = vpop.eup %2961 }
 0x884   : > { %v1066_v55 = vsel %vm536_vm2, %v2962_v54, 0.0 }
 0x885   : > { %1067 = vadd.xlane.f32.xlu1 %v1066_v55 }
 0x8b1   : > { %v1002_v56 = vpop.f32.mrb[16].mxu1 }
 0x8b2   : > { %v1008_v57 = vadd.f32 %v1002_v56, %v3617_v12  ;;  %v2681_v58 = vpop.f32.mrb[17].mxu1  ;;  %v2939_v56 = vld [vmem:[%s3915_s1 + $0x10] sm:$0xff]  }
 0x8b3   : > { %v1005_v59 = vpop.f32.mrb[18].mxu1 }
 0x8b4   : > { %v2682_v10 = vpop.f32.mrb[19].mxu1 }
 0x912   : > { %v1068_v60 = vpop.xlane.xlu1 %1067 }
 0x913   : > { %2963 = vrcp.f32 %v1068_v60 }
 0x91d   : > { %v2964_v61 = vpop.eup %2963 }
 0x91e   : > { %v1070_v62 = vmul.f32 %v2964_v61, %v2962_v54 }
 0x920   : > { %v1071_v63 = vpack.c.bf16 %v1070_v62, %v1070_v62 }
 0x922   : > { %2692 = vmatmul.mubr.msk.bf16.vlgmr.msra.gmra.mrb[20].mxu1 %vm536_vm2, %v1071_v63  ;;  %v2497_v63 = vld [vmem:[%s3916_s2 + $0x1] ss:$0 sm:$0xff] }
 0x923   : > { %2705 = vmatprep.mubr.msk.bf16.mxu1 %vm3215_vm0, %v3214_v0  ;;  %2702 = vmatpush3.bf16.msra.mxu1 %v2933_v24 }
 0x924   : > { %2703 = vmatprep.subr.bf16.mxu1 %v3214_v0 }
 0x9f5   : > { %v1114_v4 = vpop.f32.mrb[20].mxu1 }
 0x9f6   : > { %v1120_v5 = vpack.c.bf16 %v1114_v4, %v1114_v4  ;;  %v2693_v6 = vpop.f32.mrb[21].mxu1 }
 0x9f7   : > { %v1117_v7 = vpop.f32.mrb[22].mxu1 }
 0x9f8   : > { %v2694_v8 = vpop.f32.mrb[23].mxu1  ;;  %2698 = vmatmul.mubr.msk.bf16.vlgmr.msra.gmra.mrb[24].mxu0 %vm536_vm2, %v1120_v5 }
 0x9f9   : > { %2717 = vmatprep.mubr.msk.bf16.mxu0 %vm3215_vm0, %v3214_v0  ;;  %2710 = vmatpush3.bf16.msra.mxu0 %v2935_v25 }
 0x9fa   : > { %2711 = vmatprep.subr.bf16.mxu0 %v3214_v0 }
 0x9fd   : > { %2712 = vmatpush3.bf16.msra.mxu0 %v2936_v26 }
 0x9fe   : > { %2713 = vmatprep.subr.bf16.mxu0 %v3214_v0 }
 0xa01   : > { %2714 = vmatpush3.bf16.msra.mxu0 %v2937_v33 }
 0xa02   : > { %2715 = vmatprep.subr.bf16.mxu0 %v3214_v0 }
 0xa05   : > { %2716 = vmatpush3.bf16.msra.mxu0 %v2938_v34 }
 0xa06   : > { %2735 = vmatprep.subr.bf16.mxu0 %v3214_v0 }
 0xacb   : > { %v1161_v9 = vpop.f32.mrb[24].mxu0 }
 0xacc   : > { %v1167_v11 = vadd.f32 %v1161_v9, %v1008_v57  ;;  %v2699_v12 = vpop.f32.mrb[25].mxu0  ;;  %v2940_v57 = vld [vmem:[%s3915_s1 + $0x18] sm:$0xff]  }
 0xacd   : > { %v1164_v13 = vpop.f32.mrb[26].mxu0 }
 0xace   : > { %v1168_v15 = vadd.f32 %v1167_v11, %v3543_v3  ;;  %v2700_v16 = vpop.f32.mrb[27].mxu0  ;;  %v2934_v3 = vld [vmem:[%s3919_s5 + $0x8] sm:$0xff]  }
 0xacf   : > { %2704 = vmatpush3.bf16.msra.mxu1 %v2934_v3 }
 0xad0   : > { %v1176_v17 = vadd.f32 %v2481_v14, %v1168_v15  ;;  %2721 = vmatprep.subr.bf16.mxu1 %v3214_v0 }
 0xad2   : > { %v1177_v18 = vsel %vm484_vm1, %v1176_v17, 0.0 }
 0xad3   : > { %1178 = vadd.xlane.f32.xlu1 %v1177_v18 }
 0xb60   : > { %v1179_v19 = vpop.xlane.xlu1 %1178 }
 0xb61   : > { %v1181_v20 = vmul.f32 0.03125, %v1179_v19 }
 0xb63   : > { %v1182_v21 = vsub.f32 %v1176_v17, %v1181_v20 }
 0xb65   : > { %v1183_v22 = vmul.f32 %v1182_v21, %v1182_v21 }
 0xb67   : > { %v1184_v23 = vsel %vm484_vm1, %v1183_v22, 0.0 }
 0xb68   : > { %1185 = vadd.xlane.f32.xlu1 %v1184_v23 }
 0xbf5   : > { %v1186_v27 = vpop.xlane.xlu1 %1185 }
 0xbf6   : > { %v1187_v28 = vmul.f32 0.03125, %v1186_v27 }
 0xbf8   : > { %v1188_v29 = vadd.f32 1e-05, %v1187_v28 }
 0xbfa   : > { %2965 = vrsqrt.f32 %v1188_v29 }
 0xc04   : > { %v2966_v30 = vpop.eup %2965 }
 0xc05   : > { %v1190_v31 = vmul.f32 %v2966_v30, %v1182_v21 }
 0xc07   : > { %v1195_v32 = vpack.c.bf16 %v1190_v31, %v1190_v31 }
 0xc09   : > { %2706 = vmatmul.mubr.msk.bf16.vlgmr.msra.gmra.mrb[24].mxu1 %vm484_vm1, %v1195_v32 }
 0xc0a   : > { %2725 = vmatprep.mubr.msk.bf16.mxu1 %vm3215_vm0, %v3214_v0  ;;  %2722 = vmatpush3.bf16.msra.mxu1 %v2939_v56 }
 0xc0b   : > { %2723 = vmatprep.subr.bf16.mxu1 %v3214_v0 }
 0xc0e   : > { %2724 = vmatpush3.bf16.msra.mxu1 %v2940_v57 }
 0xc0f   : > { %2729 = vmatprep.subr.bf16.mxu1 %v3214_v0 }
 0xcdc   : > { %v1252_v36 = vpop.f32.mrb[24].mxu1 }
 0xcdd   : > { %v1253_v37 = vadd.f32 %v2482_v35, %v1252_v36  ;;  %v2707_v38 = vpop.f32.mrb[25].mxu1 }
 0xcde   : > { %v1255_v39 = vpop.f32.mrb[26].mxu1 }
 0xcdf   : > { %v1258_v40 = vmax.f32 %v1253_v37, 0.0  ;;  %v2708_v41 = vpop.f32.mrb[27].mxu1 }
 0xce1   : > { %v1267_v42 = vpack.c.bf16 %v1258_v40, %v1258_v40 }
 0xce3   : > { %2718 = vmatmul.mubr.msk.bf16.vlgmr.msra.gmra.mrb[28].mxu0 %vm1292_vm4, %v1267_v42 }
 0xce4   : > { %2737 = vmatprep.mubr.msk.bf16.mxu0 %vm3215_vm0, %v3214_v0 }
 0xdb6   : > { %v1330_v43 = vpop.f32.mrb[28].mxu0 }
 0xdb7   : > { %v1336_v45 = vadd.f32 %v1330_v43, %v1190_v31  ;;  %v2719_v46 = vpop.f32.mrb[29].mxu0 }
 0xdb8   : > { %v1333_v47 = vpop.f32.mrb[30].mxu0 }
 0xdb9   : > { %v2720_v48 = vpop.f32.mrb[31].mxu0  ;;  %v1344_v49 = vadd.f32 %v2491_v44, %v1336_v45  ;;  %v2501_v47 = vld [vmem:[%s3917_s3 + $0x10] sm:$0xf] }
 0xdba   : > { %v1706_v48 = vsel %vm601_vm3, %v2501_v47, 0 }
 0xdbb   : > { %v1345_v50 = vsel %vm484_vm1, %v1344_v49, 0.0 }
 0xdbc   : > { %1346 = vadd.xlane.f32.xlu1 %v1345_v50 }
 0xe49   : > { %v1347_v51 = vpop.xlane.xlu1 %1346 }
 0xe4a   : > { %v1348_v52 = vmul.f32 0.03125, %v1347_v51 }
 0xe4c   : > { %v1349_v53 = vsub.f32 %v1344_v49, %v1348_v52  ;;  %v2502_v49 = vld [vmem:[%s3917_s3 + $0x14] sm:$0xf] }
 0xe4d   : > { %v1660_v50 = vsel %vm601_vm3, %v2502_v49, 0 }
 0xe4e   : > { %v1350_v54 = vmul.f32 %v1349_v53, %v1349_v53 }
 0xe50   : > { %v1351_v55 = vsel %vm484_vm1, %v1350_v54, 0.0 }
 0xe51   : > { %1352 = vadd.xlane.f32.xlu1 %v1351_v55 }
 0xede   : > { %v1353_v58 = vpop.xlane.xlu1 %1352 }
 0xedf   : > { %v1354_v59 = vmul.f32 0.03125, %v1353_v58 }
 0xee1   : > { %v1355_v10 = vadd.f32 1e-05, %v1354_v59 }
 0xee3   : > { %2967 = vrsqrt.f32 %v1355_v10 }
 0xeed   : > { %v2968_v60 = vpop.eup %2967 }
 0xeee   : > { %v3706_v61 = vmul.f32 %v2968_v60, %v1349_v53 }
 0xef0   : > { %v1363_v62 = vpack.c.bf16 %v3706_v61, %v3706_v61 }
 0xef2   : > { %2726 = vmatmul.mubr.msk.bf16.vlgmr.msra.gmra.mrb[28].mxu1 %vm484_vm1, %v1363_v62 }
 0xef3   : > { %2731 = vmatprep.mubr.msk.bf16.mxu1 %vm3215_vm0, %v3214_v0 }
 0xfc5   : > { %v1421_v1 = vpop.f32.mrb[28].mxu1 }
 0xfc6   : > { %v1422_v2 = vadd.f32 %v2497_v63, %v1421_v1  ;;  %v2727_v4 = vpop.f32.mrb[29].mxu1 }
 0xfc7   : > { %v1424_v5 = vpop.f32.mrb[30].mxu1 }
 0xfc8   : > { %v3716_v6 = vpack.c.bf16 %v1422_v2, %v1422_v2  ;;  %v2728_v7 = vpop.f32.mrb[31].mxu1 }
 0xfca   : > { %1546 = vrot.lane.b32.xlu0 %v3716_v6, %s3218_s28  ;;  %1434 = vrot.lane.b32.xlu1 %v3716_v6, %s3217_s22  ;;  %s3961_s22 = smov 64   ;;  %s3962_s28 = smov 80  }
 0xfce   : > { %1544 = vrot.lane.b32.xlu0 %v3716_v6, %s3216_s15  ;;  %s3960_s15 = smov 112  }
0x103c   : > { %v1435_v8 = vpop.permute.xlu1 %1434  ;;  %v1547_v11 = vpop.permute.xlu0 %1546 }
0x103d   : > { %v1440_v9 = vsel %vm536_vm2, %v1435_v8, 0  ;;  %v1552_v12 = vsel %vm536_vm2, %v1547_v11, 0 }
0x103e   : > { %2730 = vmatpush3.bf16.xpose.msra.mxu1 %v1440_v9 }
0x103f   : > { %2741 = vmatprep.subr.bf16.mxu1 %v3214_v0 }
0x1040   : > { %v1545_v13 = vpop.permute.xlu0 %1544 }
0x1045   : > { %2732 = vmatmul.mubr.msk.bf16.vlgmr.msra.gmra.mrb[32].mxu1 %vm536_vm2, %v3716_v6 }
0x1046   : > { %2742 = vmatpush3.bf16.xpose.msra.mxu1 %v1552_v12  ;;  %2743 = vmatprep.mubr.msk.bf16.mxu1 %vm3215_vm0, %v3214_v0 }
0x1047   : > { %2753 = vmatprep.subr.bf16.mxu1 %v3214_v0 }
0x104d   : > { %2744 = vmatmul.mubr.msk.bf16.vlgmr.msra.gmra.mrb[36].mxu1 %vm536_vm2, %v1545_v13 }
0x104e   : > { %2755 = vmatprep.mubr.msk.bf16.mxu1 %vm3215_vm0, %v3214_v0  ;;  %2754 = vmatpush3.bf16.msra.mxu1 %v1660_v50 }
0x104f   : > { %2765 = vmatprep.subr.bf16.mxu1 %v3214_v0 }
0x1118   : > { %v1476_v14 = vpop.f32.mrb[32].mxu1 }
0x1119   : > { %v1482_v15 = vmul.f32 0.35355338, %v1476_v14  ;;  %v2733_v16 = vpop.f32.mrb[33].mxu1 }
0x111a   : > { %v1479_v17 = vpop.f32.mrb[34].mxu1 }
0x111b   : > { %v2734_v18 = vpop.f32.mrb[35].mxu1  ;;  %v1483_v19 = vsel %vm536_vm2, %v1482_v15, -inf }
0x111c   : > { %1484 = vmax.xlane.f32.xlu0 %v1483_v19 }
0x1120   : > { %v1588_v20 = vpop.f32.mrb[36].mxu1 }
0x1121   : > { %v1594_v21 = vmul.f32 0.35355338, %v1588_v20  ;;  %v2745_v22 = vpop.f32.mrb[37].mxu1 }
0x1122   : > { %v1591_v23 = vpop.f32.mrb[38].mxu1 }
0x1123   : > { %v2746_v24 = vpop.f32.mrb[39].mxu1  ;;  %v1595_v3 = vsel %vm536_vm2, %v1594_v21, -inf }
0x1124   : > { %1596 = vmax.xlane.f32.xlu1 %v1595_v3 }
0x1135   : > { %1607 = vrot.lane.b32.xlu1 %v3716_v6, %s3220_s14 }
0x1139   : > { %1748 = vrot.lane.b32.xlu1 %v3716_v6, %s3960_s15  ;;  %s3966_s15 = smov 40  }
0x11a9   : > { %v1485_v25 = vpop.xlane.xlu0 %1484 }
0x11aa   : > { %v1486_v26 = vsub.f32 %v1482_v15, %v1485_v25 }
0x11ac   : > { %v1487_v27 = vmul.f32 1.442695, %v1486_v26 }
0x11ae   : > { %2969 = vpow2.f32 %v1487_v27 }
0x11b1   : > { %v1597_v28 = vpop.xlane.xlu1 %1596 }
0x11b2   : > { %v1598_v29 = vsub.f32 %v1594_v21, %v1597_v28 }
0x11b4   : > { %v1599_v30 = vmul.f32 1.442695, %v1598_v29 }
0x11b5   : > { %v1608_v41 = vpop.permute.xlu1 %1607 }
0x11b6   : > { %2971 = vpow2.f32 %v1599_v30  ;;  %v1613_v43 = vsel %vm601_vm3, %v1608_v41, 0 }
0x11b8   : > { %v2970_v31 = vpop.eup %2969 }
0x11b9   : > { %v1489_v32 = vsel %vm536_vm2, %v2970_v31, 0.0  ;;  %v1749_v63 = vpop.permute.xlu1 %1748 }
0x11ba   : > { %1490 = vadd.xlane.f32.xlu0 %v1489_v32  ;;  %v2503_v32 = vld [vmem:[%s3917_s3 + $0x18] sm:$0xf] }
0x11c0   : > { %v2972_v33 = vpop.eup %2971 }
0x11c1   : > { %v1601_v34 = vsel %vm536_vm2, %v2972_v33, 0.0 }
0x11c2   : > { %1602 = vadd.xlane.f32.xlu0 %v1601_v34 }
0x11d8   : > { %1495 = vrot.lane.b32.xlu0 %v3716_v6, %s3961_s22 }
0x11dc   : > { %1750 = vrot.lane.b32.xlu0 %v3716_v6, %s3962_s28  ;;  %s3969_s28 = sld [smem:[#allocation19_spill]] }
0x1247   : > { %v1491_v35 = vpop.xlane.xlu0 %1490 }
0x1248   : > { %2973 = vrcp.f32 %v1491_v35 }
0x124f   : > { %v1603_v36 = vpop.xlane.xlu0 %1602 }
0x1250   : > { %2975 = vrcp.f32 %v1603_v36 }
0x1252   : > { %v2974_v37 = vpop.eup %2973 }
0x1253   : > { %v1493_v38 = vmul.f32 %v2974_v37, %v2970_v31  ;;  %v1496_v39 = vpop.permute.xlu0 %1495 }
0x1254   : > { %v1501_v40 = vsel %vm601_vm3, %v1496_v39, 0 }
0x1255   : > { %2736 = vmatpush3.bf16.msra.mxu0 %v1501_v40  ;;  %v1494_v42 = vpack.c.bf16 %v1493_v38, %v1493_v38 }
0x1256   : > { %2747 = vmatprep.subr.bf16.mxu0 %v3214_v0 }
0x1257   : > { %v1751_v56 = vpop.permute.xlu0 %1750 }
0x1258   : > { %2738 = vmatmul.mubr.msk.bf16.vlgmr.msra.gmra.mrb[32].mxu0 %vm536_vm2, %v1494_v42  ;;  %v1756_v60 = vsel %vm536_vm2, %v1751_v56, 0 }
0x1259   : > { %2748 = vmatpush3.bf16.msra.mxu0 %v1613_v43  ;;  %2749 = vmatprep.mubr.msk.bf16.mxu0 %vm3215_vm0, %v3214_v0 }
0x125a   : > { %v2976_v44 = vpop.eup %2975  ;;  %2759 = vmatprep.subr.bf16.mxu0 %v3214_v0 }
0x125b   : > { %v1605_v45 = vmul.f32 %v2976_v44, %v2972_v33  ;;  %v1864_v33 = vsel %vm601_vm3, %v2503_v32, 0 }
0x125d   : > { %v1606_v46 = vpack.c.bf16 %v1605_v45, %v1605_v45 }
0x1260   : > { %2750 = vmatmul.mubr.msk.bf16.vlgmr.msra.gmra.mrb[36].mxu0 %vm536_vm2, %v1606_v46 }
0x1261   : > { %2761 = vmatprep.mubr.msk.bf16.mxu0 %vm3215_vm0, %v3214_v0  ;;  %2760 = vmatpush3.bf16.msra.mxu0 %v1706_v48 }
0x1262   : > { %2771 = vmatprep.subr.bf16.mxu0 %v3214_v0 }
0x132b   : > { %v1537_v51 = vpop.f32.mrb[32].mxu0 }
0x132c   : > { %v1543_v52 = vpack.c.bf16 %v1537_v51, %v1537_v51  ;;  %v2739_v53 = vpop.f32.mrb[33].mxu0 }
0x132d   : > { %v1540_v54 = vpop.f32.mrb[34].mxu0 }
0x132e   : > { %v2740_v55 = vpop.f32.mrb[35].mxu0  ;;  %2762 = vmatmul.mubr.msk.bf16.vlgmr.msra.gmra.mrb[40].mxu0 %vm536_vm2, %v1543_v52 }
0x132f   : > { %2773 = vmatprep.mubr.msk.bf16.mxu0 %vm3215_vm0, %v3214_v0 }
0x1333   : > { %v1649_v57 = vpop.f32.mrb[36].mxu0 }
0x1334   : > { %v1655_v58 = vpack.c.bf16 %v1649_v57, %v1649_v57  ;;  %v2751_v59 = vpop.f32.mrb[37].mxu0 }
0x1335   : > { %v1652_v10 = vpop.f32.mrb[38].mxu0 }
0x1336   : > { %v2752_v62 = vpop.f32.mrb[39].mxu0  ;;  %2756 = vmatmul.mubr.msk.bf16.vlgmr.msra.gmra.mrb[40].mxu1 %vm536_vm2, %v1655_v58 }
0x1337   : > { %2766 = vmatpush3.bf16.xpose.msra.mxu1 %v1756_v60  ;;  %2767 = vmatprep.mubr.msk.bf16.mxu1 %vm3215_vm0, %v3214_v0 }
0x1338   : > { %2777 = vmatprep.subr.bf16.mxu1 %v3214_v0 }
0x133e   : > { %2768 = vmatmul.mubr.msk.bf16.vlgmr.msra.gmra.mrb[44].mxu1 %vm536_vm2, %v1749_v63 }
0x133f   : > { %2779 = vmatprep.mubr.msk.bf16.mxu1 %vm3215_vm0, %v3214_v0  ;;  %2778 = vmatpush3.bf16.msra.mxu1 %v1864_v33 }
0x1340   : > { %2789 = vmatprep.subr.bf16.mxu1 %v3214_v0 }
0x1401   : > { %v1742_v1 = vpop.f32.mrb[40].mxu0 }
0x1402   : > { %v2763_v2 = vpop.f32.mrb[41].mxu0 }
0x1403   : > { %v1745_v4 = vpop.f32.mrb[42].mxu0 }
0x1404   : > { %v2764_v5 = vpop.f32.mrb[43].mxu0 }
0x1409   : > { %v1696_v7 = vpop.f32.mrb[40].mxu1 }
0x140a   : > { %v3778_v8 = vadd.f32 %v1742_v1, %v1696_v7  ;;  %v2757_v9 = vpop.f32.mrb[41].mxu1 }
0x140b   : > { %v1699_v11 = vpop.f32.mrb[42].mxu1 }
0x140c   : > { %v2758_v12 = vpop.f32.mrb[43].mxu1  ;;  %v2517_v11 = vld [vmem:[#allocation5 + $0x1] ss:$0 sm:$0xff] }
0x1411   : > { %v1792_v13 = vpop.f32.mrb[44].mxu1 }
0x1412   : > { %v1798_v14 = vmul.f32 0.35355338, %v1792_v13  ;;  %v2769_v15 = vpop.f32.mrb[45].mxu1 }
0x1413   : > { %v1795_v16 = vpop.f32.mrb[46].mxu1 }
0x1414   : > { %v2770_v17 = vpop.f32.mrb[47].mxu1  ;;  %v1799_v18 = vsel %vm536_vm2, %v1798_v14, -inf }
0x1415   : > { %1800 = vmax.xlane.f32.xlu0 %v1799_v18 }
0x142b   : > { %1811 = vrot.lane.b32.xlu0 %v3716_v6, %s3963_s16  ;;  %s3135_s16 = sshll.u32 %s3227_s12, 4  ;;  %s3136_s16 = int_to_ptr.vmem [resolvable:$false] %s3135_s16 }
0x142f   : > { %1907 = vrot.lane.b32.xlu0 %v3716_v6, %s3964_s29  ;;  %s2545_s29 = sshll.u32 %s3309_s23, 7  ;;  %s2328_s23 = scalar_lea.sflag [#allocation4], %s3513_s4 }
0x1430   : > { %s3870_s14 = scalar_lea.hbm %s3969_s28, %s2545_s29 }
0x14a2   : > { %v1801_v19 = vpop.xlane.xlu0 %1800 }
0x14a3   : > { %v1802_v20 = vsub.f32 %v1798_v14, %v1801_v19 }
0x14a5   : > { %v1803_v21 = vmul.f32 1.442695, %v1802_v20 }
0x14a6   : > { %v1812_v22 = vpop.permute.xlu0 %1811 }
0x14a7   : > { %2977 = vpow2.f32 %v1803_v21  ;;  %v1817_v23 = vsel %vm601_vm3, %v1812_v22, 0  ;;  %v2941_v21 = vld [vmem:[%s3919_s5 + $0x10] sm:$0xff]   ;;  %v2943_v22 = vld [vmem:[%s3959_s24 + $0x20] sm:$0xff]  }
0x14a8   : > { %2772 = vmatpush3.bf16.msra.mxu0 %v1817_v23  ;;  %v2944_v23 = vld [vmem:[%s3959_s24 + $0x28] sm:$0xff]  }
0x14a9   : > { %2783 = vmatprep.subr.bf16.mxu0 %v3214_v0 }
0x14aa   : > { %v1908_v31 = vpop.permute.xlu0 %1907 }
0x14b1   : > { %v2978_v24 = vpop.eup %2977 }
0x14b2   : > { %v1805_v3 = vsel %vm536_vm2, %v2978_v24, 0.0 }
0x14b3   : > { %1806 = vadd.xlane.f32.xlu1 %v1805_v3 }
0x14c4   : > { %1909 = vrot.lane.b32.xlu1 %v3716_v6, %s3965_s7  ;;  %s3968_s7 = sshll.u32 %s3513_s4, 3 }
0x14c5   : > { %s457_s9 = scalar_lea.vmem [#allocation11], %s3968_s7  ;;  %s3137_s7 = scalar_lea.vmem %s3136_s16, 256 }
0x14c6   : > { %s2341_s26 = sshll.u32 %s457_s9, 4  ;;  %s3872_s26 = int_to_ptr.vmem [resolvable:$true] %s2341_s26 }
0x14c7   : > { %s3131_s30 = scalar_lea.vmem %s3872_s26, 128  ;;  %p3138_p12 = scmp.lt.s32.totalorder %s3872_s26, %s3136_s16 }
0x14c8   : > { %p3132_p6 = scmp.ne.s32.totalorder %s3872_s26, %s3131_s30  ;;  %p3139_p3 = scmp.lt.s32.totalorder %s3137_s7, %s3131_s30 }
0x14ca   : > { %p3133_p7 = pnand %p3132_p6, %p3970_p5  ;;  %p3140_p13 = por %p3139_p3, %p3138_p12 }
0x14cc   : > { %p3134_p9 = pneg %p3133_p7 }
0x14ce   : > { %p3141_p0 = pnand %p3140_p13, %p3134_p9 }
0x1540   : > { %v1807_v25 = vpop.xlane.xlu1 %1806 }
0x1541   : > { %2979 = vrcp.f32 %v1807_v25 }
0x1544   : > { %v1910_v28 = vpop.permute.xlu1 %1909 }
0x1545   : > { %v1915_v30 = vsel %vm536_vm2, %v1910_v28, 0 }
0x154b   : > { %v2980_v26 = vpop.eup %2979 }
0x154c   : > { %v1809_v27 = vmul.f32 %v2980_v26, %v2978_v24 }
0x154e   : > { %v1810_v29 = vpack.c.bf16 %v1809_v27, %v1809_v27 }
0x1550   : > { %2774 = vmatmul.mubr.msk.bf16.vlgmr.msra.gmra.mrb[44].mxu0 %vm536_vm2, %v1810_v29  ;;  %v2945_v29 = vld [vmem:[%s3959_s24 + $0x30] sm:$0xff]  }
0x1551   : > { %2784 = vmatpush3.bf16.xpose.msra.mxu0 %v1915_v30  ;;  %2785 = vmatprep.mubr.msk.bf16.mxu0 %vm3215_vm0, %v3214_v0  ;;  %v2946_v30 = vld [vmem:[%s3959_s24 + $0x38] sm:$0xff]  }
0x1552   : > { %2795 = vmatprep.subr.bf16.mxu0 %v3214_v0 }
0x1558   : > { %2786 = vmatmul.mubr.msk.bf16.vlgmr.msra.gmra.mrb[48].mxu0 %vm536_vm2, %v1908_v31  ;;  %v2522_v31 = vld [vmem:[#allocation7 + $0x1] ss:$0 sm:$0xff] }
0x1559   : > { %2797 = vmatprep.mubr.msk.bf16.mxu0 %vm3215_vm0, %v3214_v0 }
0x1623   : > { %v1853_v34 = vpop.f32.mrb[44].mxu0 }
0x1624   : > { %v1859_v35 = vpack.c.bf16 %v1853_v34, %v1853_v34  ;;  %v2775_v36 = vpop.f32.mrb[45].mxu0 }
0x1625   : > { %v1856_v37 = vpop.f32.mrb[46].mxu0 }
0x1626   : > { %v2776_v38 = vpop.f32.mrb[47].mxu0  ;;  %2780 = vmatmul.mubr.msk.bf16.vlgmr.msra.gmra.mrb[48].mxu1 %vm536_vm2, %v1859_v35 }
0x1627   : > { %2791 = vmatprep.mubr.msk.bf16.mxu1 %vm3215_vm0, %v3214_v0 }
0x162b   : > { %v1951_v39 = vpop.f32.mrb[48].mxu0 }
0x162c   : > { %v1957_v40 = vmul.f32 0.35355338, %v1951_v39  ;;  %v2787_v41 = vpop.f32.mrb[49].mxu0 }
0x162d   : > { %v1954_v42 = vpop.f32.mrb[50].mxu0 }
0x162e   : > { %v2788_v43 = vpop.f32.mrb[51].mxu0  ;;  %v1958_v44 = vsel %vm536_vm2, %v1957_v40, -inf }
0x162f   : > { %1959 = vmax.xlane.f32.xlu1 %v1958_v44 }
0x16bc   : > { %v1960_v45 = vpop.xlane.xlu1 %1959 }
0x16bd   : > { %v1961_v46 = vsub.f32 %v1957_v40, %v1960_v45  ;;  %v2539_v40 = vld [vmem:[#allocation8 + $0x1] ss:$0 sm:$0xff] }
0x16bf   : > { %v1962_v47 = vmul.f32 1.442695, %v1961_v46 }
0x16c1   : > { %2981 = vpow2.f32 %v1962_v47 }
0x16cb   : > { %v2982_v48 = vpop.eup %2981 }
0x16cc   : > { %v1964_v49 = vsel %vm536_vm2, %v2982_v48, 0.0 }
0x16cd   : > { %1965 = vadd.xlane.f32.xlu0 %v1964_v49 }
0x16e3   : > { %1970 = vrot.lane.b32.xlu0 %v3716_v6, %s3966_s15  ;;  %v2504_v6 = vld [vmem:[%s3917_s3 + $0x1c] sm:$0xf] }
0x16e4   : > { %v2023_v60 = vsel %vm601_vm3, %v2504_v6, 0 }
0x16e5   : > { %2796 = vmatpush3.bf16.msra.mxu0 %v2023_v60 }
0x16e6   : > { %2809 = vmatprep.subr.bf16.mxu0 %v3214_v0 }
0x16f9   : > { %v1900_v50 = vpop.f32.mrb[48].mxu1 }
0x16fa   : > { %v1906_v51 = vadd.f32 %v1900_v50, %v3778_v8  ;;  %v2781_v52 = vpop.f32.mrb[49].mxu1 }
0x16fb   : > { %v1903_v53 = vpop.f32.mrb[50].mxu1  ;;  %v2947_v52 = vld [vmem:[%s3967_s11] sm:$0xff]  }
0x16fc   : > { %v2782_v54 = vpop.f32.mrb[51].mxu1  ;;  %v2948_v53 = vld [vmem:[%s3967_s11 + $0x8] sm:$0xff]  }
0x175a   : > { %v1966_v55 = vpop.xlane.xlu0 %1965 }
0x175b   : > { %2983 = vrcp.f32 %v1966_v55 }
0x175e   : > { %v1971_v56 = vpop.permute.xlu0 %1970 }
0x175f   : > { %v1976_v57 = vsel %vm601_vm3, %v1971_v56, 0 }
0x1760   : > { %2790 = vmatpush3.bf16.msra.mxu1 %v1976_v57 }
0x1761   : > { %2801 = vmatprep.subr.bf16.mxu1 %v3214_v0 }
0x1765   : > { %v2984_v58 = vpop.eup %2983 }
0x1766   : > { %v1968_v59 = vmul.f32 %v2984_v58, %v2982_v48 }
0x1768   : > { %v1969_v10 = vpack.c.bf16 %v1968_v59, %v1968_v59 }
0x176a   : > { %2792 = vmatmul.mubr.msk.bf16.vlgmr.msra.gmra.mrb[52].mxu1 %vm536_vm2, %v1969_v10  ;;  %v2540_v10 = vld [vmem:[#allocation10] ss:$0 sm:$0xff] }
0x176b   : > { %2805 = vmatprep.mubr.msk.bf16.mxu1 %vm3215_vm0, %v3214_v0  ;;  %2802 = vmatpush3.bf16.msra.mxu1 %v2941_v21 }
0x176c   : > { %2803 = vmatprep.subr.bf16.mxu1 %v3214_v0 }
0x183d   : > { %v2012_v62 = vpop.f32.mrb[52].mxu1 }
0x183e   : > { %v2018_v63 = vpack.c.bf16 %v2012_v62, %v2012_v62  ;;  %v2793_v1 = vpop.f32.mrb[53].mxu1 }
0x183f   : > { %v2015_v2 = vpop.f32.mrb[54].mxu1 }
0x1840   : > { %v2794_v4 = vpop.f32.mrb[55].mxu1  ;;  %2798 = vmatmul.mubr.msk.bf16.vlgmr.msra.gmra.mrb[52].mxu0 %vm536_vm2, %v2018_v63 }
0x1841   : > { %2817 = vmatprep.mubr.msk.bf16.mxu0 %vm3215_vm0, %v3214_v0  ;;  %2810 = vmatpush3.bf16.msra.mxu0 %v2943_v22 }
0x1842   : > { %2811 = vmatprep.subr.bf16.mxu0 %v3214_v0 }
0x1845   : > { %2812 = vmatpush3.bf16.msra.mxu0 %v2944_v23 }
0x1846   : > { %2813 = vmatprep.subr.bf16.mxu0 %v3214_v0 }
0x1849   : > { %2814 = vmatpush3.bf16.msra.mxu0 %v2945_v29 }
0x184a   : > { %2815 = vmatprep.subr.bf16.mxu0 %v3214_v0 }
0x184d   : > { %2816 = vmatpush3.bf16.msra.mxu0 %v2946_v30 }
0x1913   : > { %v2059_v5 = vpop.f32.mrb[52].mxu0 }
0x1914   : > { %v2065_v7 = vadd.f32 %v2059_v5, %v1906_v51  ;;  %v2799_v8 = vpop.f32.mrb[53].mxu0 }
0x1915   : > { %v2062_v9 = vpop.f32.mrb[54].mxu0 }
0x1916   : > { %v2066_v12 = vadd.f32 %v2065_v7, %v3706_v61  ;;  %v2800_v13 = vpop.f32.mrb[55].mxu0  ;;  %v2942_v61 = vld [vmem:[%s3919_s5 + $0x18] sm:$0xff]  }
0x1917   : > { %2804 = vmatpush3.bf16.msra.mxu1 %v2942_v61 }
0x1918   : > { %v2075_v14 = vadd.f32 %v2517_v11, %v2066_v12  ;;  %2821 = vmatprep.subr.bf16.mxu1 %v3214_v0 }
0x191a   : > { %v2076_v15 = vsel %vm484_vm1, %v2075_v14, 0.0 }
0x191b   : > { %2077 = vadd.xlane.f32.xlu1 %v2076_v15 }
0x19a8   : > { %v2078_v16 = vpop.xlane.xlu1 %2077 }
0x19a9   : > { %v2079_v17 = vmul.f32 0.03125, %v2078_v16 }
0x19ab   : > { %v2080_v18 = vsub.f32 %v2075_v14, %v2079_v17 }
0x19ad   : > { %v2081_v19 = vmul.f32 %v2080_v18, %v2080_v18 }
0x19af   : > { %v2082_v20 = vsel %vm484_vm1, %v2081_v19, 0.0 }
0x19b0   : > { %2083 = vadd.xlane.f32.xlu1 %v2082_v20 }
0x1a3d   : > { %v2084_v24 = vpop.xlane.xlu1 %2083 }
0x1a3e   : > { %v2085_v3 = vmul.f32 0.03125, %v2084_v24 }
0x1a40   : > { %v2086_v25 = vadd.f32 1e-05, %v2085_v3 }
0x1a42   : > { %2985 = vrsqrt.f32 %v2086_v25 }
0x1a4c   : > { %v2986_v26 = vpop.eup %2985 }
0x1a4d   : > { %v2088_v27 = vmul.f32 %v2986_v26, %v2080_v18 }
0x1a4f   : > { %v2094_v28 = vpack.c.bf16 %v2088_v27, %v2088_v27 }
0x1a51   : > { %2806 = vmatmul.mubr.msk.bf16.vlgmr.msra.gmra.mrb[56].mxu1 %vm484_vm1, %v2094_v28 }
0x1a52   : > { %2825 = vmatprep.mubr.msk.bf16.mxu1 %vm3215_vm0, %v3214_v0  ;;  %2822 = vmatpush3.bf16.msra.mxu1 %v2947_v52 }
0x1a53   : > { %2823 = vmatprep.subr.bf16.mxu1 %v3214_v0 }
0x1a56   : > { %2824 = vmatpush3.bf16.msra.mxu1 %v2948_v53 }
0x1b24   : > { %v2152_v32 = vpop.f32.mrb[56].mxu1 }
0x1b25   : > { %v2153_v33 = vadd.f32 %v2522_v31, %v2152_v32  ;;  %v2807_v34 = vpop.f32.mrb[57].mxu1 }
0x1b26   : > { %v2155_v35 = vpop.f32.mrb[58].mxu1 }
0x1b27   : > { %v2158_v36 = vmax.f32 %v2153_v33, 0.0  ;;  %v2808_v37 = vpop.f32.mrb[59].mxu1 }
0x1b29   : > { %v2168_v38 = vpack.c.bf16 %v2158_v36, %v2158_v36 }
0x1b2b   : > { %2818 = vmatmul.mubr.msk.bf16.vlgmr.msra.gmra.mrb[56].mxu0 %vm1292_vm4, %v2168_v38 }
0x1bfe   : > { %v2230_v39 = vpop.f32.mrb[56].mxu0 }
0x1bff   : > { %v2236_v41 = vadd.f32 %v2230_v39, %v2088_v27  ;;  %v2819_v42 = vpop.f32.mrb[57].mxu0 }
0x1c00   : > { %v2233_v43 = vpop.f32.mrb[58].mxu0 }
0x1c01   : > { %v2820_v44 = vpop.f32.mrb[59].mxu0  ;;  %v2245_v45 = vadd.f32 %v2539_v40, %v2236_v41 }
0x1c03   : > { %v2246_v46 = vsel %vm484_vm1, %v2245_v45, 0.0 }
0x1c04   : > { %2247 = vadd.xlane.f32.xlu1 %v2246_v46 }
0x1c91   : > { %v2248_v47 = vpop.xlane.xlu1 %2247 }
0x1c92   : > { %v2249_v48 = vmul.f32 0.03125, %v2248_v47 }
0x1c94   : > { %v2250_v49 = vsub.f32 %v2245_v45, %v2249_v48 }
0x1c96   : > { %v2251_v50 = vmul.f32 %v2250_v49, %v2250_v49 }
0x1c98   : > { %v2252_v51 = vsel %vm484_vm1, %v2251_v50, 0.0 }
0x1c99   : > { %2253 = vadd.xlane.f32.xlu1 %v2252_v51 }
0x1d26   : > { %v2254_v54 = vpop.xlane.xlu1 %2253 }
0x1d27   : > { %v2255_v55 = vmul.f32 0.03125, %v2254_v54 }
0x1d29   : > { %v2256_v56 = vadd.f32 1e-05, %v2255_v55 }
0x1d2b   : > { %2987 = vrsqrt.f32 %v2256_v56 }
0x1d35   : > { %v2988_v57 = vpop.eup %2987 }
0x1d36   : > { %v2258_v58 = vmul.f32 %v2988_v57, %v2250_v49 }
0x1d38   : > { %v2263_v59 = vpack.c.bf16 %v2258_v58, %v2258_v58 }
0x1d3a   : > { %2826 = vmatmul.mubr.msk.bf16.vlgmr.msra.gmra.mrb[60].mxu1 %vm484_vm1, %v2263_v59 }
0x1e0d   : > { %v2320_v0 = vpop.f32.mrb[60].mxu1 }
0x1e0e   : > { %v2321_v6 = vadd.f32 %v2540_v10, %v2320_v0  ;;  %v2827_v60 = vpop.f32.mrb[61].mxu1 }
0x1e0f   : > { %v2323_v62 = vpop.f32.mrb[62].mxu1 }
0x1e10   : > { %2326 = vst [vmem:[%s457_s9] sm:$0xff] %v2321_v6  ;;  %v2828_v63 = vpop.f32.mrb[63].mxu1 }
0x1e11   : > { %3144 = shalt.err (!%p3141_p0)
}
0x1e12   : > { %s3145_s4 = scalar_lea.hbm %s3870_s14, 128  ;;  %s3149_s15 = scalar_lea.hbm %s3969_s28, 256 }
0x1e13   : > { %p3146_p2 = scmp.ne.s32.totalorder %s3870_s14, %s3145_s4  ;;  %p3150_p10 = scmp.lt.u32.totalorder %s3870_s14, %s3969_s28 }
0x1e14   : > { %p3151_p11 = scmp.lt.u32.totalorder %s3149_s15, %s3145_s4  ;;  %p3153_p6 = scmp.lt.u32.totalorder %s3145_s4, %s3870_s14 }
0x1e15   : > { %p3147_p8 = pnand %p3146_p2, %p3970_p5 }
0x1e16   : > { %p3152_p1 = por %p3151_p11, %p3150_p10 }
0x1e17   : > { %p3148_p4 = pneg %p3147_p8 }
0x1e18   : > { %p3154_p7 = por %p3153_p6, %p3152_p1 }
0x1e1a   : > { %p3155_p9 = pnand %p3154_p7, %p3148_p4 }
0x1e1c   : > { %3158 = shalt.err (!%p3155_p9)
}
0x1e1d   : > { %2847 = dma.vmem_to_hbm [thread:$0]  (%p3970_p5), %s3872_s26, 128, %s3870_s14, %s2328_s23  }
0x1e1e PF: > { %s2353_s30 = sand.u32 1, %s3193_s17   ;;  %p3971_p12 = scmp.ne.s32.totalorder %s3952_s25, 0 }
0x1e1f   : > { %p3972_p3 = scmp.ge.s32.totalorder %s3205_s20, 2  ;;  %s2354_s16 = scalar_lea.sflag [#allocation4], %s2353_s30 }
0x1e21   : > { %p2867_p13 = pnand %p3972_p3, %p3971_p12 }
0x1e23   : > { %3188 = dma.done.wait (!%p2867_p13), %s2354_s16, 128  }
0x1e24   : > { %3190 = vsyncadd (!%p2867_p13), %s2354_s16, 4294967168  ;;  %p26_p0 = scmp.ge.s32.totalorder %s3437_s27, 4   ;;  %s3973_s17 = smov %s3197_s18 }
0x1e25   : > { %s3974_s18 = smov %s3201_s19  ;;  %s3975_s19 = smov %s3448_s13 }
0x1e26   : > { %s3976_s20 = smov %s3437_s27  ;;  %28 = sbr.rel (!%p26_p0) target bundleno = 12 (0xc), region = 133 }
0x1e2d   :  { %2359 = vsyncpa [#allocation3], 1 }
0x1e2e   :  { %2361 = vsyncpa [#allocation3 + $0x1], 1 }
0x1e2f   :  { %2362 = vsyncpa [#allocation6], 1 }
0x1e30   :  { %2363 = vsyncpa [#allocation9], 1 }
0x1e31   :  { %2364 = vsyncpa [#allocation4], 1 }
0x1e32   :  { %2366 = vsyncpa [#allocation4 + $0x1], 1 }

// kernel: radioml_transformer_forward.1
= control target key start
LH: loop header
LB: loop body
LE: loop exit
PB: predicated region body
PF: predicated region fallthrough
CT: control target
= control target key end

     0   :  { %s3914_s0 = inlined_call_operand.hbm [shape: f32[2,8,32], index: 0, kind: input, shape index: {}]   ;;  %s3915_s1 = inlined_call_operand.vmem [shape: bf16[2,32,96], index: 1, kind: input, shape index: {}]   ;;  %s3916_s2 = inlined_call_operand.vmem [shape: f32[2,1,96], index: 2, kind: input, shape index: {}]   ;;  %s3917_s3 = inlined_call_operand.vmem [shape: bf16[2,4,8,32], index: 3, kind: input, shape index: {}]   ;;  %s3918_s4 = inlined_call_operand.hbm [shape: f32[2,1,32], index: 4, kind: input, shape index: {}]   ;;  %s3919_s5 = inlined_call_operand.vmem [shape: bf16[2,32,64], index: 5, kind: input, shape index: {}]   ;;  %s3920_s6 = inlined_call_operand.hbm [shape: f32[2,1,64], index: 6, kind: input, shape index: {}]   ;;  %s3921_s7 = inlined_call_operand.vmem [shape: bf16[2,64,32], index: 7, kind: input, shape index: {}]   ;;  %s3922_s8 = inlined_call_operand.hbm [shape: f32[2,1,32], index: 8, kind: input, shape index: {}]   ;;  %s3923_s9 = inlined_call_operand.vmem [shape: bf16[32,128], index: 9, kind: input, shape index: {}]   ;;  %s3924_s10 = inlined_call_operand.hbm [shape: f32[1,128], index: 10, kind: input, shape index: {}]   ;;  %s3925_s11 = inlined_call_operand.hbm [shape: f32[2,8,128], index: 11, kind: output, shape index: {}]  }
   0x1   :  { %3940 = sst [smem:[#allocation16_spill]] %s3918_s4 }
   0x2   :  { %3941 = sst [smem:[#allocation17_spill]] %s3921_s7 }
   0x3   :  { %3942 = sst [smem:[#allocation18_spill]] %s3923_s9 }
   0x4   :  { %3943 = sst [smem:[#allocation19_spill]] %s3925_s11 }
   0x5   :  { %16 = vsyncpa [#allocation3], 0 }
   0x6   :  { %18 = vsyncpa [#allocation3 + $0x1], 0 }
   0x7   :  { %19 = vsyncpa [#allocation6], 0 }
   0x8   :  { %20 = vsyncpa [#allocation9], 0 }
   0x9   :  { %21 = vsyncpa [#allocation4], 0 }
   0xa   :  { %23 = vsyncpa [#allocation4 + $0x1], 0  ;;  %s3288_s17 = smov 0   ;;  %s3290_s18 = smov 0  }
   0xb   :  { %s3292_s19 = smov 0   ;;  %s3294_s20 = smov 0  }
   0xc LB: > { %s3207_s21 = smov [#allocation5]   ;;  %s3309_s23 = sadd.s32 4294967295, %s3205_s20   ;;  %s3205_s20 = sphi %s3294_s20, %s3976_s20   ;;  %s3201_s19 = sphi %s3292_s19, %s3975_s19   ;;  %s3197_s18 = sphi %s3290_s18, %s3974_s18   ;;  %s3193_s17 = sphi %s3288_s17, %s3973_s17  }
   0xd   : > { %s317_s22 = sshll.u32 %s3207_s21, 4  ;;  %p2450_p0 = scmp.ge.s32.totalorder %s3205_s20, 1  ;;  %s3314_s22 = int_to_ptr.vmem [resolvable:$true] %s317_s22 }
   0xe   : > { %p3929_p1 = scmp.eq.s32.totalorder %s3309_s23, 0  ;;  %p296_p2 = scmp.lt.s32.totalorder %s3205_s20, 3 }
   0xf   : > { %s3208_s25 = smov [#allocation8]   ;;  %s3209_s28 = smov [#allocation7]  }
  0x10   : > { %p3316_p3 = pnand %p2450_p0, %p296_p2  ;;  %s349_s26 = sshll.u32 %s3208_s25, 4  ;;  %s3329_s26 = int_to_ptr.vmem [resolvable:$true] %s349_s26 }
  0x11   : > { %s333_s29 = sshll.u32 %s3209_s28, 4  ;;  %s3946_s4 = sld [smem:[#allocation16_spill]]  ;;  %s3331_s29 = int_to_ptr.vmem [resolvable:$true] %s333_s29 }
  0x12   : > { %s3944_s24 = scalar_select %p3316_p3, 1, 0 }
  0x13   : > { %p2849_p5 = pneg %p3316_p3 }
  0x15   : > { %p3325_p6 = pnand %p2849_p5, %p3929_p1 }
  0x17   : > { %s2989_s13 = scalar_lea.hbm %s3946_s4, 32  ;;  %p3341_p8 = pneg %p3325_p6 }
  0x18   : > { %p2990_p7 = scmp.ne.s32.totalorder %s3946_s4, %s2989_s13  ;;  %p2996_p11 = scmp.lt.u32.totalorder %s2989_s13, %s3946_s4 }
  0x1a   : > { %p2992_p9 = pnand %p3341_p8, %p2990_p7 }
  0x1c   : > { %p2993_p10 = pneg %p2992_p9 }
  0x1e   : > { %p2998_p12 = pnand %p2996_p11, %p2993_p10 }
  0x20   : > { %3001 = shalt.err (!%p2998_p12)
}
  0x21   : > { %s3002_s28 = scalar_lea.vmem %s3314_s22, 32  ;;  %p3010_p5 = scmp.lt.s32.totalorder %s3314_s22, %s3314_s22 }
  0x22   : > { %p3003_p13 = scmp.ne.s32.totalorder %s3314_s22, %s3002_s28  ;;  %p3011_p4 = scmp.lt.s32.totalorder %s3002_s28, %s3002_s28 }
  0x24   : > { %p3005_p0 = pnand %p3003_p13, %p3341_p8  ;;  %p3012_p7 = por %p3011_p4, %p3010_p5 }
  0x26   : > { %p3006_p2 = pneg %p3005_p0 }
  0x28   : > { %p3013_p9 = pnand %p3012_p7, %p3006_p2 }
  0x2a   : > { %3016 = shalt.err (!%p3013_p9)
}
  0x2b   : > { %s3210_s30 = smov 16   ;;  %s3211_s12 = smov 1  }
  0x2c   : > { %2852 = dma.hbm_to_vmem [thread:$0]  (!%p3325_p6), %s3946_s4, 32, %s3314_s22, [#allocation6], %s3210_s30, %s3210_s30, %s3211_s12  }
  0x2d   : > { %s3017_s25 = scalar_lea.hbm %s3922_s8, 32 }
  0x2e   : > { %p3018_p4 = scmp.ne.s32.totalorder %s3922_s8, %s3017_s25  ;;  %p3024_p12 = scmp.lt.u32.totalorder %s3017_s25, %s3922_s8 }
  0x30   : > { %p3020_p10 = pnand %p3018_p4, %p3341_p8 }
  0x32   : > { %p3021_p11 = pneg %p3020_p10 }
  0x34   : > { %p3026_p13 = pnand %p3024_p12, %p3021_p11 }
  0x36   : > { %3029 = shalt.err (!%p3026_p13)
}
  0x37   : > { %s3030_s22 = scalar_lea.vmem %s3329_s26, 32  ;;  %p3038_p7 = scmp.lt.s32.totalorder %s3329_s26, %s3329_s26 }
  0x38   : > { %p3031_p0 = scmp.ne.s32.totalorder %s3329_s26, %s3030_s22  ;;  %p3039_p9 = scmp.lt.s32.totalorder %s3030_s22, %s3030_s22 }
  0x3a   : > { %p3033_p2 = pnand %p3031_p0, %p3341_p8  ;;  %p3040_p4 = por %p3039_p9, %p3038_p7 }
  0x3c   : > { %p3034_p5 = pneg %p3033_p2 }
  0x3e   : > { %p3041_p10 = pnand %p3040_p4, %p3034_p5 }
  0x40   : > { %3044 = shalt.err (!%p3041_p10)
}
  0x41   : > { %2858 = dma.hbm_to_vmem [thread:$0]  (!%p3325_p6), %s3922_s8, 32, %s3329_s26, [#allocation9], %s3210_s30, %s3210_s30, %s3211_s12  }
  0x42   : > { %s3045_s14 = scalar_lea.hbm %s3920_s6, 32 }
  0x43   : > { %p3046_p11 = scmp.ne.s32.totalorder %s3920_s6, %s3045_s14  ;;  %p3052_p0 = scmp.lt.u32.totalorder %s3045_s14, %s3920_s6 }
  0x45   : > { %p3048_p12 = pnand %p3046_p11, %p3341_p8 }
  0x47   : > { %p3049_p13 = pneg %p3048_p12 }
  0x49   : > { %p3054_p2 = pnand %p3052_p0, %p3049_p13 }
  0x4b   : > { %3057 = shalt.err (!%p3054_p2)
}
  0x4c   : > { %s3058_s26 = scalar_lea.vmem %s3331_s29, 32  ;;  %p3066_p4 = scmp.lt.s32.totalorder %s3331_s29, %s3331_s29 }
  0x4d   : > { %p3059_p5 = scmp.ne.s32.totalorder %s3331_s29, %s3058_s26  ;;  %p3067_p10 = scmp.lt.s32.totalorder %s3058_s26, %s3058_s26 }
  0x4f   : > { %p3061_p7 = pnand %p3059_p5, %p3341_p8  ;;  %p3068_p11 = por %p3067_p10, %p3066_p4 }
  0x51   : > { %p3062_p9 = pneg %p3061_p7 }
  0x53   : > { %p3069_p12 = pnand %p3068_p11, %p3062_p9 }
  0x55   : > { %3072 = shalt.err (!%p3069_p12)
}
  0x56   : > { %2855 = dma.hbm_to_vmem [thread:$0]  (!%p3325_p6), %s3920_s6, 32, %s3331_s29, [#allocation6], %s3210_s30, %s3210_s30, %s3211_s12  }
  0x57   : > { %s3212_s9 = smov [#allocation10]   ;;  %s3073_s15 = scalar_lea.hbm %s3924_s10, 16 }
  0x58   : > { %s366_s11 = sshll.u32 %s3212_s9, 4  ;;  %p3074_p13 = scmp.ne.s32.totalorder %s3924_s10, %s3073_s15  ;;  %s367_s11 = int_to_ptr.vmem [resolvable:$true] %s366_s11 }
  0x59   : > { %p3080_p5 = scmp.lt.u32.totalorder %s3073_s15, %s3924_s10 }
  0x5a   : > { %p3076_p0 = pnand %p3074_p13, %p3341_p8 }
  0x5c   : > { %p3077_p2 = pneg %p3076_p0 }
  0x5e   : > { %p3082_p7 = pnand %p3080_p5, %p3077_p2 }
  0x60   : > { %3085 = shalt.err (!%p3082_p7)
}
  0x61   : > { %s3086_s29 = scalar_lea.vmem %s367_s11, 16  ;;  %s3093_s30 = scalar_lea.vmem %s367_s11, 32 }
  0x62   : > { %p3087_p9 = scmp.ne.s32.totalorder %s367_s11, %s3086_s29  ;;  %p3094_p11 = scmp.lt.s32.totalorder %s367_s11, %s367_s11 }
  0x63   : > { %p3095_p12 = scmp.lt.s32.totalorder %s3093_s30, %s3086_s29 }
  0x64   : > { %p3089_p4 = pnand %p3087_p9, %p3341_p8 }
  0x65   : > { %p3096_p1 = por %p3095_p12, %p3094_p11 }
  0x66   : > { %p3090_p10 = pneg %p3089_p4 }
  0x68   : > { %p3097_p3 = pnand %p3096_p1, %p3090_p10 }
  0x6a   : > { %3100 = shalt.err (!%p3097_p3)
}
  0x6b   : > { %2861 = dma.hbm_to_vmem [thread:$0]  (!%p3325_p6), %s3924_s10, 16, %s367_s11, [#allocation9]  }
  0x6c   : > { %s2449_s16 = sadd.s32 4294967294, %s3205_s20   ;;  %s3437_s27 = sadd.s32 1, %s3205_s20  }
  0x6d   : > { %s33_s7 = ssub.s32 %s3205_s20, %s3437_s27  ;;  %s36_s9 = sadd.s32 1, %s3201_s19 }
  0x6e   : > { %p34_p1 = scmp.eq.s32.totalorder %s33_s7, 0  ;;  %p43_p3 = scmp.ne.s32.totalorder %s3201_s19, %s3197_s18 }
  0x6f   : > { %p44_p8 = scmp.eq.s32.totalorder %s3205_s20, 0  ;;  %p49_p13 = scmp.ne.s32.totalorder %s3197_s18, %s3193_s17 }
  0x70   : > { %s3448_s13 = scalar_select %p34_p1, %s3201_s19, %s36_s9  }
  0x71   : > { %p3450_p0 = por %p44_p8, %p43_p3  ;;  %p3949_p2 = scmp.eq.s32.totalorder %s3309_s23, 0 }
  0x72   : > { %p283_p5 = scmp.eq.s32.totalorder %s3309_s23, 1  ;;  %p289_p7 = scmp.eq.s32.totalorder %s2449_s16, 1 }
  0x73   : > { %p3456_p6 = por %p3949_p2, %p49_p13  ;;  %p2874_p9 = scmp.lt.s32.totalorder %s3205_s20, 2 }
  0x74   : > { %s377_s15 = sand.u32 1, %s3201_s19   ;;  %p3463_p4 = por %p283_p5, %p43_p3 }
  0x75   : > { %p3467_p10 = por %p289_p7, %p49_p13  ;;  %s2456_s28 = sshll.u32 %s377_s15, 3 }
  0x76   : > { %s3951_s21 = scalar_select %p3463_p4, 1, 0 }
  0x77   : > { %s3952_s25 = scalar_select %p3467_p10, 1, 0 }
  0x78   : > { %s2457_s26 = sshll.u32 %s3205_s20, 7  ;;  %s381_s22 = scalar_lea.vmem [#allocation2], %s2456_s28 }
  0x79   : > { %s3475_s12 = scalar_lea.hbm %s3914_s0, %s2457_s26  ;;  %s388_s16 = sshll.u32 %s381_s22, 4  ;;  %s3477_s16 = int_to_ptr.vmem [resolvable:$true] %s388_s16 }
  0x7a   : > { %p3481_p11 = pnand %p2874_p9, %p3450_p0  ;;  %s378_s9 = scalar_lea.sflag [#allocation3], %s377_s15 }
  0x7b   : > { %s3101_s4 = scalar_lea.hbm %s3475_s12, 128  ;;  %s3106_s29 = scalar_lea.hbm %s3914_s0, 256 }
  0x7c   : > { %p3102_p12 = scmp.ne.s32.totalorder %s3475_s12, %s3101_s4  ;;  %p3103_p1 = pneg %p3481_p11 }
  0x7d   : > { %p3107_p13 = scmp.lt.u32.totalorder %s3475_s12, %s3914_s0  ;;  %p3108_p0 = scmp.lt.u32.totalorder %s3106_s29, %s3101_s4 }
  0x7e   : > { %p3104_p3 = pnand %p3103_p1, %p3102_p12  ;;  %p3110_p5 = scmp.lt.u32.totalorder %s3101_s4, %s3475_s12 }
  0x7f   : > { %p3109_p2 = por %p3108_p0, %p3107_p13 }
  0x80   : > { %p3105_p8 = pneg %p3104_p3 }
  0x81   : > { %p3111_p7 = por %p3110_p5, %p3109_p2 }
  0x83   : > { %p3112_p9 = pnand %p3111_p7, %p3105_p8 }
  0x85   : > { %3115 = shalt.err (!%p3112_p9)
}
  0x86   : > { %s3116_s15 = scalar_lea.vmem %s3477_s16, 128  ;;  %s3213_s22 = smov [#allocation2]  }
  0x87   : > { %p3117_p12 = scmp.ne.s32.totalorder %s3477_s16, %s3116_s15  ;;  %s3121_s28 = sshll.u32 %s3213_s22, 4  ;;  %s3122_s28 = int_to_ptr.vmem [resolvable:$false] %s3121_s28 }
  0x88   : > { %s3123_s26 = scalar_lea.vmem %s3122_s28, 256  ;;  %p3124_p4 = scmp.lt.s32.totalorder %s3477_s16, %s3122_s28 }
  0x89   : > { %p3119_p3 = pnand %p3117_p12, %p3103_p1  ;;  %p3125_p13 = scmp.lt.s32.totalorder %s3123_s26, %s3116_s15 }
  0x8b   : > { %p3120_p10 = pneg %p3119_p3  ;;  %p3126_p0 = por %p3125_p13, %p3124_p4 }
  0x8d   : > { %p3127_p2 = pnand %p3126_p0, %p3120_p10 }
  0x8f   : > { %3130 = shalt.err (!%p3127_p2)
}
  0x90   : > { %2865 = dma.hbm_to_vmem [thread:$0]  (!%p3481_p11), %s3475_s12, 128, %s3477_s16, %s378_s9  }
  0x91   : > { %p3954_p8 = scmp.ne.s32.totalorder %s3944_s24, 0 }
  0x92   : > { %s3513_s4 = sand.u32 (!%p3954_p8), 1, %s3197_s18  }
  0x93   : > { %397 = sbr.rel (%p3954_p8) target bundleno = 7710 (0x1e1e), region = 64  ;;  %s3932_s29 = sshll.u32 (!%p3954_p8), %s3513_s4, 3 }
  0x94   : > { %s400_s14 = scalar_lea.sflag (!%p3954_p8), [#allocation3], %s3513_s4  ;;  %s403_s30 = scalar_lea.vmem (!%p3954_p8), [#allocation2], %s3932_s29 }
  0x9a   : > { %3176 = dma.done.wait (%p3456_p6), %s400_s14, 128  }
  0x9b   : > { %3178 = vsyncadd (%p3456_p6), %s400_s14, 4294967168  ;;  %p3955_p4 = scmp.eq.s32.totalorder %s3309_s23, 0 }
  0x9d   : > { %3180 = dma.done.wait (%p3955_p4), [#allocation6], 64   ;;  %p3956_p10 = pmov %p3955_p4 }
  0x9e   : > { %p3957_p11 = pmov %p3955_p4 }
  0x9f   : > { %3182 = vsyncadd (%p3956_p10), [#allocation6], 4294967232 }
  0xa0   : > { %3184 = dma.done.wait (%p3957_p11), [#allocation9], 48   ;;  %p3958_p1 = pmov %p3955_p4 }
  0xa1   : > { %v3214_v0 = vmov 0.0   ;;  %vm3215_vm0 = vmmov 0   ;;  %v2931_v1 = vld [vmem:[%s3915_s1] sm:$0xff]   ;;  %v2932_v2 = vld [vmem:[%s3915_s1 + $0x8] sm:$0xff]   ;;  %vm484_vm1 = vcmask 261120   ;;  %s3216_s15 = smov 120  }
  0xa2   : > { %3186 = vsyncadd (%p3958_p1), [#allocation9], 4294967248  ;;  %2621 = vmatprep.subr.bf16.mxu0 %v3214_v0  ;;  %2625 = vmatprep.mubr.msk.bf16.mxu0 %vm3215_vm0, %v3214_v0  ;;  %v3543_v3 = vld [vmem:[%s403_s30] sm:$0xff]  ;;  %s3217_s22 = smov 96   ;;  %s3218_s28 = smov 88   ;;  %vm536_vm2 = vcmask 64512  }
  0xa3   : > { %2629 = vmatprep.subr.bf16.mxu1 %v3214_v0  ;;  %2631 = vmatprep.mubr.msk.bf16.mxu1 %vm3215_vm0, %v3214_v0  ;;  %v464_v4 = vpack.c.bf16 %v3543_v3, %v3543_v3  ;;  %v2465_v5 = vld [vmem:[%s3916_s2] ss:$0 sm:$0xff]  ;;  %s3938_s26 = smov 64   ;;  %s3220_s14 = smov 56   ;;  %vm601_vm3 = vcmask 1043456   ;;  %vm1292_vm4 = vcmask 523264  }
  0xa4   : > { %2622 = vmatpush3.bf16.msra.mxu0 %v2931_v1  ;;  %s3939_s30 = smov 112   ;;  %s3937_s24 = smov 80   ;;  %v528_v51 = vld [vmem:[%s3917_s3] sm:$0xf]  ;;  %v529_v53 = vld [vmem:[%s3917_s3 + $0x4] sm:$0xf] }
  0xa5   : > { %2623 = vmatprep.subr.bf16.mxu0 %v3214_v0  ;;  %v808_v52 = vsel %vm601_vm3, %v528_v51, 0  ;;  %v762_v54 = vsel %vm601_vm3, %v529_v53, 0  ;;  %s3934_s9 = smov 72   ;;  %s3935_s11 = smov 104  }
  0xa6   : > { %s3936_s12 = smov 48   ;;  %s3933_s16 = smov 40  }
  0xa7   : > { %s3964_s29 = smov 104   ;;  %s3965_s7 = smov 72  }
  0xa8   : > { %2624 = vmatpush3.bf16.msra.mxu0 %v2932_v2  ;;  %p3970_p5 = scmp.ne.s32.totalorder %s3951_s21, 0 }
  0xa9   : > { %2635 = vmatprep.subr.bf16.mxu0 %v3214_v0 }
  0xab   : > { %2626 = vmatmul.mubr.msk.bf16.vlgmr.msra.gmra.mrb[0].mxu0 %vm484_vm1, %v464_v4 }
  0xac   : > { %2637 = vmatprep.mubr.msk.bf16.mxu0 %vm3215_vm0, %v3214_v0 }
 0x17e   : > { %v522_v6 = vpop.f32.mrb[0].mxu0 }
 0x17f   : > { %v523_v7 = vadd.f32 %v2465_v5, %v522_v6  ;;  %v2627_v8 = vpop.f32.mrb[1].mxu0 }
 0x180   : > { %v525_v9 = vpop.f32.mrb[2].mxu0 }
 0x181   : > { %v3555_v10 = vpack.c.bf16 %v523_v7, %v523_v7  ;;  %v2628_v11 = vpop.f32.mrb[3].mxu0 }
 0x183   : > { %646 = vrot.lane.b32.xlu1 %v3555_v10, %s3216_s15  ;;  %534 = vrot.lane.b32.xlu0 %v3555_v10, %s3217_s22 }
 0x187   : > { %648 = vrot.lane.b32.xlu0 %v3555_v10, %s3218_s28 }
 0x1f5   : > { %v535_v12 = vpop.permute.xlu0 %534  ;;  %v647_v16 = vpop.permute.xlu1 %646 }
 0x1f6   : > { %v541_v13 = vsel %vm536_vm2, %v535_v12, 0 }
 0x1f7   : > { %2630 = vmatpush3.bf16.xpose.msra.mxu1 %v541_v13 }
 0x1f8   : > { %2641 = vmatprep.subr.bf16.mxu1 %v3214_v0 }
 0x1f9   : > { %v649_v14 = vpop.permute.xlu0 %648 }
 0x1fa   : > { %v654_v15 = vsel %vm536_vm2, %v649_v14, 0 }
 0x1fe   : > { %2632 = vmatmul.mubr.msk.bf16.vlgmr.msra.gmra.mrb[0].mxu1 %vm536_vm2, %v3555_v10 }
 0x1ff   : > { %2642 = vmatpush3.bf16.xpose.msra.mxu1 %v654_v15  ;;  %2643 = vmatprep.mubr.msk.bf16.mxu1 %vm3215_vm0, %v3214_v0 }
 0x200   : > { %2653 = vmatprep.subr.bf16.mxu1 %v3214_v0 }
 0x206   : > { %2644 = vmatmul.mubr.msk.bf16.vlgmr.msra.gmra.mrb[4].mxu1 %vm536_vm2, %v647_v16 }
 0x207   : > { %2655 = vmatprep.mubr.msk.bf16.mxu1 %vm3215_vm0, %v3214_v0  ;;  %2654 = vmatpush3.bf16.msra.mxu1 %v762_v54 }
 0x208   : > { %2665 = vmatprep.subr.bf16.mxu1 %v3214_v0 }
 0x2d1   : > { %v577_v17 = vpop.f32.mrb[0].mxu1 }
 0x2d2   : > { %v583_v18 = vmul.f32 0.35355338, %v577_v17  ;;  %v2633_v19 = vpop.f32.mrb[1].mxu1 }
 0x2d3   : > { %v580_v20 = vpop.f32.mrb[2].mxu1 }
 0x2d4   : > { %v2634_v21 = vpop.f32.mrb[3].mxu1  ;;  %v584_v22 = vsel %vm536_vm2, %v583_v18, -inf }
 0x2d5   : > { %585 = vmax.xlane.f32.xlu1 %v584_v22 }
 0x2d9   : > { %v690_v23 = vpop.f32.mrb[4].mxu1 }
 0x2da   : > { %v696_v24 = vmul.f32 0.35355338, %v690_v23  ;;  %v2645_v25 = vpop.f32.mrb[5].mxu1 }
 0x2db   : > { %v693_v26 = vpop.f32.mrb[6].mxu1 }
 0x2dc   : > { %v2646_v27 = vpop.f32.mrb[7].mxu1  ;;  %v697_v28 = vsel %vm536_vm2, %v696_v24, -inf }
 0x2dd   : > { %698 = vmax.xlane.f32.xlu0 %v697_v28 }
 0x362   : > { %v586_v29 = vpop.xlane.xlu1 %585 }
 0x363   : > { %v587_v30 = vsub.f32 %v583_v18, %v586_v29 }
 0x365   : > { %v588_v31 = vmul.f32 1.442695, %v587_v30 }
 0x367   : > { %2949 = vpow2.f32 %v588_v31 }
 0x36a   : > { %v699_v32 = vpop.xlane.xlu0 %698 }
 0x36b   : > { %v700_v33 = vsub.f32 %v696_v24, %v699_v32 }
 0x36d   : > { %v701_v34 = vmul.f32 1.442695, %v700_v33 }
 0x36f   : > { %2951 = vpow2.f32 %v701_v34 }
 0x371   : > { %v2950_v35 = vpop.eup %2949 }
 0x372   : > { %v590_v36 = vsel %vm536_vm2, %v2950_v35, 0.0 }
 0x373   : > { %591 = vadd.xlane.f32.xlu0 %v590_v36  ;;  %v530_v36 = vld [vmem:[%s3917_s3 + $0x8] sm:$0xf] }
 0x379   : > { %v2952_v37 = vpop.eup %2951 }
 0x37a   : > { %v703_v38 = vsel %vm536_vm2, %v2952_v37, 0.0 }
 0x37b   : > { %704 = vadd.xlane.f32.xlu1 %v703_v38 }
 0x389   : > { %596 = vrot.lane.b32.xlu0 %v3555_v10, %s3938_s26 }
 0x38c   : > { %709 = vrot.lane.b32.xlu1 %v3555_v10, %s3220_s14 }
 0x38d   : > { %850 = vrot.lane.b32.xlu0 %v3555_v10, %s3939_s30 }
 0x390   : > { %852 = vrot.lane.b32.xlu1 %v3555_v10, %s3937_s24  ;;  %s3959_s24 = sld [smem:[#allocation17_spill]] }
 0x400   : > { %v592_v39 = vpop.xlane.xlu0 %591 }
 0x401   : > { %2953 = vrcp.f32 %v592_v39 }
 0x404   : > { %v597_v40 = vpop.permute.xlu0 %596 }
 0x405   : > { %v603_v41 = vsel %vm601_vm3, %v597_v40, 0 }
 0x406   : > { %2636 = vmatpush3.bf16.msra.mxu0 %v603_v41 }
 0x407   : > { %2647 = vmatprep.subr.bf16.mxu0 %v3214_v0 }
 0x408   : > { %v705_v42 = vpop.xlane.xlu1 %704  ;;  %v851_v5 = vpop.permute.xlu0 %850 }
 0x409   : > { %2955 = vrcp.f32 %v705_v42 }
 0x40b   : > { %v2954_v43 = vpop.eup %2953 }
 0x40c   : > { %v594_v44 = vmul.f32 %v2954_v43, %v2950_v35  ;;  %v710_v45 = vpop.permute.xlu1 %709 }
 0x40d   : > { %v715_v47 = vsel %vm601_vm3, %v710_v45, 0 }
 0x40e   : > { %v595_v46 = vpack.c.bf16 %v594_v44, %v594_v44 }
 0x410   : > { %2638 = vmatmul.mubr.msk.bf16.vlgmr.msra.gmra.mrb[4].mxu0 %vm536_vm2, %v595_v46  ;;  %v853_v60 = vpop.permute.xlu1 %852 }
 0x411   : > { %2648 = vmatpush3.bf16.msra.mxu0 %v715_v47  ;;  %2649 = vmatprep.mubr.msk.bf16.mxu0 %vm3215_vm0, %v3214_v0  ;;  %v858_v2 = vsel %vm536_vm2, %v853_v60, 0 }
 0x412   : > { %2659 = vmatprep.subr.bf16.mxu0 %v3214_v0 }
 0x413   : > { %v2956_v48 = vpop.eup %2955 }
 0x414   : > { %v707_v49 = vmul.f32 %v2956_v48, %v2952_v37  ;;  %v966_v37 = vsel %vm601_vm3, %v530_v36, 0 }
 0x416   : > { %v708_v50 = vpack.c.bf16 %v707_v49, %v707_v49 }
 0x418   : > { %2650 = vmatmul.mubr.msk.bf16.vlgmr.msra.gmra.mrb[8].mxu0 %vm536_vm2, %v708_v50 }
 0x419   : > { %2661 = vmatprep.mubr.msk.bf16.mxu0 %vm3215_vm0, %v3214_v0  ;;  %2660 = vmatpush3.bf16.msra.mxu0 %v808_v52 }
 0x41a   : > { %2671 = vmatprep.subr.bf16.mxu0 %v3214_v0 }
 0x4e3   : > { %v639_v55 = vpop.f32.mrb[4].mxu0 }
 0x4e4   : > { %v645_v56 = vpack.c.bf16 %v639_v55, %v639_v55  ;;  %v2639_v57 = vpop.f32.mrb[5].mxu0 }
 0x4e5   : > { %v642_v58 = vpop.f32.mrb[6].mxu0 }
 0x4e6   : > { %v2640_v59 = vpop.f32.mrb[7].mxu0  ;;  %2662 = vmatmul.mubr.msk.bf16.vlgmr.msra.gmra.mrb[12].mxu0 %vm536_vm2, %v645_v56 }
 0x4e7   : > { %2673 = vmatprep.mubr.msk.bf16.mxu0 %vm3215_vm0, %v3214_v0 }
 0x4eb   : > { %v751_v61 = vpop.f32.mrb[8].mxu0 }
 0x4ec   : > { %v757_v62 = vpack.c.bf16 %v751_v61, %v751_v61  ;;  %v2651_v63 = vpop.f32.mrb[9].mxu0 }
 0x4ed   : > { %v754_v1 = vpop.f32.mrb[10].mxu0 }
 0x4ee   : > { %v2652_v4 = vpop.f32.mrb[11].mxu0  ;;  %2656 = vmatmul.mubr.msk.bf16.vlgmr.msra.gmra.mrb[8].mxu1 %vm536_vm2, %v757_v62  ;;  %v531_v1 = vld [vmem:[%s3917_s3 + $0xc] sm:$0xf] }
 0x4ef   : > { %2666 = vmatpush3.bf16.xpose.msra.mxu1 %v858_v2  ;;  %2667 = vmatprep.mubr.msk.bf16.mxu1 %vm3215_vm0, %v3214_v0  ;;  %v1125_v2 = vsel %vm601_vm3, %v531_v1, 0 }
 0x4f0   : > { %2677 = vmatprep.subr.bf16.mxu1 %v3214_v0 }
 0x4f6   : > { %2668 = vmatmul.mubr.msk.bf16.vlgmr.msra.gmra.mrb[12].mxu1 %vm536_vm2, %v851_v5 }
 0x4f7   : > { %2679 = vmatprep.mubr.msk.bf16.mxu1 %vm3215_vm0, %v3214_v0  ;;  %2678 = vmatpush3.bf16.msra.mxu1 %v966_v37 }
 0x4f8   : > { %2689 = vmatprep.subr.bf16.mxu1 %v3214_v0 }
 0x5b9   : > { %v844_v6 = vpop.f32.mrb[12].mxu0 }
 0x5ba   : > { %v2663_v7 = vpop.f32.mrb[13].mxu0 }
 0x5bb   : > { %v847_v8 = vpop.f32.mrb[14].mxu0 }
 0x5bc   : > { %v2664_v9 = vpop.f32.mrb[15].mxu0 }
 0x5c1   : > { %v798_v11 = vpop.f32.mrb[8].mxu1 }
 0x5c2   : > { %v3617_v12 = vadd.f32 %v844_v6, %v798_v11  ;;  %v2657_v13 = vpop.f32.mrb[9].mxu1 }
 0x5c3   : > { %v801_v14 = vpop.f32.mrb[10].mxu1 }
 0x5c4   : > { %v2658_v15 = vpop.f32.mrb[11].mxu1  ;;  %v2481_v14 = vld [vmem:[#allocation5] ss:$0 sm:$0xff] }
 0x5c9   : > { %v894_v16 = vpop.f32.mrb[12].mxu1 }
 0x5ca   : > { %v900_v17 = vmul.f32 0.35355338, %v894_v16  ;;  %v2669_v18 = vpop.f32.mrb[13].mxu1 }
 0x5cb   : > { %v897_v19 = vpop.f32.mrb[14].mxu1 }
 0x5cc   : > { %v2670_v20 = vpop.f32.mrb[15].mxu1  ;;  %v901_v21 = vsel %vm536_vm2, %v900_v17, -inf }
 0x5cd   : > { %902 = vmax.xlane.f32.xlu1 %v901_v21 }
 0x5de   : > { %1011 = vrot.lane.b32.xlu1 %v3555_v10, %s3934_s9 }
 0x5e2   : > { %1009 = vrot.lane.b32.xlu1 %v3555_v10, %s3935_s11  ;;  %s3967_s11 = sld [smem:[#allocation18_spill]] }
 0x65a   : > { %v903_v22 = vpop.xlane.xlu1 %902 }
 0x65b   : > { %v904_v23 = vsub.f32 %v900_v17, %v903_v22 }
 0x65d   : > { %v905_v24 = vmul.f32 1.442695, %v904_v23 }
 0x65e   : > { %v1012_v32 = vpop.permute.xlu1 %1011 }
 0x65f   : > { %2957 = vpow2.f32 %v905_v24  ;;  %v1017_v34 = vsel %vm536_vm2, %v1012_v32, 0  ;;  %v2933_v24 = vld [vmem:[%s3919_s5] sm:$0xff]  }
 0x662   : > { %v1010_v35 = vpop.permute.xlu1 %1009 }
 0x669   : > { %v2958_v25 = vpop.eup %2957 }
 0x66a   : > { %v907_v26 = vsel %vm536_vm2, %v2958_v25, 0.0 }
 0x66b   : > { %908 = vadd.xlane.f32.xlu0 %v907_v26  ;;  %v2936_v26 = vld [vmem:[%s3959_s24 + $0x8] sm:$0xff]  }
 0x681   : > { %913 = vrot.lane.b32.xlu0 %v3555_v10, %s3936_s12  ;;  %s3227_s12 = smov [#allocation11]  }
 0x6f8   : > { %v909_v27 = vpop.xlane.xlu0 %908 }
 0x6f9   : > { %2959 = vrcp.f32 %v909_v27 }
 0x6fc   : > { %v914_v28 = vpop.permute.xlu0 %913 }
 0x6fd   : > { %v919_v29 = vsel %vm601_vm3, %v914_v28, 0 }
 0x6fe   : > { %2672 = vmatpush3.bf16.msra.mxu0 %v919_v29 }
 0x6ff   : > { %2683 = vmatprep.subr.bf16.mxu0 %v3214_v0 }
 0x703   : > { %v2960_v30 = vpop.eup %2959 }
 0x704   : > { %v911_v31 = vmul.f32 %v2960_v30, %v2958_v25  ;;  %v2935_v25 = vld [vmem:[%s3959_s24] sm:$0xff]  }
 0x706   : > { %v912_v33 = vpack.c.bf16 %v911_v31, %v911_v31 }
 0x708   : > { %2674 = vmatmul.mubr.msk.bf16.vlgmr.msra.gmra.mrb[16].mxu0 %vm536_vm2, %v912_v33  ;;  %v2937_v33 = vld [vmem:[%s3959_s24 + $0x10] sm:$0xff]  }
 0x709   : > { %2684 = vmatpush3.bf16.xpose.msra.mxu0 %v1017_v34  ;;  %2685 = vmatprep.mubr.msk.bf16.mxu0 %vm3215_vm0, %v3214_v0  ;;  %v2938_v34 = vld [vmem:[%s3959_s24 + $0x18] sm:$0xff]  }
 0x70a   : > { %2695 = vmatprep.subr.bf16.mxu0 %v3214_v0 }
 0x710   : > { %2686 = vmatmul.mubr.msk.bf16.vlgmr.msra.gmra.mrb[20].mxu0 %vm536_vm2, %v1010_v35  ;;  %v2482_v35 = vld [vmem:[#allocation7] ss:$0 sm:$0xff] }
 0x711   : > { %2697 = vmatprep.mubr.msk.bf16.mxu0 %vm3215_vm0, %v3214_v0  ;;  %2696 = vmatpush3.bf16.msra.mxu0 %v1125_v2 }
 0x712   : > { %2709 = vmatprep.subr.bf16.mxu0 %v3214_v0 }
 0x7db   : > { %v955_v38 = vpop.f32.mrb[16].mxu0 }
 0x7dc   : > { %v961_v39 = vpack.c.bf16 %v955_v38, %v955_v38  ;;  %v2675_v40 = vpop.f32.mrb[17].mxu0 }
 0x7dd   : > { %v958_v41 = vpop.f32.mrb[18].mxu0 }
 0x7de   : > { %v2676_v42 = vpop.f32.mrb[19].mxu0  ;;  %2680 = vmatmul.mubr.msk.bf16.vlgmr.msra.gmra.mrb[16].mxu1 %vm536_vm2, %v961_v39 }
 0x7df   : > { %2691 = vmatprep.mubr.msk.bf16.mxu1 %vm3215_vm0, %v3214_v0 }
 0x7e3   : > { %v1053_v43 = vpop.f32.mrb[20].mxu0 }
 0x7e4   : > { %v1059_v44 = vmul.f32 0.35355338, %v1053_v43  ;;  %v2687_v45 = vpop.f32.mrb[21].mxu0 }
 0x7e5   : > { %v1056_v46 = vpop.f32.mrb[22].mxu0 }
 0x7e6   : > { %v2688_v47 = vpop.f32.mrb[23].mxu0  ;;  %v1060_v48 = vsel %vm536_vm2, %v1059_v44, -inf }
 0x7e7   : > { %1061 = vmax.xlane.f32.xlu0 %v1060_v48 }
 0x7fd   : > { %1072 = vrot.lane.b32.xlu0 %v3555_v10, %s3933_s16  ;;  %s3963_s16 = smov 48  }
 0x874   : > { %v1062_v49 = vpop.xlane.xlu0 %1061 }
 0x875   : > { %v1063_v50 = vsub.f32 %v1059_v44, %v1062_v49  ;;  %v2491_v44 = vld [vmem:[#allocation8] ss:$0 sm:$0xff] }
 0x877   : > { %v1064_v51 = vmul.f32 1.442695, %v1063_v50 }
 0x878   : > { %v1073_v52 = vpop.permute.xlu0 %1072 }
 0x879   : > { %2961 = vpow2.f32 %v1064_v51  ;;  %v1078_v53 = vsel %vm601_vm3, %v1073_v52, 0 }
 0x87a   : > { %2690 = vmatpush3.bf16.msra.mxu1 %v1078_v53 }
 0x87b   : > { %2701 = vmatprep.subr.bf16.mxu1 %v3214_v0 }
 0x883   : > { %v2962_v54 = vpop.eup %2961 }
 0x884   : > { %v1066_v55 = vsel %vm536_vm2, %v2962_v54, 0.0 }
 0x885   : > { %1067 = vadd.xlane.f32.xlu1 %v1066_v55 }
 0x8b1   : > { %v1002_v56 = vpop.f32.mrb[16].mxu1 }
 0x8b2   : > { %v1008_v57 = vadd.f32 %v1002_v56, %v3617_v12  ;;  %v2681_v58 = vpop.f32.mrb[17].mxu1  ;;  %v2939_v56 = vld [vmem:[%s3915_s1 + $0x10] sm:$0xff]  }
 0x8b3   : > { %v1005_v59 = vpop.f32.mrb[18].mxu1 }
 0x8b4   : > { %v2682_v10 = vpop.f32.mrb[19].mxu1 }
 0x912   : > { %v1068_v60 = vpop.xlane.xlu1 %1067 }
 0x913   : > { %2963 = vrcp.f32 %v1068_v60 }
 0x91d   : > { %v2964_v61 = vpop.eup %2963 }
 0x91e   : > { %v1070_v62 = vmul.f32 %v2964_v61, %v2962_v54 }
 0x920   : > { %v1071_v63 = vpack.c.bf16 %v1070_v62, %v1070_v62 }
 0x922   : > { %2692 = vmatmul.mubr.msk.bf16.vlgmr.msra.gmra.mrb[20].mxu1 %vm536_vm2, %v1071_v63  ;;  %v2497_v63 = vld [vmem:[%s3916_s2 + $0x1] ss:$0 sm:$0xff] }
 0x923   : > { %2705 = vmatprep.mubr.msk.bf16.mxu1 %vm3215_vm0, %v3214_v0  ;;  %2702 = vmatpush3.bf16.msra.mxu1 %v2933_v24 }
 0x924   : > { %2703 = vmatprep.subr.bf16.mxu1 %v3214_v0 }
 0x9f5   : > { %v1114_v4 = vpop.f32.mrb[20].mxu1 }
 0x9f6   : > { %v1120_v5 = vpack.c.bf16 %v1114_v4, %v1114_v4  ;;  %v2693_v6 = vpop.f32.mrb[21].mxu1 }
 0x9f7   : > { %v1117_v7 = vpop.f32.mrb[22].mxu1 }
 0x9f8   : > { %v2694_v8 = vpop.f32.mrb[23].mxu1  ;;  %2698 = vmatmul.mubr.msk.bf16.vlgmr.msra.gmra.mrb[24].mxu0 %vm536_vm2, %v1120_v5 }
 0x9f9   : > { %2717 = vmatprep.mubr.msk.bf16.mxu0 %vm3215_vm0, %v3214_v0  ;;  %2710 = vmatpush3.bf16.msra.mxu0 %v2935_v25 }
 0x9fa   : > { %2711 = vmatprep.subr.bf16.mxu0 %v3214_v0 }
 0x9fd   : > { %2712 = vmatpush3.bf16.msra.mxu0 %v2936_v26 }
 0x9fe   : > { %2713 = vmatprep.subr.bf16.mxu0 %v3214_v0 }
 0xa01   : > { %2714 = vmatpush3.bf16.msra.mxu0 %v2937_v33 }
 0xa02   : > { %2715 = vmatprep.subr.bf16.mxu0 %v3214_v0 }
 0xa05   : > { %2716 = vmatpush3.bf16.msra.mxu0 %v2938_v34 }
 0xa06   : > { %2735 = vmatprep.subr.bf16.mxu0 %v3214_v0 }
 0xacb   : > { %v1161_v9 = vpop.f32.mrb[24].mxu0 }
 0xacc   : > { %v1167_v11 = vadd.f32 %v1161_v9, %v1008_v57  ;;  %v2699_v12 = vpop.f32.mrb[25].mxu0  ;;  %v2940_v57 = vld [vmem:[%s3915_s1 + $0x18] sm:$0xff]  }
 0xacd   : > { %v1164_v13 = vpop.f32.mrb[26].mxu0 }
 0xace   : > { %v1168_v15 = vadd.f32 %v1167_v11, %v3543_v3  ;;  %v2700_v16 = vpop.f32.mrb[27].mxu0  ;;  %v2934_v3 = vld [vmem:[%s3919_s5 + $0x8] sm:$0xff]  }
 0xacf   : > { %2704 = vmatpush3.bf16.msra.mxu1 %v2934_v3 }
 0xad0   : > { %v1176_v17 = vadd.f32 %v2481_v14, %v1168_v15  ;;  %2721 = vmatprep.subr.bf16.mxu1 %v3214_v0 }
 0xad2   : > { %v1177_v18 = vsel %vm484_vm1, %v1176_v17, 0.0 }
 0xad3   : > { %1178 = vadd.xlane.f32.xlu1 %v1177_v18 }
 0xb60   : > { %v1179_v19 = vpop.xlane.xlu1 %1178 }
 0xb61   : > { %v1181_v20 = vmul.f32 0.03125, %v1179_v19 }
 0xb63   : > { %v1182_v21 = vsub.f32 %v1176_v17, %v1181_v20 }
 0xb65   : > { %v1183_v22 = vmul.f32 %v1182_v21, %v1182_v21 }
 0xb67   : > { %v1184_v23 = vsel %vm484_vm1, %v1183_v22, 0.0 }
 0xb68   : > { %1185 = vadd.xlane.f32.xlu1 %v1184_v23 }
 0xbf5   : > { %v1186_v27 = vpop.xlane.xlu1 %1185 }
 0xbf6   : > { %v1187_v28 = vmul.f32 0.03125, %v1186_v27 }
 0xbf8   : > { %v1188_v29 = vadd.f32 1e-05, %v1187_v28 }
 0xbfa   : > { %2965 = vrsqrt.f32 %v1188_v29 }
 0xc04   : > { %v2966_v30 = vpop.eup %2965 }
 0xc05   : > { %v1190_v31 = vmul.f32 %v2966_v30, %v1182_v21 }
 0xc07   : > { %v1195_v32 = vpack.c.bf16 %v1190_v31, %v1190_v31 }
 0xc09   : > { %2706 = vmatmul.mubr.msk.bf16.vlgmr.msra.gmra.mrb[24].mxu1 %vm484_vm1, %v1195_v32 }
 0xc0a   : > { %2725 = vmatprep.mubr.msk.bf16.mxu1 %vm3215_vm0, %v3214_v0  ;;  %2722 = vmatpush3.bf16.msra.mxu1 %v2939_v56 }
 0xc0b   : > { %2723 = vmatprep.subr.bf16.mxu1 %v3214_v0 }
 0xc0e   : > { %2724 = vmatpush3.bf16.msra.mxu1 %v2940_v57 }
 0xc0f   : > { %2729 = vmatprep.subr.bf16.mxu1 %v3214_v0 }
 0xcdc   : > { %v1252_v36 = vpop.f32.mrb[24].mxu1 }
 0xcdd   : > { %v1253_v37 = vadd.f32 %v2482_v35, %v1252_v36  ;;  %v2707_v38 = vpop.f32.mrb[25].mxu1 }
 0xcde   : > { %v1255_v39 = vpop.f32.mrb[26].mxu1 }
 0xcdf   : > { %v1258_v40 = vmax.f32 %v1253_v37, 0.0  ;;  %v2708_v41 = vpop.f32.mrb[27].mxu1 }
 0xce1   : > { %v1267_v42 = vpack.c.bf16 %v1258_v40, %v1258_v40 }
 0xce3   : > { %2718 = vmatmul.mubr.msk.bf16.vlgmr.msra.gmra.mrb[28].mxu0 %vm1292_vm4, %v1267_v42 }
 0xce4   : > { %2737 = vmatprep.mubr.msk.bf16.mxu0 %vm3215_vm0, %v3214_v0 }
 0xdb6   : > { %v1330_v43 = vpop.f32.mrb[28].mxu0 }
 0xdb7   : > { %v1336_v45 = vadd.f32 %v1330_v43, %v1190_v31  ;;  %v2719_v46 = vpop.f32.mrb[29].mxu0 }
 0xdb8   : > { %v1333_v47 = vpop.f32.mrb[30].mxu0 }
 0xdb9   : > { %v2720_v48 = vpop.f32.mrb[31].mxu0  ;;  %v1344_v49 = vadd.f32 %v2491_v44, %v1336_v45  ;;  %v2501_v47 = vld [vmem:[%s3917_s3 + $0x10] sm:$0xf] }
 0xdba   : > { %v1706_v48 = vsel %vm601_vm3, %v2501_v47, 0 }
 0xdbb   : > { %v1345_v50 = vsel %vm484_vm1, %v1344_v49, 0.0 }
 0xdbc   : > { %1346 = vadd.xlane.f32.xlu1 %v1345_v50 }
 0xe49   : > { %v1347_v51 = vpop.xlane.xlu1 %1346 }
 0xe4a   : > { %v1348_v52 = vmul.f32 0.03125, %v1347_v51 }
 0xe4c   : > { %v1349_v53 = vsub.f32 %v1344_v49, %v1348_v52  ;;  %v2502_v49 = vld [vmem:[%s3917_s3 + $0x14] sm:$0xf] }
 0xe4d   : > { %v1660_v50 = vsel %vm601_vm3, %v2502_v49, 0 }
 0xe4e   : > { %v1350_v54 = vmul.f32 %v1349_v53, %v1349_v53 }
 0xe50   : > { %v1351_v55 = vsel %vm484_vm1, %v1350_v54, 0.0 }
 0xe51   : > { %1352 = vadd.xlane.f32.xlu1 %v1351_v55 }
 0xede   : > { %v1353_v58 = vpop.xlane.xlu1 %1352 }
 0xedf   : > { %v1354_v59 = vmul.f32 0.03125, %v1353_v58 }
 0xee1   : > { %v1355_v10 = vadd.f32 1e-05, %v1354_v59 }
 0xee3   : > { %2967 = vrsqrt.f32 %v1355_v10 }
 0xeed   : > { %v2968_v60 = vpop.eup %2967 }
 0xeee   : > { %v3706_v61 = vmul.f32 %v2968_v60, %v1349_v53 }
 0xef0   : > { %v1363_v62 = vpack.c.bf16 %v3706_v61, %v3706_v61 }
 0xef2   : > { %2726 = vmatmul.mubr.msk.bf16.vlgmr.msra.gmra.mrb[28].mxu1 %vm484_vm1, %v1363_v62 }
 0xef3   : > { %2731 = vmatprep.mubr.msk.bf16.mxu1 %vm3215_vm0, %v3214_v0 }
 0xfc5   : > { %v1421_v1 = vpop.f32.mrb[28].mxu1 }
 0xfc6   : > { %v1422_v2 = vadd.f32 %v2497_v63, %v1421_v1  ;;  %v2727_v4 = vpop.f32.mrb[29].mxu1 }
 0xfc7   : > { %v1424_v5 = vpop.f32.mrb[30].mxu1 }
 0xfc8   : > { %v3716_v6 = vpack.c.bf16 %v1422_v2, %v1422_v2  ;;  %v2728_v7 = vpop.f32.mrb[31].mxu1 }
 0xfca   : > { %1546 = vrot.lane.b32.xlu0 %v3716_v6, %s3218_s28  ;;  %1434 = vrot.lane.b32.xlu1 %v3716_v6, %s3217_s22  ;;  %s3961_s22 = smov 64   ;;  %s3962_s28 = smov 80  }
 0xfce   : > { %1544 = vrot.lane.b32.xlu0 %v3716_v6, %s3216_s15  ;;  %s3960_s15 = smov 112  }
0x103c   : > { %v1435_v8 = vpop.permute.xlu1 %1434  ;;  %v1547_v11 = vpop.permute.xlu0 %1546 }
0x103d   : > { %v1440_v9 = vsel %vm536_vm2, %v1435_v8, 0  ;;  %v1552_v12 = vsel %vm536_vm2, %v1547_v11, 0 }
0x103e   : > { %2730 = vmatpush3.bf16.xpose.msra.mxu1 %v1440_v9 }
0x103f   : > { %2741 = vmatprep.subr.bf16.mxu1 %v3214_v0 }
0x1040   : > { %v1545_v13 = vpop.permute.xlu0 %1544 }
0x1045   : > { %2732 = vmatmul.mubr.msk.bf16.vlgmr.msra.gmra.mrb[32].mxu1 %vm536_vm2, %v3716_v6 }
0x1046   : > { %2742 = vmatpush3.bf16.xpose.msra.mxu1 %v1552_v12  ;;  %2743 = vmatprep.mubr.msk.bf16.mxu1 %vm3215_vm0, %v3214_v0 }
0x1047   : > { %2753 = vmatprep.subr.bf16.mxu1 %v3214_v0 }
0x104d   : > { %2744 = vmatmul.mubr.msk.bf16.vlgmr.msra.gmra.mrb[36].mxu1 %vm536_vm2, %v1545_v13 }
0x104e   : > { %2755 = vmatprep.mubr.msk.bf16.mxu1 %vm3215_vm0, %v3214_v0  ;;  %2754 = vmatpush3.bf16.msra.mxu1 %v1660_v50 }
0x104f   : > { %2765 = vmatprep.subr.bf16.mxu1 %v3214_v0 }
0x1118   : > { %v1476_v14 = vpop.f32.mrb[32].mxu1 }
0x1119   : > { %v1482_v15 = vmul.f32 0.35355338, %v1476_v14  ;;  %v2733_v16 = vpop.f32.mrb[33].mxu1 }
0x111a   : > { %v1479_v17 = vpop.f32.mrb[34].mxu1 }
0x111b   : > { %v2734_v18 = vpop.f32.mrb[35].mxu1  ;;  %v1483_v19 = vsel %vm536_vm2, %v1482_v15, -inf }
0x111c   : > { %1484 = vmax.xlane.f32.xlu0 %v1483_v19 }
0x1120   : > { %v1588_v20 = vpop.f32.mrb[36].mxu1 }
0x1121   : > { %v1594_v21 = vmul.f32 0.35355338, %v1588_v20  ;;  %v2745_v22 = vpop.f32.mrb[37].mxu1 }
0x1122   : > { %v1591_v23 = vpop.f32.mrb[38].mxu1 }
0x1123   : > { %v2746_v24 = vpop.f32.mrb[39].mxu1  ;;  %v1595_v3 = vsel %vm536_vm2, %v1594_v21, -inf }
0x1124   : > { %1596 = vmax.xlane.f32.xlu1 %v1595_v3 }
0x1135   : > { %1607 = vrot.lane.b32.xlu1 %v3716_v6, %s3220_s14 }
0x1139   : > { %1748 = vrot.lane.b32.xlu1 %v3716_v6, %s3960_s15  ;;  %s3966_s15 = smov 40  }
0x11a9   : > { %v1485_v25 = vpop.xlane.xlu0 %1484 }
0x11aa   : > { %v1486_v26 = vsub.f32 %v1482_v15, %v1485_v25 }
0x11ac   : > { %v1487_v27 = vmul.f32 1.442695, %v1486_v26 }
0x11ae   : > { %2969 = vpow2.f32 %v1487_v27 }
0x11b1   : > { %v1597_v28 = vpop.xlane.xlu1 %1596 }
0x11b2   : > { %v1598_v29 = vsub.f32 %v1594_v21, %v1597_v28 }
0x11b4   : > { %v1599_v30 = vmul.f32 1.442695, %v1598_v29 }
0x11b5   : > { %v1608_v41 = vpop.permute.xlu1 %1607 }
0x11b6   : > { %2971 = vpow2.f32 %v1599_v30  ;;  %v1613_v43 = vsel %vm601_vm3, %v1608_v41, 0 }
0x11b8   : > { %v2970_v31 = vpop.eup %2969 }
0x11b9   : > { %v1489_v32 = vsel %vm536_vm2, %v2970_v31, 0.0  ;;  %v1749_v63 = vpop.permute.xlu1 %1748 }
0x11ba   : > { %1490 = vadd.xlane.f32.xlu0 %v1489_v32  ;;  %v2503_v32 = vld [vmem:[%s3917_s3 + $0x18] sm:$0xf] }
0x11c0   : > { %v2972_v33 = vpop.eup %2971 }
0x11c1   : > { %v1601_v34 = vsel %vm536_vm2, %v2972_v33, 0.0 }
0x11c2   : > { %1602 = vadd.xlane.f32.xlu0 %v1601_v34 }
0x11d8   : > { %1495 = vrot.lane.b32.xlu0 %v3716_v6, %s3961_s22 }
0x11dc   : > { %1750 = vrot.lane.b32.xlu0 %v3716_v6, %s3962_s28  ;;  %s3969_s28 = sld [smem:[#allocation19_spill]] }
0x1247   : > { %v1491_v35 = vpop.xlane.xlu0 %1490 }
0x1248   : > { %2973 = vrcp.f32 %v1491_v35 }
0x124f   : > { %v1603_v36 = vpop.xlane.xlu0 %1602 }
0x1250   : > { %2975 = vrcp.f32 %v1603_v36 }
0x1252   : > { %v2974_v37 = vpop.eup %2973 }
0x1253   : > { %v1493_v38 = vmul.f32 %v2974_v37, %v2970_v31  ;;  %v1496_v39 = vpop.permute.xlu0 %1495 }
0x1254   : > { %v1501_v40 = vsel %vm601_vm3, %v1496_v39, 0 }
0x1255   : > { %2736 = vmatpush3.bf16.msra.mxu0 %v1501_v40  ;;  %v1494_v42 = vpack.c.bf16 %v1493_v38, %v1493_v38 }
0x1256   : > { %2747 = vmatprep.subr.bf16.mxu0 %v3214_v0 }
0x1257   : > { %v1751_v56 = vpop.permute.xlu0 %1750 }
0x1258   : > { %2738 = vmatmul.mubr.msk.bf16.vlgmr.msra.gmra.mrb[32].mxu0 %vm536_vm2, %v1494_v42  ;;  %v1756_v60 = vsel %vm536_vm2, %v1751_v56, 0 }
0x1259   : > { %2748 = vmatpush3.bf16.msra.mxu0 %v1613_v43  ;;  %2749 = vmatprep.mubr.msk.bf16.mxu0 %vm3215_vm0, %v3214_v0 }
0x125a   : > { %v2976_v44 = vpop.eup %2975  ;;  %2759 = vmatprep.subr.bf16.mxu0 %v3214_v0 }
0x125b   : > { %v1605_v45 = vmul.f32 %v2976_v44, %v2972_v33  ;;  %v1864_v33 = vsel %vm601_vm3, %v2503_v32, 0 }
0x125d   : > { %v1606_v46 = vpack.c.bf16 %v1605_v45, %v1605_v45 }
0x1260   : > { %2750 = vmatmul.mubr.msk.bf16.vlgmr.msra.gmra.mrb[36].mxu0 %vm536_vm2, %v1606_v46 }
0x1261   : > { %2761 = vmatprep.mubr.msk.bf16.mxu0 %vm3215_vm0, %v3214_v0  ;;  %2760 = vmatpush3.bf16.msra.mxu0 %v1706_v48 }
0x1262   : > { %2771 = vmatprep.subr.bf16.mxu0 %v3214_v0 }
0x132b   : > { %v1537_v51 = vpop.f32.mrb[32].mxu0 }
0x132c   : > { %v1543_v52 = vpack.c.bf16 %v1537_v51, %v1537_v51  ;;  %v2739_v53 = vpop.f32.mrb[33].mxu0 }
0x132d   : > { %v1540_v54 = vpop.f32.mrb[34].mxu0 }
0x132e   : > { %v2740_v55 = vpop.f32.mrb[35].mxu0  ;;  %2762 = vmatmul.mubr.msk.bf16.vlgmr.msra.gmra.mrb[40].mxu0 %vm536_vm2, %v1543_v52 }
0x132f   : > { %2773 = vmatprep.mubr.msk.bf16.mxu0 %vm3215_vm0, %v3214_v0 }
0x1333   : > { %v1649_v57 = vpop.f32.mrb[36].mxu0 }
0x1334   : > { %v1655_v58 = vpack.c.bf16 %v1649_v57, %v1649_v57  ;;  %v2751_v59 = vpop.f32.mrb[37].mxu0 }
0x1335   : > { %v1652_v10 = vpop.f32.mrb[38].mxu0 }
0x1336   : > { %v2752_v62 = vpop.f32.mrb[39].mxu0  ;;  %2756 = vmatmul.mubr.msk.bf16.vlgmr.msra.gmra.mrb[40].mxu1 %vm536_vm2, %v1655_v58 }
0x1337   : > { %2766 = vmatpush3.bf16.xpose.msra.mxu1 %v1756_v60  ;;  %2767 = vmatprep.mubr.msk.bf16.mxu1 %vm3215_vm0, %v3214_v0 }
0x1338   : > { %2777 = vmatprep.subr.bf16.mxu1 %v3214_v0 }
0x133e   : > { %2768 = vmatmul.mubr.msk.bf16.vlgmr.msra.gmra.mrb[44].mxu1 %vm536_vm2, %v1749_v63 }
0x133f   : > { %2779 = vmatprep.mubr.msk.bf16.mxu1 %vm3215_vm0, %v3214_v0  ;;  %2778 = vmatpush3.bf16.msra.mxu1 %v1864_v33 }
0x1340   : > { %2789 = vmatprep.subr.bf16.mxu1 %v3214_v0 }
0x1401   : > { %v1742_v1 = vpop.f32.mrb[40].mxu0 }
0x1402   : > { %v2763_v2 = vpop.f32.mrb[41].mxu0 }
0x1403   : > { %v1745_v4 = vpop.f32.mrb[42].mxu0 }
0x1404   : > { %v2764_v5 = vpop.f32.mrb[43].mxu0 }
0x1409   : > { %v1696_v7 = vpop.f32.mrb[40].mxu1 }
0x140a   : > { %v3778_v8 = vadd.f32 %v1742_v1, %v1696_v7  ;;  %v2757_v9 = vpop.f32.mrb[41].mxu1 }
0x140b   : > { %v1699_v11 = vpop.f32.mrb[42].mxu1 }
0x140c   : > { %v2758_v12 = vpop.f32.mrb[43].mxu1  ;;  %v2517_v11 = vld [vmem:[#allocation5 + $0x1] ss:$0 sm:$0xff] }
0x1411   : > { %v1792_v13 = vpop.f32.mrb[44].mxu1 }
0x1412   : > { %v1798_v14 = vmul.f32 0.35355338, %v1792_v13  ;;  %v2769_v15 = vpop.f32.mrb[45].mxu1 }
0x1413   : > { %v1795_v16 = vpop.f32.mrb[46].mxu1 }
0x1414   : > { %v2770_v17 = vpop.f32.mrb[47].mxu1  ;;  %v1799_v18 = vsel %vm536_vm2, %v1798_v14, -inf }
0x1415   : > { %1800 = vmax.xlane.f32.xlu0 %v1799_v18 }
0x142b   : > { %1811 = vrot.lane.b32.xlu0 %v3716_v6, %s3963_s16  ;;  %s3135_s16 = sshll.u32 %s3227_s12, 4  ;;  %s3136_s16 = int_to_ptr.vmem [resolvable:$false] %s3135_s16 }
0x142f   : > { %1907 = vrot.lane.b32.xlu0 %v3716_v6, %s3964_s29  ;;  %s2545_s29 = sshll.u32 %s3309_s23, 7  ;;  %s2328_s23 = scalar_lea.sflag [#allocation4], %s3513_s4 }
0x1430   : > { %s3870_s14 = scalar_lea.hbm %s3969_s28, %s2545_s29 }
0x14a2   : > { %v1801_v19 = vpop.xlane.xlu0 %1800 }
0x14a3   : > { %v1802_v20 = vsub.f32 %v1798_v14, %v1801_v19 }
0x14a5   : > { %v1803_v21 = vmul.f32 1.442695, %v1802_v20 }
0x14a6   : > { %v1812_v22 = vpop.permute.xlu0 %1811 }
0x14a7   : > { %2977 = vpow2.f32 %v1803_v21  ;;  %v1817_v23 = vsel %vm601_vm3, %v1812_v22, 0  ;;  %v2941_v21 = vld [vmem:[%s3919_s5 + $0x10] sm:$0xff]   ;;  %v2943_v22 = vld [vmem:[%s3959_s24 + $0x20] sm:$0xff]  }
0x14a8   : > { %2772 = vmatpush3.bf16.msra.mxu0 %v1817_v23  ;;  %v2944_v23 = vld [vmem:[%s3959_s24 + $0x28] sm:$0xff]  }
0x14a9   : > { %2783 = vmatprep.subr.bf16.mxu0 %v3214_v0 }
0x14aa   : > { %v1908_v31 = vpop.permute.xlu0 %1907 }
0x14b1   : > { %v2978_v24 = vpop.eup %2977 }
0x14b2   : > { %v1805_v3 = vsel %vm536_vm2, %v2978_v24, 0.0 }
0x14b3   : > { %1806 = vadd.xlane.f32.xlu1 %v1805_v3 }
0x14c4   : > { %1909 = vrot.lane.b32.xlu1 %v3716_v6, %s3965_s7  ;;  %s3968_s7 = sshll.u32 %s3513_s4, 3 }
0x14c5   : > { %s457_s9 = scalar_lea.vmem [#allocation11], %s3968_s7  ;;  %s3137_s7 = scalar_lea.vmem %s3136_s16, 256 }
0x14c6   : > { %s2341_s26 = sshll.u32 %s457_s9, 4  ;;  %s3872_s26 = int_to_ptr.vmem [resolvable:$true] %s2341_s26 }
0x14c7   : > { %s3131_s30 = scalar_lea.vmem %s3872_s26, 128  ;;  %p3138_p12 = scmp.lt.s32.totalorder %s3872_s26, %s3136_s16 }
0x14c8   : > { %p3132_p6 = scmp.ne.s32.totalorder %s3872_s26, %s3131_s30  ;;  %p3139_p3 = scmp.lt.s32.totalorder %s3137_s7, %s3131_s30 }
0x14ca   : > { %p3133_p7 = pnand %p3132_p6, %p3970_p5  ;;  %p3140_p13 = por %p3139_p3, %p3138_p12 }
0x14cc   : > { %p3134_p9 = pneg %p3133_p7 }
0x14ce   : > { %p3141_p0 = pnand %p3140_p13, %p3134_p9 }
0x1540   : > { %v1807_v25 = vpop.xlane.xlu1 %1806 }
0x1541   : > { %2979 = vrcp.f32 %v1807_v25 }
0x1544   : > { %v1910_v28 = vpop.permute.xlu1 %1909 }
0x1545   : > { %v1915_v30 = vsel %vm536_vm2, %v1910_v28, 0 }
0x154b   : > { %v2980_v26 = vpop.eup %2979 }
0x154c   : > { %v1809_v27 = vmul.f32 %v2980_v26, %v2978_v24 }
0x154e   : > { %v1810_v29 = vpack.c.bf16 %v1809_v27, %v1809_v27 }
0x1550   : > { %2774 = vmatmul.mubr.msk.bf16.vlgmr.msra.gmra.mrb[44].mxu0 %vm536_vm2, %v1810_v29  ;;  %v2945_v29 = vld [vmem:[%s3959_s24 + $0x30] sm:$0xff]  }
0x1551   : > { %2784 = vmatpush3.bf16.xpose.msra.mxu0 %v1915_v30  ;;  %2785 = vmatprep.mubr.msk.bf16.mxu0 %vm3215_vm0, %v3214_v0  ;;  %v2946_v30 = vld [vmem:[%s3959_s24 + $0x38] sm:$0xff]  }
0x1552   : > { %2795 = vmatprep.subr.bf16.mxu0 %v3214_v0 }
0x1558   : > { %2786 = vmatmul.mubr.msk.bf16.vlgmr.msra.gmra.mrb[48].mxu0 %vm536_vm2, %v1908_v31  ;;  %v2522_v31 = vld [vmem:[#allocation7 + $0x1] ss:$0 sm:$0xff] }
0x1559   : > { %2797 = vmatprep.mubr.msk.bf16.mxu0 %vm3215_vm0, %v3214_v0 }
0x1623   : > { %v1853_v34 = vpop.f32.mrb[44].mxu0 }
0x1624   : > { %v1859_v35 = vpack.c.bf16 %v1853_v34, %v1853_v34  ;;  %v2775_v36 = vpop.f32.mrb[45].mxu0 }
0x1625   : > { %v1856_v37 = vpop.f32.mrb[46].mxu0 }
0x1626   : > { %v2776_v38 = vpop.f32.mrb[47].mxu0  ;;  %2780 = vmatmul.mubr.msk.bf16.vlgmr.msra.gmra.mrb[48].mxu1 %vm536_vm2, %v1859_v35 }
0x1627   : > { %2791 = vmatprep.mubr.msk.bf16.mxu1 %vm3215_vm0, %v3214_v0 }
0x162b   : > { %v1951_v39 = vpop.f32.mrb[48].mxu0 }
0x162c   : > { %v1957_v40 = vmul.f32 0.35355338, %v1951_v39  ;;  %v2787_v41 = vpop.f32.mrb[49].mxu0 }
0x162d   : > { %v1954_v42 = vpop.f32.mrb[50].mxu0 }
0x162e   : > { %v2788_v43 = vpop.f32.mrb[51].mxu0  ;;  %v1958_v44 = vsel %vm536_vm2, %v1957_v40, -inf }
0x162f   : > { %1959 = vmax.xlane.f32.xlu1 %v1958_v44 }
0x16bc   : > { %v1960_v45 = vpop.xlane.xlu1 %1959 }
0x16bd   : > { %v1961_v46 = vsub.f32 %v1957_v40, %v1960_v45  ;;  %v2539_v40 = vld [vmem:[#allocation8 + $0x1] ss:$0 sm:$0xff] }
0x16bf   : > { %v1962_v47 = vmul.f32 1.442695, %v1961_v46 }
0x16c1   : > { %2981 = vpow2.f32 %v1962_v47 }
0x16cb   : > { %v2982_v48 = vpop.eup %2981 }
0x16cc   : > { %v1964_v49 = vsel %vm536_vm2, %v2982_v48, 0.0 }
0x16cd   : > { %1965 = vadd.xlane.f32.xlu0 %v1964_v49 }
0x16e3   : > { %1970 = vrot.lane.b32.xlu0 %v3716_v6, %s3966_s15  ;;  %v2504_v6 = vld [vmem:[%s3917_s3 + $0x1c] sm:$0xf] }
0x16e4   : > { %v2023_v60 = vsel %vm601_vm3, %v2504_v6, 0 }
0x16e5   : > { %2796 = vmatpush3.bf16.msra.mxu0 %v2023_v60 }
0x16e6   : > { %2809 = vmatprep.subr.bf16.mxu0 %v3214_v0 }
0x16f9   : > { %v1900_v50 = vpop.f32.mrb[48].mxu1 }
0x16fa   : > { %v1906_v51 = vadd.f32 %v1900_v50, %v3778_v8  ;;  %v2781_v52 = vpop.f32.mrb[49].mxu1 }
0x16fb   : > { %v1903_v53 = vpop.f32.mrb[50].mxu1  ;;  %v2947_v52 = vld [vmem:[%s3967_s11] sm:$0xff]  }
0x16fc   : > { %v2782_v54 = vpop.f32.mrb[51].mxu1  ;;  %v2948_v53 = vld [vmem:[%s3967_s11 + $0x8] sm:$0xff]  }
0x175a   : > { %v1966_v55 = vpop.xlane.xlu0 %1965 }
0x175b   : > { %2983 = vrcp.f32 %v1966_v55 }
0x175e   : > { %v1971_v56 = vpop.permute.xlu0 %1970 }
0x175f   : > { %v1976_v57 = vsel %vm601_vm3, %v1971_v56, 0 }
0x1760   : > { %2790 = vmatpush3.bf16.msra.mxu1 %v1976_v57 }
0x1761   : > { %2801 = vmatprep.subr.bf16.mxu1 %v3214_v0 }
0x1765   : > { %v2984_v58 = vpop.eup %2983 }
0x1766   : > { %v1968_v59 = vmul.f32 %v2984_v58, %v2982_v48 }
0x1768   : > { %v1969_v10 = vpack.c.bf16 %v1968_v59, %v1968_v59 }
0x176a   : > { %2792 = vmatmul.mubr.msk.bf16.vlgmr.msra.gmra.mrb[52].mxu1 %vm536_vm2, %v1969_v10  ;;  %v2540_v10 = vld [vmem:[#allocation10] ss:$0 sm:$0xff] }
0x176b   : > { %2805 = vmatprep.mubr.msk.bf16.mxu1 %vm3215_vm0, %v3214_v0  ;;  %2802 = vmatpush3.bf16.msra.mxu1 %v2941_v21 }
0x176c   : > { %2803 = vmatprep.subr.bf16.mxu1 %v3214_v0 }
0x183d   : > { %v2012_v62 = vpop.f32.mrb[52].mxu1 }
0x183e   : > { %v2018_v63 = vpack.c.bf16 %v2012_v62, %v2012_v62  ;;  %v2793_v1 = vpop.f32.mrb[53].mxu1 }
0x183f   : > { %v2015_v2 = vpop.f32.mrb[54].mxu1 }
0x1840   : > { %v2794_v4 = vpop.f32.mrb[55].mxu1  ;;  %2798 = vmatmul.mubr.msk.bf16.vlgmr.msra.gmra.mrb[52].mxu0 %vm536_vm2, %v2018_v63 }
0x1841   : > { %2817 = vmatprep.mubr.msk.bf16.mxu0 %vm3215_vm0, %v3214_v0  ;;  %2810 = vmatpush3.bf16.msra.mxu0 %v2943_v22 }
0x1842   : > { %2811 = vmatprep.subr.bf16.mxu0 %v3214_v0 }
0x1845   : > { %2812 = vmatpush3.bf16.msra.mxu0 %v2944_v23 }
0x1846   : > { %2813 = vmatprep.subr.bf16.mxu0 %v3214_v0 }
0x1849   : > { %2814 = vmatpush3.bf16.msra.mxu0 %v2945_v29 }
0x184a   : > { %2815 = vmatprep.subr.bf16.mxu0 %v3214_v0 }
0x184d   : > { %2816 = vmatpush3.bf16.msra.mxu0 %v2946_v30 }
0x1913   : > { %v2059_v5 = vpop.f32.mrb[52].mxu0 }
0x1914   : > { %v2065_v7 = vadd.f32 %v2059_v5, %v1906_v51  ;;  %v2799_v8 = vpop.f32.mrb[53].mxu0 }
0x1915   : > { %v2062_v9 = vpop.f32.mrb[54].mxu0 }
0x1916   : > { %v2066_v12 = vadd.f32 %v2065_v7, %v3706_v61  ;;  %v2800_v13 = vpop.f32.mrb[55].mxu0  ;;  %v2942_v61 = vld [vmem:[%s3919_s5 + $0x18] sm:$0xff]  }
0x1917   : > { %2804 = vmatpush3.bf16.msra.mxu1 %v2942_v61 }
0x1918   : > { %v2075_v14 = vadd.f32 %v2517_v11, %v2066_v12  ;;  %2821 = vmatprep.subr.bf16.mxu1 %v3214_v0 }
0x191a   : > { %v2076_v15 = vsel %vm484_vm1, %v2075_v14, 0.0 }
0x191b   : > { %2077 = vadd.xlane.f32.xlu1 %v2076_v15 }
0x19a8   : > { %v2078_v16 = vpop.xlane.xlu1 %2077 }
0x19a9   : > { %v2079_v17 = vmul.f32 0.03125, %v2078_v16 }
0x19ab   : > { %v2080_v18 = vsub.f32 %v2075_v14, %v2079_v17 }
0x19ad   : > { %v2081_v19 = vmul.f32 %v2080_v18, %v2080_v18 }
0x19af   : > { %v2082_v20 = vsel %vm484_vm1, %v2081_v19, 0.0 }
0x19b0   : > { %2083 = vadd.xlane.f32.xlu1 %v2082_v20 }
0x1a3d   : > { %v2084_v24 = vpop.xlane.xlu1 %2083 }
0x1a3e   : > { %v2085_v3 = vmul.f32 0.03125, %v2084_v24 }
0x1a40   : > { %v2086_v25 = vadd.f32 1e-05, %v2085_v3 }
0x1a42   : > { %2985 = vrsqrt.f32 %v2086_v25 }
0x1a4c   : > { %v2986_v26 = vpop.eup %2985 }
0x1a4d   : > { %v2088_v27 = vmul.f32 %v2986_v26, %v2080_v18 }
0x1a4f   : > { %v2094_v28 = vpack.c.bf16 %v2088_v27, %v2088_v27 }
0x1a51   : > { %2806 = vmatmul.mubr.msk.bf16.vlgmr.msra.gmra.mrb[56].mxu1 %vm484_vm1, %v2094_v28 }
0x1a52   : > { %2825 = vmatprep.mubr.msk.bf16.mxu1 %vm3215_vm0, %v3214_v0  ;;  %2822 = vmatpush3.bf16.msra.mxu1 %v2947_v52 }
0x1a53   : > { %2823 = vmatprep.subr.bf16.mxu1 %v3214_v0 }
0x1a56   : > { %2824 = vmatpush3.bf16.msra.mxu1 %v2948_v53 }
0x1b24   : > { %v2152_v32 = vpop.f32.mrb[56].mxu1 }
0x1b25   : > { %v2153_v33 = vadd.f32 %v2522_v31, %v2152_v32  ;;  %v2807_v34 = vpop.f32.mrb[57].mxu1 }
0x1b26   : > { %v2155_v35 = vpop.f32.mrb[58].mxu1 }
0x1b27   : > { %v2158_v36 = vmax.f32 %v2153_v33, 0.0  ;;  %v2808_v37 = vpop.f32.mrb[59].mxu1 }
0x1b29   : > { %v2168_v38 = vpack.c.bf16 %v2158_v36, %v2158_v36 }
0x1b2b   : > { %2818 = vmatmul.mubr.msk.bf16.vlgmr.msra.gmra.mrb[56].mxu0 %vm1292_vm4, %v2168_v38 }
0x1bfe   : > { %v2230_v39 = vpop.f32.mrb[56].mxu0 }
0x1bff   : > { %v2236_v41 = vadd.f32 %v2230_v39, %v2088_v27  ;;  %v2819_v42 = vpop.f32.mrb[57].mxu0 }
0x1c00   : > { %v2233_v43 = vpop.f32.mrb[58].mxu0 }
0x1c01   : > { %v2820_v44 = vpop.f32.mrb[59].mxu0  ;;  %v2245_v45 = vadd.f32 %v2539_v40, %v2236_v41 }
0x1c03   : > { %v2246_v46 = vsel %vm484_vm1, %v2245_v45, 0.0 }
0x1c04   : > { %2247 = vadd.xlane.f32.xlu1 %v2246_v46 }
0x1c91   : > { %v2248_v47 = vpop.xlane.xlu1 %2247 }
0x1c92   : > { %v2249_v48 = vmul.f32 0.03125, %v2248_v47 }
0x1c94   : > { %v2250_v49 = vsub.f32 %v2245_v45, %v2249_v48 }
0x1c96   : > { %v2251_v50 = vmul.f32 %v2250_v49, %v2250_v49 }
0x1c98   : > { %v2252_v51 = vsel %vm484_vm1, %v2251_v50, 0.0 }
0x1c99   : > { %2253 = vadd.xlane.f32.xlu1 %v2252_v51 }
0x1d26   : > { %v2254_v54 = vpop.xlane.xlu1 %2253 }
0x1d27   : > { %v2255_v55 = vmul.f32 0.03125, %v2254_v54 }
0x1d29   : > { %v2256_v56 = vadd.f32 1e-05, %v2255_v55 }
0x1d2b   : > { %2987 = vrsqrt.f32 %v2256_v56 }
0x1d35   : > { %v2988_v57 = vpop.eup %2987 }
0x1d36   : > { %v2258_v58 = vmul.f32 %v2988_v57, %v2250_v49 }
0x1d38   : > { %v2263_v59 = vpack.c.bf16 %v2258_v58, %v2258_v58 }
0x1d3a   : > { %2826 = vmatmul.mubr.msk.bf16.vlgmr.msra.gmra.mrb[60].mxu1 %vm484_vm1, %v2263_v59 }
0x1e0d   : > { %v2320_v0 = vpop.f32.mrb[60].mxu1 }
0x1e0e   : > { %v2321_v6 = vadd.f32 %v2540_v10, %v2320_v0  ;;  %v2827_v60 = vpop.f32.mrb[61].mxu1 }
0x1e0f   : > { %v2323_v62 = vpop.f32.mrb[62].mxu1 }
0x1e10   : > { %2326 = vst [vmem:[%s457_s9] sm:$0xff] %v2321_v6  ;;  %v2828_v63 = vpop.f32.mrb[63].mxu1 }
0x1e11   : > { %3144 = shalt.err (!%p3141_p0)
}
0x1e12   : > { %s3145_s4 = scalar_lea.hbm %s3870_s14, 128  ;;  %s3149_s15 = scalar_lea.hbm %s3969_s28, 256 }
0x1e13   : > { %p3146_p2 = scmp.ne.s32.totalorder %s3870_s14, %s3145_s4  ;;  %p3150_p10 = scmp.lt.u32.totalorder %s3870_s14, %s3969_s28 }
0x1e14   : > { %p3151_p11 = scmp.lt.u32.totalorder %s3149_s15, %s3145_s4  ;;  %p3153_p6 = scmp.lt.u32.totalorder %s3145_s4, %s3870_s14 }
0x1e15   : > { %p3147_p8 = pnand %p3146_p2, %p3970_p5 }
0x1e16   : > { %p3152_p1 = por %p3151_p11, %p3150_p10 }
0x1e17   : > { %p3148_p4 = pneg %p3147_p8 }
0x1e18   : > { %p3154_p7 = por %p3153_p6, %p3152_p1 }
0x1e1a   : > { %p3155_p9 = pnand %p3154_p7, %p3148_p4 }
0x1e1c   : > { %3158 = shalt.err (!%p3155_p9)
}
0x1e1d   : > { %2847 = dma.vmem_to_hbm [thread:$0]  (%p3970_p5), %s3872_s26, 128, %s3870_s14, %s2328_s23  }
0x1e1e PF: > { %s2353_s30 = sand.u32 1, %s3193_s17   ;;  %p3971_p12 = scmp.ne.s32.totalorder %s3952_s25, 0 }
0x1e1f   : > { %p3972_p3 = scmp.ge.s32.totalorder %s3205_s20, 2  ;;  %s2354_s16 = scalar_lea.sflag [#allocation4], %s2353_s30 }
0x1e21   : > { %p2867_p13 = pnand %p3972_p3, %p3971_p12 }
0x1e23   : > { %3188 = dma.done.wait (!%p2867_p13), %s2354_s16, 128  }
0x1e24   : > { %3190 = vsyncadd (!%p2867_p13), %s2354_s16, 4294967168  ;;  %p26_p0 = scmp.ge.s32.totalorder %s3437_s27, 4   ;;  %s3973_s17 = smov %s3197_s18 }
0x1e25   : > { %s3974_s18 = smov %s3201_s19  ;;  %s3975_s19 = smov %s3448_s13 }
0x1e26   : > { %s3976_s20 = smov %s3437_s27  ;;  %28 = sbr.rel (!%p26_p0) target bundleno = 12 (0xc), region = 133 }
0x1e2d   :  { %2359 = vsyncpa [#allocation3], 1 }
0x1e2e   :  { %2361 = vsyncpa [#allocation3 + $0x1], 1 }
0x1e2f   :  { %2362 = vsyncpa [#allocation6], 1 }
0x1e30   :  { %2363 = vsyncpa [#allocation9], 1 }
0x1e31   :  { %2364 = vsyncpa [#allocation4], 1 }
0x1e32   :  { %2366 = vsyncpa [#allocation4 + $0x1], 1 }

</bundles_post_ra>
